<compile_context>
chip_gen: v7x
topology: tpu7x:2x2x1
jax: 0.10.0
libtpu: 0.0.40
codegen_flags: <defaults>
</compile_context>

<pallas_src>
import functools
import math

import jax
import jax.numpy as jnp
from jax.experimental import pallas as pl
from jax.experimental.pallas import tpu as pltpu

D = 768            # in_features (fixed by M_RBF = eye(768) in the module)
TILE_M_MAX = 256   # safe for v5e/v6e/v7x default scoped VMEM


def _round_up(a, b):
    return (a + b - 1) // b * b


def rbf_kernel(x_ref, m_ref, g_ref, cmc_ref, negbeta_ref, w_ref, b_ref, o_ref):
    # x_ref:  (TM, D) f32       m_ref: (D, D) bf16     g_ref: (D, C) bf16
    # cmc_ref/negbeta_ref: (1, C) f32
    # w_ref:  (C, O) bf16       b_ref: (1, O) f32      o_ref: (TM, O) f32
    x = x_ref[...]
    xb = x.astype(jnp.bfloat16)

    # x @ M  (MXU, bf16 operands, f32 accumulation)
    x_m = jnp.dot(xb, m_ref[...], preferred_element_type=jnp.float32)
    # xMx = sum(x * (x @ M), -1)  (VPU mul + XLU lane reduce, f32)
    xmx = jnp.sum(x * x_m, axis=-1, keepdims=True)
    # xMc = x @ (M @ centers.T)   (MXU)
    xmc = jnp.dot(xb, g_ref[...], preferred_element_type=jnp.float32)

    dist = xmx + cmc_ref[...] - 2.0 * xmc
    phi = jnp.exp(negbeta_ref[...] * dist)          # EUP, f32

    out = jnp.dot(phi.astype(jnp.bfloat16), w_ref[...],
                  preferred_element_type=jnp.float32) + b_ref[...]
    o_ref[...] = out.astype(o_ref.dtype)


def prepare_params(centers, m_rbf, beta, w_fc, b_fc):
    """Parameter-only prep, hoisted out of the per-call path (do this once)."""
    centers_m = centers @ m_rbf                                  # (C, D) f32
    cmc = jnp.sum(centers * centers_m, axis=-1)[None, :]         # (1, C)
    g = m_rbf @ centers.T                                        # (D, C)
    return dict(
        m=m_rbf.astype(jnp.bfloat16),
        g=g.astype(jnp.bfloat16),
        cmc=cmc.astype(jnp.float32),
        negbeta=(-beta)[None, :].astype(jnp.float32),
        w=w_fc.astype(jnp.bfloat16),      # (C, O), math-friendly (in, out) layout
        b=b_fc[None, :].astype(jnp.float32),
    )


@functools.partial(jax.jit, static_argnames=())
def rbf_forward(x, params):
    """x: (..., D) float32.  Returns (..., out_features)."""
    *lead, d = x.shape
    assert d == D
    m = 1
    for s in lead:
        m *= s

    tile_m = min(TILE_M_MAX, _round_up(max(m, 1), 8))
    m_pad = _round_up(m, tile_m)

    x2d = x.reshape(m, d).astype(jnp.float32)
    if m_pad != m:
        x2d = jnp.pad(x2d, ((0, m_pad - m), (0, 0)))

    c = params["g"].shape[1]
    o = params["w"].shape[1]
    grid = (m_pad // tile_m,)

    out2d = pl.pallas_call(
        rbf_kernel,
        out_shape=jax.ShapeDtypeStruct((m_pad, o), jnp.float32),
        grid=grid,
        in_specs=[
            pl.BlockSpec((tile_m, d), lambda i: (i, 0)),   # x tile (pipelined)
            pl.BlockSpec((d, d), lambda i: (0, 0)),        # M_RBF (resident)
            pl.BlockSpec((d, c), lambda i: (0, 0)),        # G = M @ centers.T
            pl.BlockSpec((1, c), lambda i: (0, 0)),        # cMc
            pl.BlockSpec((1, c), lambda i: (0, 0)),        # -beta
            pl.BlockSpec((c, o), lambda i: (0, 0)),        # fc weight
            pl.BlockSpec((1, o), lambda i: (0, 0)),        # fc bias
        ],
        out_specs=pl.BlockSpec((tile_m, o), lambda i: (i, 0)),
        compiler_params=pltpu.CompilerParams(
            dimension_semantics=("parallel",)),
    )(x2d, params["m"], params["g"], params["cmc"], params["negbeta"],
      params["w"], params["b"])

    return out2d[:m].reshape(*lead, o)


def ref_forward(x, centers, m_rbf, beta, w_fc, b_fc):
    """Pure-JAX f32 reference with the module's exact math."""
    x_m = x @ m_rbf
    xmx = jnp.sum(x * x_m, axis=-1, keepdims=True)
    centers_m = centers @ m_rbf
    cmc = jnp.sum(centers * centers_m, axis=-1)
    xmc = x_m @ centers.T
    dist = xmx + cmc - 2.0 * xmc
    phi = jnp.exp(-beta[None, :] * dist)
    return phi @ w_fc + b_fc


if __name__ == "__main__":
    key = jax.random.PRNGKey(0)
    kx, kc, km, kw, kb = jax.random.split(key, 5)

    B, S = 2, 8
    C = D   # center_feature defaults to in_features
    O = D   # out_features defaults to in_features

    # Small deterministic example. x/centers are scaled so beta*distances stays
    # O(1) and the exp / fc path is numerically exercised (unscaled randn would
    # drive every RBF activation to exactly 0).
    x = 0.05 * jax.random.normal(kx, (B, S, D), jnp.float32)
    centers = 0.05 * jax.random.normal(kc, (C, D), jnp.float32)
    # Module initializes M_RBF = eye(768); add a small perturbation so the
    # general (non-identity) matmul path is actually tested.
    m_rbf = jnp.eye(D, dtype=jnp.float32) + 0.01 * jax.random.normal(km, (D, D), jnp.float32)
    beta = jnp.full((C,), 0.1, jnp.float32)
    bound = 1.0 / math.sqrt(C)
    w_fc = jax.random.uniform(kw, (C, O), jnp.float32, -bound, bound)
    b_fc = jax.random.uniform(kb, (O,), jnp.float32, -bound, bound)

    params = prepare_params(centers, m_rbf, beta, w_fc, b_fc)
    params = jax.tree_util.tree_map(jax.block_until_ready, params)

    out = rbf_forward(x, params)
    jax.block_until_ready(out)

    ref = ref_forward(x.reshape(-1, D), centers, m_rbf, beta, w_fc, b_fc)
    ref = ref.reshape(B, S, O)

    assert out.shape == (B, S, O)
    # Tolerance covers bf16 MXU operands (f32 accumulation) vs. the f32 reference.
    assert jnp.allclose(out, ref, atol=2e-2, rtol=2e-2), (
        float(jnp.max(jnp.abs(out - ref))))

    # TODO(synk): nn.Dropout(p=0.0) is the identity and is omitted; the
    # beta_mean_history bookkeeping is host-side Python state, not forward math.
    print("KERNEL_OK")
</pallas_src>

<mosaic_0001>
module attributes {stable_mosaic.version = 11 : i64} {
  func.func @rbf_kernel(%arg0: i32, %arg1: memref<16x768xf32, #tpu.memory_space<vmem>>, %arg2: memref<768x768xbf16, #tpu.memory_space<vmem>>, %arg3: memref<768x768xbf16, #tpu.memory_space<vmem>>, %arg4: memref<1x768xf32, #tpu.memory_space<vmem>>, %arg5: memref<1x768xf32, #tpu.memory_space<vmem>>, %arg6: memref<768x768xbf16, #tpu.memory_space<vmem>>, %arg7: memref<1x768xf32, #tpu.memory_space<vmem>>, %arg8: memref<16x768xf32, #tpu.memory_space<vmem>>) attributes {dimension_semantics = [#tpu.dimension_semantics<parallel>], iteration_bounds = array<i64: 1>, scalar_prefetch = 0 : i64, scratch_operands = 0 : i64, tpu.core_type = #tpu.core_type<tc>, window_params = [{transform_indices = @transform_0, window_bounds = array<i64: 16, 768>}, {pipeline_mode = #tpu.pipeline_mode<synchronous>, transform_indices = @transform_1, window_bounds = array<i64: 768, 768>}, {pipeline_mode = #tpu.pipeline_mode<synchronous>, transform_indices = @transform_2, window_bounds = array<i64: 768, 768>}, {pipeline_mode = #tpu.pipeline_mode<synchronous>, transform_indices = @transform_3, window_bounds = array<i64: 1, 768>}, {pipeline_mode = #tpu.pipeline_mode<synchronous>, transform_indices = @transform_4, window_bounds = array<i64: 1, 768>}, {pipeline_mode = #tpu.pipeline_mode<synchronous>, transform_indices = @transform_5, window_bounds = array<i64: 768, 768>}, {pipeline_mode = #tpu.pipeline_mode<synchronous>, transform_indices = @transform_6, window_bounds = array<i64: 1, 768>}, {transform_indices = @transform_7, window_bounds = array<i64: 16, 768>}]} {
    %c0 = arith.constant 0 : index
    %c0_0 = arith.constant 0 : index
    %0 = vector.load %arg1[%c0, %c0_0] : memref<16x768xf32, #tpu.memory_space<vmem>>, vector<16x768xf32>
    %1 = arith.truncf %0 : vector<16x768xf32> to vector<16x768xbf16>
    %c0_1 = arith.constant 0 : index
    %c0_2 = arith.constant 0 : index
    %2 = vector.load %arg2[%c0_1, %c0_2] : memref<768x768xbf16, #tpu.memory_space<vmem>>, vector<768x768xbf16>
    %cst = arith.constant dense<0.000000e+00> : vector<16x768xf32>
    %3 = tpu.matmul %1, %2, %cst {dimension_numbers = #tpu.dot_dimension_numbers<[1], [0], [0], [1], [0, 0, 1, 1], [], []>} : vector<16x768xbf16>, vector<768x768xbf16>, vector<16x768xf32> -> vector<16x768xf32>
    %4 = arith.mulf %0, %3 : vector<16x768xf32>
    %cst_3 = arith.constant dense<0.000000e+00> : vector<16xf32>
    %5 = vector.multi_reduction <add>, %4, %cst_3 [1] : vector<16x768xf32> to vector<16xf32>
    %6 = vector.shape_cast %5 : vector<16xf32> to vector<16x1xf32>
    %c0_4 = arith.constant 0 : index
    %c0_5 = arith.constant 0 : index
    %7 = vector.load %arg3[%c0_4, %c0_5] : memref<768x768xbf16, #tpu.memory_space<vmem>>, vector<768x768xbf16>
    %cst_6 = arith.constant dense<0.000000e+00> : vector<16x768xf32>
    %8 = tpu.matmul %1, %7, %cst_6 {dimension_numbers = #tpu.dot_dimension_numbers<[1], [0], [0], [1], [0, 0, 1, 1], [], []>} : vector<16x768xbf16>, vector<768x768xbf16>, vector<16x768xf32> -> vector<16x768xf32>
    %c0_7 = arith.constant 0 : index
    %c0_8 = arith.constant 0 : index
    %9 = vector.load %arg4[%c0_7, %c0_8] : memref<1x768xf32, #tpu.memory_space<vmem>>, vector<1x768xf32>
    %10 = vector.broadcast %6 : vector<16x1xf32> to vector<16x768xf32>
    %11 = vector.broadcast %9 : vector<1x768xf32> to vector<16x768xf32>
    %12 = arith.addf %10, %11 : vector<16x768xf32>
    %cst_9 = arith.constant 2.000000e+00 : f32
    %13 = vector.broadcast %cst_9 : f32 to vector<16x768xf32>
    %14 = arith.mulf %13, %8 : vector<16x768xf32>
    %15 = arith.subf %12, %14 : vector<16x768xf32>
    %c0_10 = arith.constant 0 : index
    %c0_11 = arith.constant 0 : index
    %16 = vector.load %arg5[%c0_10, %c0_11] : memref<1x768xf32, #tpu.memory_space<vmem>>, vector<1x768xf32>
    %17 = vector.broadcast %16 : vector<1x768xf32> to vector<16x768xf32>
    %18 = arith.mulf %17, %15 : vector<16x768xf32>
    %19 = math.exp %18 : vector<16x768xf32>
    %20 = arith.truncf %19 : vector<16x768xf32> to vector<16x768xbf16>
    %c0_12 = arith.constant 0 : index
    %c0_13 = arith.constant 0 : index
    %21 = vector.load %arg6[%c0_12, %c0_13] : memref<768x768xbf16, #tpu.memory_space<vmem>>, vector<768x768xbf16>
    %cst_14 = arith.constant dense<0.000000e+00> : vector<16x768xf32>
    %22 = tpu.matmul %20, %21, %cst_14 {dimension_numbers = #tpu.dot_dimension_numbers<[1], [0], [0], [1], [0, 0, 1, 1], [], []>} : vector<16x768xbf16>, vector<768x768xbf16>, vector<16x768xf32> -> vector<16x768xf32>
    %c0_15 = arith.constant 0 : index
    %c0_16 = arith.constant 0 : index
    %23 = vector.load %arg7[%c0_15, %c0_16] : memref<1x768xf32, #tpu.memory_space<vmem>>, vector<1x768xf32>
    %24 = vector.broadcast %23 : vector<1x768xf32> to vector<16x768xf32>
    %25 = arith.addf %22, %24 : vector<16x768xf32>
    %c0_17 = arith.constant 0 : index
    %c0_18 = arith.constant 0 : index
    %26 = vector.load %arg8[%c0_17, %c0_18] : memref<16x768xf32, #tpu.memory_space<vmem>>, vector<16x768xf32>
    tpu.vector_store %arg8[%c0_17, %c0_18], %25 {strides = array<i32>} : memref<16x768xf32, #tpu.memory_space<vmem>>, vector<16x768xf32>,
    return
  }
  func.func @transform_0(%arg0: i32) -> (i32, i32) {
    %c0_i32 = arith.constant 0 : i32
    %c0_i32_0 = arith.constant 0 : i32
    return %arg0, %c0_i32 : i32, i32
  }
  func.func @transform_1(%arg0: i32) -> (i32, i32) {
    %c0_i32 = arith.constant 0 : i32
    %c0_i32_0 = arith.constant 0 : i32
    %c0_i32_1 = arith.constant 0 : i32
    return %c0_i32, %c0_i32_0 : i32, i32
  }
  func.func @transform_2(%arg0: i32) -> (i32, i32) {
    %c0_i32 = arith.constant 0 : i32
    %c0_i32_0 = arith.constant 0 : i32
    %c0_i32_1 = arith.constant 0 : i32
    return %c0_i32, %c0_i32_0 : i32, i32
  }
  func.func @transform_3(%arg0: i32) -> (i32, i32) {
    %c0_i32 = arith.constant 0 : i32
    %c0_i32_0 = arith.constant 0 : i32
    %c0_i32_1 = arith.constant 0 : i32
    return %c0_i32, %c0_i32_0 : i32, i32
  }
  func.func @transform_4(%arg0: i32) -> (i32, i32) {
    %c0_i32 = arith.constant 0 : i32
    %c0_i32_0 = arith.constant 0 : i32
    %c0_i32_1 = arith.constant 0 : i32
    return %c0_i32, %c0_i32_0 : i32, i32
  }
  func.func @transform_5(%arg0: i32) -> (i32, i32) {
    %c0_i32 = arith.constant 0 : i32
    %c0_i32_0 = arith.constant 0 : i32
    %c0_i32_1 = arith.constant 0 : i32
    return %c0_i32, %c0_i32_0 : i32, i32
  }
  func.func @transform_6(%arg0: i32) -> (i32, i32) {
    %c0_i32 = arith.constant 0 : i32
    %c0_i32_0 = arith.constant 0 : i32
    %c0_i32_1 = arith.constant 0 : i32
    return %c0_i32, %c0_i32_0 : i32, i32
  }
  func.func @transform_7(%arg0: i32) -> (i32, i32) {
    %c0_i32 = arith.constant 0 : i32
    %c0_i32_0 = arith.constant 0 : i32
    return %arg0, %c0_i32 : i32, i32
  }
}

</mosaic_0001>

<bundles_post_ra>
// kernel: rbf_forward.1
= control target key start
LH: loop header
LB: loop body
LE: loop exit
PB: predicated region body
PF: predicated region fallthrough
CT: control target
= control target key end

     0   :  { %12 = vsyncpa [#allocation3], 0  ;;  %s9542_s0 = inlined_call_operand.hbm [shape: f32[16,768], index: 0, kind: input, shape index: {}]   ;;  %s9543_s1 = inlined_call_operand.hbm [shape: bf16[768,768], index: 1, kind: input, shape index: {}]   ;;  %s9544_s2 = inlined_call_operand.hbm [shape: bf16[768,768], index: 2, kind: input, shape index: {}]   ;;  %s9545_s3 = inlined_call_operand.hbm [shape: f32[1,768], index: 3, kind: input, shape index: {}]   ;;  %s9546_s4 = inlined_call_operand.hbm [shape: f32[1,768], index: 4, kind: input, shape index: {}]   ;;  %s9547_s5 = inlined_call_operand.hbm [shape: bf16[768,768], index: 5, kind: input, shape index: {}]   ;;  %s9548_s6 = inlined_call_operand.hbm [shape: f32[1,768], index: 6, kind: input, shape index: {}]   ;;  %s9549_s7 = inlined_call_operand.hbm [shape: f32[16,768], index: 7, kind: output, shape index: {}]  }
   0x1   :  { %13 = vsyncpa [#allocation6], 0 }
   0x2   :  { %14 = vsyncpa [#allocation9], 0 }
   0x3   :  { %15 = vsyncpa [#allocation12], 0 }
   0x4   :  { %16 = vsyncpa [#allocation4], 0  ;;  %s9189_s24 = smov [#allocation5]   ;;  %s9003_s28 = scalar_lea.hbm %s9543_s1, 36864 }
   0x5   :  { %s34_s25 = sshll.u32 %s9189_s24, 4  ;;  %p9004_p0 = scmp.ne.s32.totalorder %s9543_s1, %s9003_s28  ;;  %s35_s25 = int_to_ptr.vmem [resolvable:$true] %s34_s25 }
   0x6   :  { %p9007_p1 = scmp.lt.u32.totalorder %s9003_s28, %s9543_s1 }
   0x8   :  { %p9009_p2 = pnand %p9007_p1, %p9004_p0 }
   0xa   :  { %9012 = shalt.err (!%p9009_p2)
}
   0xb   :  { %s9013_s10 = scalar_lea.vmem %s35_s25, 36864  ;;  %p9018_p4 = scmp.lt.s32.totalorder %s35_s25, %s35_s25 }
   0xc   :  { %p9014_p3 = scmp.ne.s32.totalorder %s35_s25, %s9013_s10  ;;  %p9019_p5 = scmp.lt.s32.totalorder %s9013_s10, %s9013_s10 }
   0xe   :  { %p9020_p6 = por %p9019_p5, %p9018_p4 }
  0x10   :  { %p9021_p7 = pnand %p9020_p6, %p9014_p3 }
  0x12   :  { %9024 = shalt.err (!%p9021_p7)
}
  0x13   :  { %s9190_s11 = smov 384   ;;  %s9191_s12 = smov 24  }
  0x14   :  { %40 = dma.hbm_to_vmem [thread:$0]  %s9543_s1, 36864, %s35_s25, [#allocation6], %s9190_s11, %s9190_s11, %s9191_s12  }
  0x15   :  { %s9192_s15 = smov [#allocation8]   ;;  %s9193_s17 = smov [#allocation11]  }
  0x16   :  { %s59_s16 = sshll.u32 %s9192_s15, 4  ;;  %s78_s18 = sshll.u32 %s9193_s17, 4  ;;  %s60_s16 = int_to_ptr.vmem [resolvable:$true] %s59_s16  ;;  %s79_s18 = int_to_ptr.vmem [resolvable:$true] %s78_s18 }
  0x17   :  { %s9025_s21 = scalar_lea.hbm %s9545_s3, 96 }
  0x18   :  { %p9026_p8 = scmp.ne.s32.totalorder %s9545_s3, %s9025_s21  ;;  %p9029_p9 = scmp.lt.u32.totalorder %s9025_s21, %s9545_s3 }
  0x1a   :  { %p9031_p10 = pnand %p9029_p9, %p9026_p8 }
  0x1c   :  { %9034 = shalt.err (!%p9031_p10)
}
  0x1d   :  { %s9035_s1 = scalar_lea.vmem %s60_s16, 96  ;;  %p9040_p12 = scmp.lt.s32.totalorder %s60_s16, %s60_s16 }
  0x1e   :  { %p9036_p11 = scmp.ne.s32.totalorder %s60_s16, %s9035_s1  ;;  %p9041_p13 = scmp.lt.s32.totalorder %s9035_s1, %s9035_s1 }
  0x20   :  { %p9042_p0 = por %p9041_p13, %p9040_p12 }
  0x22   :  { %p9043_p1 = pnand %p9042_p0, %p9036_p11 }
  0x24   :  { %9046 = shalt.err (!%p9043_p1)
}
  0x25   :  { %62 = dma.hbm_to_vmem [thread:$0]  %s9545_s3, 96, %s60_s16, [#allocation9]  }
  0x26   :  { %s9047_s30 = scalar_lea.hbm %s9547_s5, 36864 }
  0x27   :  { %p9048_p2 = scmp.ne.s32.totalorder %s9547_s5, %s9047_s30  ;;  %p9051_p3 = scmp.lt.u32.totalorder %s9047_s30, %s9547_s5 }
  0x29   :  { %p9053_p4 = pnand %p9051_p3, %p9048_p2 }
  0x2b   :  { %9056 = shalt.err (!%p9053_p4)
}
  0x2c   :  { %s9057_s14 = scalar_lea.vmem %s79_s18, 36864  ;;  %p9062_p6 = scmp.lt.s32.totalorder %s79_s18, %s79_s18 }
  0x2d   :  { %p9058_p5 = scmp.ne.s32.totalorder %s79_s18, %s9057_s14  ;;  %p9063_p7 = scmp.lt.s32.totalorder %s9057_s14, %s9057_s14 }
  0x2f   :  { %p9064_p8 = por %p9063_p7, %p9062_p6 }
  0x31   :  { %p9065_p9 = pnand %p9064_p8, %p9058_p5 }
  0x33   :  { %9068 = shalt.err (!%p9065_p9)
}
  0x34   :  { %84 = dma.hbm_to_vmem [thread:$0]  %s9547_s5, 36864, %s79_s18, [#allocation12], %s9190_s11, %s9190_s11, %s9191_s12  }
  0x35   :  { %s9194_s16 = smov [#allocation2]   ;;  %s9069_s21 = scalar_lea.hbm %s9542_s0, 1536 }
  0x36   :  { %s22_s17 = sshll.u32 %s9194_s16, 4  ;;  %p9070_p10 = scmp.ne.s32.totalorder %s9542_s0, %s9069_s21  ;;  %s23_s17 = int_to_ptr.vmem [resolvable:$true] %s22_s17 }
  0x37   :  { %p9073_p11 = scmp.lt.u32.totalorder %s9069_s21, %s9542_s0 }
  0x39   :  { %p9075_p12 = pnand %p9073_p11, %p9070_p10 }
  0x3b   :  { %9078 = shalt.err (!%p9075_p12)
}
  0x3c   :  { %s9079_s1 = scalar_lea.vmem %s23_s17, 1536  ;;  %p9084_p0 = scmp.lt.s32.totalorder %s23_s17, %s23_s17 }
  0x3d   :  { %p9080_p13 = scmp.ne.s32.totalorder %s23_s17, %s9079_s1  ;;  %p9085_p1 = scmp.lt.s32.totalorder %s9079_s1, %s9079_s1 }
  0x3f   :  { %p9086_p2 = por %p9085_p1, %p9084_p0 }
  0x41   :  { %p9087_p3 = pnand %p9086_p2, %p9080_p13 }
  0x43   :  { %9090 = shalt.err (!%p9087_p3)
}
  0x44   :  { %s9195_s5 = smov 768   ;;  %s9196_s18 = smov 48  }
  0x45   :  { %28 = dma.hbm_to_vmem [thread:$0]  %s9542_s0, 1536, %s23_s17, [#allocation3], %s9195_s5, %s9195_s5, %s9196_s18  }
  0x46   :  { %s9197_s28 = smov [#allocation7]   ;;  %s9198_s30 = smov [#allocation10]  }
  0x47   :  { %s46_s29 = sshll.u32 %s9197_s28, 4  ;;  %s69_s8 = sshll.u32 %s9198_s30, 4  ;;  %s47_s29 = int_to_ptr.vmem [resolvable:$true] %s46_s29  ;;  %s70_s8 = int_to_ptr.vmem [resolvable:$true] %s69_s8 }
  0x48   :  { %s9091_s13 = scalar_lea.hbm %s9544_s2, 36864 }
  0x49   :  { %p9092_p4 = scmp.ne.s32.totalorder %s9544_s2, %s9091_s13  ;;  %p9095_p5 = scmp.lt.u32.totalorder %s9091_s13, %s9544_s2 }
  0x4b   :  { %p9097_p6 = pnand %p9095_p5, %p9092_p4 }
  0x4d   :  { %9100 = shalt.err (!%p9097_p6)
}
  0x4e   :  { %s9101_s0 = scalar_lea.vmem %s47_s29, 36864  ;;  %p9106_p8 = scmp.lt.s32.totalorder %s47_s29, %s47_s29 }
  0x4f   :  { %p9102_p7 = scmp.ne.s32.totalorder %s47_s29, %s9101_s0  ;;  %p9107_p9 = scmp.lt.s32.totalorder %s9101_s0, %s9101_s0 }
  0x51   :  { %p9108_p10 = por %p9107_p9, %p9106_p8 }
  0x53   :  { %p9109_p11 = pnand %p9108_p10, %p9102_p7 }
  0x55   :  { %9112 = shalt.err (!%p9109_p11)
}
  0x56   :  { %52 = dma.hbm_to_vmem [thread:$0]  %s9544_s2, 36864, %s47_s29, [#allocation6], %s9190_s11, %s9190_s11, %s9191_s12  }
  0x57   :  { %s9113_s22 = scalar_lea.hbm %s9546_s4, 96 }
  0x58   :  { %p9114_p12 = scmp.ne.s32.totalorder %s9546_s4, %s9113_s22  ;;  %p9117_p13 = scmp.lt.u32.totalorder %s9113_s22, %s9546_s4 }
  0x5a   :  { %p9119_p0 = pnand %p9117_p13, %p9114_p12 }
  0x5c   :  { %9122 = shalt.err (!%p9119_p0)
}
  0x5d   :  { %s9123_s25 = scalar_lea.vmem %s70_s8, 96  ;;  %p9128_p2 = scmp.lt.s32.totalorder %s70_s8, %s70_s8 }
  0x5e   :  { %p9124_p1 = scmp.ne.s32.totalorder %s70_s8, %s9123_s25  ;;  %p9129_p3 = scmp.lt.s32.totalorder %s9123_s25, %s9123_s25 }
  0x60   :  { %p9130_p4 = por %p9129_p3, %p9128_p2 }
  0x62   :  { %p9131_p5 = pnand %p9130_p4, %p9124_p1 }
  0x64   :  { %9134 = shalt.err (!%p9131_p5)
}
  0x65   :  { %72 = dma.hbm_to_vmem [thread:$0]  %s9546_s4, 96, %s70_s8, [#allocation9]  }
  0x66   :  { %s9199_s12 = smov [#allocation13]   ;;  %s9135_s30 = scalar_lea.hbm %s9548_s6, 96 }
  0x67   :  { %s91_s27 = sshll.u32 %s9199_s12, 4  ;;  %p9136_p6 = scmp.ne.s32.totalorder %s9548_s6, %s9135_s30  ;;  %s92_s27 = int_to_ptr.vmem [resolvable:$true] %s91_s27 }
  0x68   :  { %p9139_p7 = scmp.lt.u32.totalorder %s9135_s30, %s9548_s6 }
  0x6a   :  { %p9141_p8 = pnand %p9139_p7, %p9136_p6 }
  0x6c   :  { %9144 = shalt.err (!%p9141_p8)
}
  0x6d   :  { %s9145_s3 = scalar_lea.vmem %s92_s27, 96  ;;  %p9150_p10 = scmp.lt.s32.totalorder %s92_s27, %s92_s27 }
  0x6e   :  { %p9146_p9 = scmp.ne.s32.totalorder %s92_s27, %s9145_s3  ;;  %p9151_p11 = scmp.lt.s32.totalorder %s9145_s3, %s9145_s3 }
  0x70   :  { %p9152_p12 = por %p9151_p11, %p9150_p10 }
  0x72   :  { %p9153_p13 = pnand %p9152_p12, %p9146_p9 }
  0x74   :  { %9156 = shalt.err (!%p9153_p13)
}
  0x75   :  { %94 = dma.hbm_to_vmem [thread:$0]  %s9548_s6, 96, %s92_s27, [#allocation12]  }
  0x76   :  { %9179 = dma.done.wait [#allocation3], 1536  }
  0x77   :  { %9180 = vsyncadd [#allocation3], 4294965760 }
  0x78   :  { %9181 = dma.done.wait [#allocation6], 73728  }
  0x79   :  { %9182 = vsyncadd [#allocation6], 4294893568 }
  0x7a   :  { %9183 = dma.done.wait [#allocation9], 192  }
  0x7b   :  { %9184 = vsyncadd [#allocation9], 4294967104 }
  0x7c   :  { %9185 = dma.done.wait [#allocation12], 36960  }
  0x7d   :  { %9186 = vsyncadd [#allocation12], 4294930336  ;;  %v7671_v0 = vld [vmem:[#allocation5 + $0x4] ss:$24 sps:$4 sm:$0xff]   ;;  %v7675_v2 = vld [vmem:[#allocation5] ss:$24 sps:$4 sm:$0xff]  }
  0x7e   :  { %v7673_v1 = vld [vmem:[#allocation5 + $0x304] ss:$24 sps:$4 sm:$0xff]   ;;  %1862 = vmatprep.subr.bf16.mxu1 %v7671_v0  ;;  %v7676_v3 = vld [vmem:[#allocation5 + $0x300] ss:$24 sps:$4 sm:$0xff]   ;;  %v7677_v4 = vld [vmem:[#allocation5 + $0x34] ss:$24 sps:$4 sm:$0xff]  }
  0x7f   :  { %1905 = vmatprep.subr.bf16.mxu0 %v7673_v1  ;;  %1863 = vmatpush1.bf16.msra.mxu1 %v7675_v2  ;;  %v7679_v5 = vld [vmem:[#allocation5 + $0x334] ss:$24 sps:$4 sm:$0xff]   ;;  %v7681_v6 = vld [vmem:[#allocation5 + $0x30] ss:$24 sps:$4 sm:$0xff]   ;;  %v7683_v8 = vld [vmem:[#allocation5 + $0x64] ss:$24 sps:$4 sm:$0xff]  }
  0x80   :  { %1906 = vmatpush1.bf16.msra.mxu0 %v7676_v3  ;;  %1864 = vmatprep.subr.bf16.mxu1 %v7677_v4  ;;  %v7682_v7 = vld [vmem:[#allocation5 + $0x330] ss:$24 sps:$4 sm:$0xff]   ;;  %v7685_v9 = vld [vmem:[#allocation5 + $0x364] ss:$24 sps:$4 sm:$0xff]   ;;  %v7687_v10 = vld [vmem:[#allocation5 + $0x60] ss:$24 sps:$4 sm:$0xff]  }
  0x81   :  { %1907 = vmatprep.subr.bf16.mxu0 %v7679_v5  ;;  %v7688_v11 = vld [vmem:[#allocation5 + $0x360] ss:$24 sps:$4 sm:$0xff]   ;;  %v7689_v12 = vld [vmem:[#allocation5 + $0x94] ss:$24 sps:$4 sm:$0xff]   ;;  %v7693_v14 = vld [vmem:[#allocation5 + $0x90] ss:$24 sps:$4 sm:$0xff]  }
  0x82   :  { %v7691_v13 = vld [vmem:[#allocation5 + $0x394] ss:$24 sps:$4 sm:$0xff]   ;;  %v7694_v15 = vld [vmem:[#allocation5 + $0x390] ss:$24 sps:$4 sm:$0xff]   ;;  %v7695_v16 = vld [vmem:[#allocation5 + $0xc4] ss:$24 sps:$4 sm:$0xff]  }
  0x83   :  { %1865 = vmatpush1.bf16.msra.mxu1 %v7681_v6  ;;  %v7697_v17 = vld [vmem:[#allocation5 + $0x3c4] ss:$24 sps:$4 sm:$0xff]   ;;  %v7699_v18 = vld [vmem:[#allocation5 + $0xc0] ss:$24 sps:$4 sm:$0xff]   ;;  %v7701_v20 = vld [vmem:[#allocation5 + $0xf4] ss:$24 sps:$4 sm:$0xff]  }
  0x84   :  { %1908 = vmatpush1.bf16.msra.mxu0 %v7682_v7  ;;  %1866 = vmatprep.subr.bf16.mxu1 %v7683_v8  ;;  %v7700_v19 = vld [vmem:[#allocation5 + $0x3c0] ss:$24 sps:$4 sm:$0xff]   ;;  %v7703_v21 = vld [vmem:[#allocation5 + $0x3f4] ss:$24 sps:$4 sm:$0xff]   ;;  %v7705_v22 = vld [vmem:[#allocation5 + $0xf0] ss:$24 sps:$4 sm:$0xff]  }
  0x85   :  { %1909 = vmatprep.subr.bf16.mxu0 %v7685_v9  ;;  %v7706_v23 = vld [vmem:[#allocation5 + $0x3f0] ss:$24 sps:$4 sm:$0xff]   ;;  %v7707_v24 = vld [vmem:[#allocation5 + $0x124] ss:$24 sps:$4 sm:$0xff]   ;;  %v7711_v26 = vld [vmem:[#allocation5 + $0x120] ss:$24 sps:$4 sm:$0xff]  }
  0x86   :  { %v7709_v25 = vld [vmem:[#allocation5 + $0x424] ss:$24 sps:$4 sm:$0xff]   ;;  %v7712_v27 = vld [vmem:[#allocation5 + $0x420] ss:$24 sps:$4 sm:$0xff]   ;;  %v7713_v28 = vld [vmem:[#allocation5 + $0x154] ss:$24 sps:$4 sm:$0xff]  }
  0x87   :  { %1867 = vmatpush1.bf16.msra.mxu1 %v7687_v10  ;;  %v7715_v29 = vld [vmem:[#allocation5 + $0x454] ss:$24 sps:$4 sm:$0xff]   ;;  %v7717_v30 = vld [vmem:[#allocation5 + $0x150] ss:$24 sps:$4 sm:$0xff]   ;;  %v7719_v32 = vld [vmem:[#allocation5 + $0x184] ss:$24 sps:$4 sm:$0xff]  }
  0x88   :  { %1910 = vmatpush1.bf16.msra.mxu0 %v7688_v11  ;;  %1868 = vmatprep.subr.bf16.mxu1 %v7689_v12  ;;  %v7718_v31 = vld [vmem:[#allocation5 + $0x450] ss:$24 sps:$4 sm:$0xff]   ;;  %v7721_v33 = vld [vmem:[#allocation5 + $0x484] ss:$24 sps:$4 sm:$0xff]   ;;  %v7723_v34 = vld [vmem:[#allocation5 + $0x180] ss:$24 sps:$4 sm:$0xff]  }
  0x89   :  { %1911 = vmatprep.subr.bf16.mxu0 %v7691_v13  ;;  %v7724_v35 = vld [vmem:[#allocation5 + $0x480] ss:$24 sps:$4 sm:$0xff]   ;;  %v7725_v36 = vld [vmem:[#allocation5 + $0x1b4] ss:$24 sps:$4 sm:$0xff]   ;;  %v7729_v38 = vld [vmem:[#allocation5 + $0x1b0] ss:$24 sps:$4 sm:$0xff]  }
  0x8a   :  { %v7727_v37 = vld [vmem:[#allocation5 + $0x4b4] ss:$24 sps:$4 sm:$0xff]   ;;  %v7730_v39 = vld [vmem:[#allocation5 + $0x4b0] ss:$24 sps:$4 sm:$0xff]   ;;  %v7731_v40 = vld [vmem:[#allocation5 + $0x1e4] ss:$24 sps:$4 sm:$0xff]  }
  0x8b   :  { %1869 = vmatpush1.bf16.msra.mxu1 %v7693_v14  ;;  %v7733_v41 = vld [vmem:[#allocation5 + $0x4e4] ss:$24 sps:$4 sm:$0xff]   ;;  %v7735_v42 = vld [vmem:[#allocation5 + $0x1e0] ss:$24 sps:$4 sm:$0xff]   ;;  %v7737_v44 = vld [vmem:[#allocation5 + $0x214] ss:$24 sps:$4 sm:$0xff]  }
  0x8c   :  { %1912 = vmatpush1.bf16.msra.mxu0 %v7694_v15  ;;  %1870 = vmatprep.subr.bf16.mxu1 %v7695_v16  ;;  %v7736_v43 = vld [vmem:[#allocation5 + $0x4e0] ss:$24 sps:$4 sm:$0xff]   ;;  %v7739_v45 = vld [vmem:[#allocation5 + $0x514] ss:$24 sps:$4 sm:$0xff]   ;;  %v7741_v47 = vld [vmem:[#allocation5 + $0x210] ss:$24 sps:$4 sm:$0xff]  }
  0x8d   :  { %1913 = vmatprep.subr.bf16.mxu0 %v7697_v17  ;;  %v117_v46 = vld [vmem:[#allocation2 + $0x8] sm:$0xff]  ;;  %v123_v49 = vld [vmem:[#allocation2 + $0x38] sm:$0xff]  ;;  %v116_v6 = vld [vmem:[#allocation2] sm:$0xff]  ;;  %s9200_s6 = smov [#allocation14]  }
  0x8e   :  { %v7742_v48 = vld [vmem:[#allocation5 + $0x510] ss:$24 sps:$4 sm:$0xff]   ;;  %v9337_v50 = vpack.c.bf16 %v123_v49, %v117_v46  ;;  %v119_v51 = vld [vmem:[#allocation2 + $0x18] sm:$0xff]  ;;  %v7749_v58 = vld [vmem:[#allocation5 + $0x274] ss:$24 sps:$4 sm:$0xff]   ;;  %s6696_s15 = sshll.u32 %s9200_s6, 4  ;;  %s6697_s15 = int_to_ptr.vmem [resolvable:$true] %s6696_s15 }
  0x8f   :  { %1871 = vmatpush1.bf16.msra.mxu1 %v7699_v18  ;;  %v125_v52 = vld [vmem:[#allocation2 + $0x48] sm:$0xff]  ;;  %v7743_v53 = vld [vmem:[#allocation5 + $0x244] ss:$24 sps:$4 sm:$0xff]   ;;  %v7747_v56 = vld [vmem:[#allocation5 + $0x240] ss:$24 sps:$4 sm:$0xff]   ;;  %s9157_s16 = scalar_lea.vmem %s6697_s15, 1536  ;;  %p9162_p1 = scmp.lt.s32.totalorder %s6697_s15, %s6697_s15 }
  0x90   :  { %1914 = vmatpush1.bf16.msra.mxu0 %v7700_v19  ;;  %1872 = vmatprep.subr.bf16.mxu1 %v7701_v20  ;;  %v7745_v54 = vld [vmem:[#allocation5 + $0x544] ss:$24 sps:$4 sm:$0xff]   ;;  %v9339_v55 = vpack.c.bf16 %v125_v52, %v119_v51  ;;  %v7748_v57 = vld [vmem:[#allocation5 + $0x540] ss:$24 sps:$4 sm:$0xff]   ;;  %v7751_v59 = vld [vmem:[#allocation5 + $0x574] ss:$24 sps:$4 sm:$0xff]   ;;  %p9158_p0 = scmp.ne.s32.totalorder %s6697_s15, %s9157_s16  ;;  %p9163_p2 = scmp.lt.s32.totalorder %s9157_s16, %s9157_s16 }
  0x91   :  { %1915 = vmatprep.subr.bf16.mxu0 %v7703_v21  ;;  %1894 = vmatprep.mubr.bf16.mxu1 %v9337_v50  ;;  %v7753_v60 = vld [vmem:[#allocation5 + $0x270] ss:$24 sps:$4 sm:$0xff]   ;;  %v7755_v62 = vld [vmem:[#allocation5 + $0x2a4] ss:$24 sps:$4 sm:$0xff]   ;;  %v7759_v0 = vld [vmem:[#allocation5 + $0x2a0] ss:$24 sps:$4 sm:$0xff]  }
  0x92   :  { %1937 = vmatprep.mubr.bf16.mxu0 %v9339_v55  ;;  %v7754_v61 = vld [vmem:[#allocation5 + $0x570] ss:$24 sps:$4 sm:$0xff]   ;;  %v7757_v63 = vld [vmem:[#allocation5 + $0x5a4] ss:$24 sps:$4 sm:$0xff]   ;;  %v7760_v1 = vld [vmem:[#allocation5 + $0x5a0] ss:$24 sps:$4 sm:$0xff]   ;;  %p9164_p3 = por %p9163_p2, %p9162_p1 }
  0x93   :  { %1873 = vmatpush1.bf16.msra.mxu1 %v7705_v22  ;;  %v7761_v2 = vld [vmem:[#allocation5 + $0x2d4] ss:$24 sps:$4 sm:$0xff]   ;;  %v7765_v4 = vld [vmem:[#allocation5 + $0x2d0] ss:$24 sps:$4 sm:$0xff]   ;;  %v7769_v8 = vld [vmem:[#allocation5 + $0x604] ss:$24 sps:$4 sm:$0xff]  }
  0x94   :  { %1916 = vmatpush1.bf16.msra.mxu0 %v7706_v23  ;;  %1874 = vmatprep.subr.bf16.mxu1 %v7707_v24  ;;  %v7763_v3 = vld [vmem:[#allocation5 + $0x5d4] ss:$24 sps:$4 sm:$0xff]   ;;  %v7766_v5 = vld [vmem:[#allocation5 + $0x5d0] ss:$24 sps:$4 sm:$0xff]   ;;  %v124_v10 = vld [vmem:[#allocation2 + $0x40] sm:$0xff]  ;;  %p9165_p4 = pnand %p9164_p3, %p9158_p0 }
  0x95   :  { %1917 = vmatprep.subr.bf16.mxu0 %v7709_v25  ;;  %v122_v7 = vld [vmem:[#allocation2 + $0x30] sm:$0xff]  ;;  %v7772_v11 = vld [vmem:[#allocation5 + $0xc] ss:$24 sps:$4 sm:$0xff]   ;;  %v7767_v13 = vld [vmem:[#allocation5 + $0x600] ss:$24 sps:$4 sm:$0xff]  }
  0x96   :  { %v118_v9 = vld [vmem:[#allocation2 + $0x10] sm:$0xff]  ;;  %v9343_v12 = vpack.c.bf16 %v122_v7, %v116_v6  ;;  %v7770_v14 = vld [vmem:[#allocation5 + $0x8] ss:$24 sps:$4 sm:$0xff]   ;;  %v7781_v20 = vld [vmem:[#allocation5 + $0x664] ss:$24 sps:$4 sm:$0xff]  }
  0x97   :  { %1875 = vmatpush1.bf16.msra.mxu1 %v7711_v26  ;;  %v9345_v15 = vpack.c.bf16 %v124_v10, %v118_v9  ;;  %v7775_v16 = vld [vmem:[#allocation5 + $0x634] ss:$24 sps:$4 sm:$0xff]   ;;  %v7773_v18 = vld [vmem:[#allocation5 + $0x630] ss:$24 sps:$4 sm:$0xff]   ;;  %v7779_v22 = vld [vmem:[#allocation5 + $0x660] ss:$24 sps:$4 sm:$0xff]  }
  0x98   :  { %1918 = vmatpush1.bf16.msra.mxu0 %v7712_v27  ;;  %1876 = vmatprep.subr.bf16.mxu1 %v7713_v28  ;;  %v7778_v17 = vld [vmem:[#allocation5 + $0x3c] ss:$24 sps:$4 sm:$0xff]   ;;  %v7776_v19 = vld [vmem:[#allocation5 + $0x38] ss:$24 sps:$4 sm:$0xff]   ;;  %v7784_v21 = vld [vmem:[#allocation5 + $0x6c] ss:$24 sps:$4 sm:$0xff]  }
  0x99   :  { %1919 = vmatprep.subr.bf16.mxu0 %v7715_v29  ;;  %v7782_v23 = vld [vmem:[#allocation5 + $0x68] ss:$24 sps:$4 sm:$0xff]   ;;  %v7787_v24 = vld [vmem:[#allocation5 + $0x694] ss:$24 sps:$4 sm:$0xff]   ;;  %v7788_v27 = vld [vmem:[#allocation5 + $0x98] ss:$24 sps:$4 sm:$0xff]  }
  0x9a   :  { %v7790_v25 = vld [vmem:[#allocation5 + $0x9c] ss:$24 sps:$4 sm:$0xff]   ;;  %v7785_v26 = vld [vmem:[#allocation5 + $0x690] ss:$24 sps:$4 sm:$0xff]   ;;  %v7796_v29 = vld [vmem:[#allocation5 + $0xcc] ss:$24 sps:$4 sm:$0xff]  }
  0x9b   :  { %1877 = vmatpush1.bf16.msra.mxu1 %v7717_v30  ;;  %v7793_v28 = vld [vmem:[#allocation5 + $0x6c4] ss:$24 sps:$4 sm:$0xff]   ;;  %v7791_v30 = vld [vmem:[#allocation5 + $0x6c0] ss:$24 sps:$4 sm:$0xff]   ;;  %v7823_v52 = vld [vmem:[#allocation5 + $0x7b4] ss:$24 sps:$4 sm:$0xff]  }
  0x9c   :  { %1920 = vmatpush1.bf16.msra.mxu0 %v7718_v31  ;;  %1878 = vmatprep.subr.bf16.mxu1 %v7719_v32  ;;  %v7794_v31 = vld [vmem:[#allocation5 + $0xc8] ss:$24 sps:$4 sm:$0xff]   ;;  %v7799_v32 = vld [vmem:[#allocation5 + $0x6f4] ss:$24 sps:$4 sm:$0xff]   ;;  %v7812_v46 = vld [vmem:[#allocation5 + $0x158] ss:$24 sps:$4 sm:$0xff]  }
  0x9d   :  { %1921 = vmatprep.subr.bf16.mxu0 %v7721_v33  ;;  %v7802_v33 = vld [vmem:[#allocation5 + $0xfc] ss:$24 sps:$4 sm:$0xff]   ;;  %v7815_v49 = vld [vmem:[#allocation5 + $0x780] ss:$24 sps:$4 sm:$0xff]   ;;  %v7845_v7 = vld [vmem:[#allocation5 + $0x870] ss:$24 sps:$4 sm:$0xff]  }
  0x9e   :  { %v7818_v51 = vld [vmem:[#allocation5 + $0x188] ss:$24 sps:$4 sm:$0xff]   ;;  %v7850_v6 = vld [vmem:[#allocation5 + $0x27c] ss:$24 sps:$4 sm:$0xff]   ;;  %v7856_v10 = vld [vmem:[#allocation5 + $0x2ac] ss:$24 sps:$4 sm:$0xff]  }
  0x9f   :  { %1879 = vmatpush1.bf16.msra.mxu1 %v7723_v34  ;;  %v7797_v34 = vld [vmem:[#allocation5 + $0x6f0] ss:$24 sps:$4 sm:$0xff]   ;;  %v7853_v9 = vld [vmem:[#allocation5 + $0x8a4] ss:$24 sps:$4 sm:$0xff]  }
  0xa0   :  { %1922 = vmatpush1.bf16.msra.mxu0 %v7724_v35  ;;  %1880 = vmatprep.subr.bf16.mxu1 %v7725_v36  ;;  %v7800_v35 = vld [vmem:[#allocation5 + $0xf8] ss:$24 sps:$4 sm:$0xff]   ;;  %v7805_v36 = vld [vmem:[#allocation5 + $0x724] ss:$24 sps:$4 sm:$0xff]  }
  0xa1   :  { %1923 = vmatprep.subr.bf16.mxu0 %v7727_v37  ;;  %v7808_v37 = vld [vmem:[#allocation5 + $0x12c] ss:$24 sps:$4 sm:$0xff]  }
  0xa3   :  { %1881 = vmatpush1.bf16.msra.mxu1 %v7729_v38  ;;  %v7803_v38 = vld [vmem:[#allocation5 + $0x720] ss:$24 sps:$4 sm:$0xff]  }
  0xa4   :  { %1924 = vmatpush1.bf16.msra.mxu0 %v7730_v39  ;;  %1882 = vmatprep.subr.bf16.mxu1 %v7731_v40  ;;  %v7806_v39 = vld [vmem:[#allocation5 + $0x128] ss:$24 sps:$4 sm:$0xff]   ;;  %v7811_v40 = vld [vmem:[#allocation5 + $0x754] ss:$24 sps:$4 sm:$0xff]  }
  0xa5   :  { %1925 = vmatprep.subr.bf16.mxu0 %v7733_v41  ;;  %v121_v41 = vld [vmem:[#allocation2 + $0x28] sm:$0xff] }
  0xa7   :  { %1883 = vmatpush1.bf16.msra.mxu1 %v7735_v42  ;;  %v127_v42 = vld [vmem:[#allocation2 + $0x58] sm:$0xff] }
  0xa8   :  { %1926 = vmatpush1.bf16.msra.mxu0 %v7736_v43  ;;  %1884 = vmatprep.subr.bf16.mxu1 %v7737_v44  ;;  %v7814_v43 = vld [vmem:[#allocation5 + $0x15c] ss:$24 sps:$4 sm:$0xff]   ;;  %v9350_v44 = vpack.c.bf16 %v127_v42, %v121_v41  ;;  %v7890_v41 = vld [vmem:[#allocation5 + $0xd0] ss:$24 sps:$4 sm:$0xff]  }
  0xa9   :  { %1927 = vmatprep.subr.bf16.mxu0 %v7739_v45  ;;  %v7809_v45 = vld [vmem:[#allocation5 + $0x750] ss:$24 sps:$4 sm:$0xff]   ;;  %v7895_v42 = vld [vmem:[#allocation5 + $0x3fc] ss:$24 sps:$4 sm:$0xff]  }
  0xab   :  { %1885 = vmatpush1.bf16.msra.mxu1 %v7741_v47  ;;  %v7817_v47 = vld [vmem:[#allocation5 + $0x784] ss:$24 sps:$4 sm:$0xff]  }
  0xac   :  { %1928 = vmatpush1.bf16.msra.mxu0 %v7742_v48  ;;  %1886 = vmatprep.subr.bf16.mxu1 %v7743_v53  ;;  %v7820_v48 = vld [vmem:[#allocation5 + $0x18c] ss:$24 sps:$4 sm:$0xff]   ;;  %v7826_v53 = vld [vmem:[#allocation5 + $0x1bc] ss:$24 sps:$4 sm:$0xff]  }
  0xad   :  { %1929 = vmatprep.subr.bf16.mxu0 %v7745_v54  ;;  %v7821_v54 = vld [vmem:[#allocation5 + $0x7b0] ss:$24 sps:$4 sm:$0xff]  }
  0xaf   :  { %1887 = vmatpush1.bf16.msra.mxu1 %v7747_v56  ;;  %v7824_v56 = vld [vmem:[#allocation5 + $0x1b8] ss:$24 sps:$4 sm:$0xff]  }
  0xb0   :  { %1930 = vmatpush1.bf16.msra.mxu0 %v7748_v57  ;;  %1888 = vmatprep.subr.bf16.mxu1 %v7749_v58  ;;  %v7829_v57 = vld [vmem:[#allocation5 + $0x7e4] ss:$24 sps:$4 sm:$0xff]  }
  0xb1   :  { %1931 = vmatprep.subr.bf16.mxu0 %v7751_v59  ;;  %v7832_v58 = vld [vmem:[#allocation5 + $0x1ec] ss:$24 sps:$4 sm:$0xff]   ;;  %v7827_v59 = vld [vmem:[#allocation5 + $0x7e0] ss:$24 sps:$4 sm:$0xff]  }
  0xb3   :  { %1889 = vmatpush1.bf16.msra.mxu1 %v7753_v60  ;;  %v7830_v60 = vld [vmem:[#allocation5 + $0x1e8] ss:$24 sps:$4 sm:$0xff]  }
  0xb4   :  { %1932 = vmatpush1.bf16.msra.mxu0 %v7754_v61  ;;  %1890 = vmatprep.subr.bf16.mxu1 %v7755_v62  ;;  %v7835_v61 = vld [vmem:[#allocation5 + $0x814] ss:$24 sps:$4 sm:$0xff]  }
  0xb5   :  { %1933 = vmatprep.subr.bf16.mxu0 %v7757_v63  ;;  %v7838_v62 = vld [vmem:[#allocation5 + $0x21c] ss:$24 sps:$4 sm:$0xff]   ;;  %v7833_v63 = vld [vmem:[#allocation5 + $0x810] ss:$24 sps:$4 sm:$0xff]  }
  0xb7   :  { %1891 = vmatpush1.bf16.msra.mxu1 %v7759_v0  ;;  %v7836_v0 = vld [vmem:[#allocation5 + $0x218] ss:$24 sps:$4 sm:$0xff]  }
  0xb8   :  { %1934 = vmatpush1.bf16.msra.mxu0 %v7760_v1  ;;  %1892 = vmatprep.subr.bf16.mxu1 %v7761_v2  ;;  %v7841_v1 = vld [vmem:[#allocation5 + $0x844] ss:$24 sps:$4 sm:$0xff]  }
  0xb9   :  { %1935 = vmatprep.subr.bf16.mxu0 %v7763_v3  ;;  %v7844_v2 = vld [vmem:[#allocation5 + $0x24c] ss:$24 sps:$4 sm:$0xff]   ;;  %v7839_v3 = vld [vmem:[#allocation5 + $0x840] ss:$24 sps:$4 sm:$0xff]  }
  0xbb   :  { %1893 = vmatpush1.bf16.msra.mxu1 %v7765_v4  ;;  %v7842_v4 = vld [vmem:[#allocation5 + $0x248] ss:$24 sps:$4 sm:$0xff]  }
  0xbc   :  { %1936 = vmatpush1.bf16.msra.mxu0 %v7766_v5  ;;  %1991 = vmatprep.subr.bf16.mxu1 %v7772_v11  ;;  %v7847_v5 = vld [vmem:[#allocation5 + $0x874] ss:$24 sps:$4 sm:$0xff]   ;;  %v7851_v11 = vld [vmem:[#allocation5 + $0x8a0] ss:$24 sps:$4 sm:$0xff]  }
  0xbd   :  { %1948 = vmatprep.subr.bf16.mxu0 %v7769_v8  ;;  %v7848_v8 = vld [vmem:[#allocation5 + $0x278] ss:$24 sps:$4 sm:$0xff]  }
  0xbe   :  { %1895 = vmatmul.mubr.bf16.vlgmr.msra.gmra.mrb[0].mxu1 %v9343_v12 }
  0xbf   :  { %1938 = vmatmul.mubr.bf16.vlgmr.msra.gmra.mrb[0].mxu0 %v9345_v15  ;;  %1992 = vmatpush1.bf16.msra.mxu1 %v7770_v14  ;;  %v7859_v14 = vld [vmem:[#allocation5 + $0x8d4] ss:$24 sps:$4 sm:$0xff]  }
  0xc0   :  { %1949 = vmatpush1.bf16.msra.mxu0 %v7767_v13  ;;  %1993 = vmatprep.subr.bf16.mxu1 %v7778_v17  ;;  %v7854_v13 = vld [vmem:[#allocation5 + $0x2a8] ss:$24 sps:$4 sm:$0xff]  }
  0xc1   :  { %1950 = vmatprep.subr.bf16.mxu0 %v7775_v16  ;;  %2023 = vmatprep.mubr.bf16.mxu1 %v9337_v50  ;;  %v7862_v16 = vld [vmem:[#allocation5 + $0x2dc] ss:$24 sps:$4 sm:$0xff]   ;;  %v7857_v17 = vld [vmem:[#allocation5 + $0x8d0] ss:$24 sps:$4 sm:$0xff]  }
  0xc2   :  { %1980 = vmatprep.mubr.bf16.mxu0 %v9350_v44 }
  0xc3   :  { %1994 = vmatpush1.bf16.msra.mxu1 %v7776_v19  ;;  %v120_v19 = vld [vmem:[#allocation2 + $0x20] sm:$0xff] }
  0xc4   :  { %1951 = vmatpush1.bf16.msra.mxu0 %v7773_v18  ;;  %1995 = vmatprep.subr.bf16.mxu1 %v7784_v21  ;;  %v7860_v18 = vld [vmem:[#allocation5 + $0x2d8] ss:$24 sps:$4 sm:$0xff]   ;;  %v7865_v21 = vld [vmem:[#allocation5 + $0x30c] ss:$24 sps:$4 sm:$0xff]  }
  0xc5   :  { %1952 = vmatprep.subr.bf16.mxu0 %v7781_v20  ;;  %v126_v20 = vld [vmem:[#allocation2 + $0x50] sm:$0xff] }
  0xc7   :  { %1996 = vmatpush1.bf16.msra.mxu1 %v7782_v23  ;;  %v9353_v23 = vpack.c.bf16 %v126_v20, %v120_v19  ;;  %v7949_v19 = vld [vmem:[#allocation5 + $0x5ac] ss:$24 sps:$4 sm:$0xff]  }
  0xc8   :  { %1953 = vmatpush1.bf16.msra.mxu0 %v7779_v22  ;;  %1997 = vmatprep.subr.bf16.mxu1 %v7790_v25  ;;  %v7868_v22 = vld [vmem:[#allocation5 + $0x14] ss:$24 sps:$4 sm:$0xff]   ;;  %v7866_v25 = vld [vmem:[#allocation5 + $0x10] ss:$24 sps:$4 sm:$0xff]  }
  0xc9   :  { %1954 = vmatprep.subr.bf16.mxu0 %v7787_v24  ;;  %v7863_v24 = vld [vmem:[#allocation5 + $0x308] ss:$24 sps:$4 sm:$0xff]   ;;  %v7952_v20 = vld [vmem:[#allocation5 + $0x2b4] ss:$24 sps:$4 sm:$0xff]  }
  0xcb   :  { %1998 = vmatpush1.bf16.msra.mxu1 %v7788_v27  ;;  %v7874_v27 = vld [vmem:[#allocation5 + $0x44] ss:$24 sps:$4 sm:$0xff]  }
  0xcc   :  { %1955 = vmatpush1.bf16.msra.mxu0 %v7785_v26  ;;  %1999 = vmatprep.subr.bf16.mxu1 %v7796_v29  ;;  %v7871_v26 = vld [vmem:[#allocation5 + $0x33c] ss:$24 sps:$4 sm:$0xff]   ;;  %v7872_v29 = vld [vmem:[#allocation5 + $0x40] ss:$24 sps:$4 sm:$0xff]  }
  0xcd   :  { %1956 = vmatprep.subr.bf16.mxu0 %v7793_v28  ;;  %v7869_v28 = vld [vmem:[#allocation5 + $0x338] ss:$24 sps:$4 sm:$0xff]  }
  0xcf   :  { %2000 = vmatpush1.bf16.msra.mxu1 %v7794_v31  ;;  %v7880_v31 = vld [vmem:[#allocation5 + $0x74] ss:$24 sps:$4 sm:$0xff]  }
  0xd0   :  { %1957 = vmatpush1.bf16.msra.mxu0 %v7791_v30  ;;  %2001 = vmatprep.subr.bf16.mxu1 %v7802_v33  ;;  %v7877_v30 = vld [vmem:[#allocation5 + $0x36c] ss:$24 sps:$4 sm:$0xff]   ;;  %v7878_v33 = vld [vmem:[#allocation5 + $0x70] ss:$24 sps:$4 sm:$0xff]  }
  0xd1   :  { %1958 = vmatprep.subr.bf16.mxu0 %v7799_v32  ;;  %v7875_v32 = vld [vmem:[#allocation5 + $0x368] ss:$24 sps:$4 sm:$0xff]  }
  0xd3   :  { %2002 = vmatpush1.bf16.msra.mxu1 %v7800_v35  ;;  %v7886_v35 = vld [vmem:[#allocation5 + $0xa4] ss:$24 sps:$4 sm:$0xff]  }
  0xd4   :  { %1959 = vmatpush1.bf16.msra.mxu0 %v7797_v34  ;;  %2003 = vmatprep.subr.bf16.mxu1 %v7808_v37  ;;  %v7883_v34 = vld [vmem:[#allocation5 + $0x39c] ss:$24 sps:$4 sm:$0xff]   ;;  %v7884_v37 = vld [vmem:[#allocation5 + $0xa0] ss:$24 sps:$4 sm:$0xff]  }
  0xd5   :  { %1960 = vmatprep.subr.bf16.mxu0 %v7805_v36  ;;  %v7881_v36 = vld [vmem:[#allocation5 + $0x398] ss:$24 sps:$4 sm:$0xff]  }
  0xd7   :  { %2004 = vmatpush1.bf16.msra.mxu1 %v7806_v39  ;;  %v7892_v39 = vld [vmem:[#allocation5 + $0xd4] ss:$24 sps:$4 sm:$0xff]  }
  0xd8   :  { %1961 = vmatpush1.bf16.msra.mxu0 %v7803_v38  ;;  %2005 = vmatprep.subr.bf16.mxu1 %v7814_v43  ;;  %v7889_v38 = vld [vmem:[#allocation5 + $0x3cc] ss:$24 sps:$4 sm:$0xff]  }
  0xd9   :  { %1962 = vmatprep.subr.bf16.mxu0 %v7811_v40  ;;  %v7887_v40 = vld [vmem:[#allocation5 + $0x3c8] ss:$24 sps:$4 sm:$0xff]   ;;  %v7898_v43 = vld [vmem:[#allocation5 + $0x104] ss:$24 sps:$4 sm:$0xff]  }
  0xdb   :  { %2006 = vmatpush1.bf16.msra.mxu1 %v7812_v46  ;;  %v7896_v46 = vld [vmem:[#allocation5 + $0x100] ss:$24 sps:$4 sm:$0xff]  }
  0xdc   :  { %1963 = vmatpush1.bf16.msra.mxu0 %v7809_v45  ;;  %2007 = vmatprep.subr.bf16.mxu1 %v7820_v48  ;;  %v7893_v45 = vld [vmem:[#allocation5 + $0x3f8] ss:$24 sps:$4 sm:$0xff]   ;;  %v7904_v48 = vld [vmem:[#allocation5 + $0x134] ss:$24 sps:$4 sm:$0xff]  }
  0xdd   :  { %1964 = vmatprep.subr.bf16.mxu0 %v7817_v47  ;;  %v7901_v47 = vld [vmem:[#allocation5 + $0x42c] ss:$24 sps:$4 sm:$0xff]  }
  0xdf   :  { %2008 = vmatpush1.bf16.msra.mxu1 %v7818_v51  ;;  %v7902_v51 = vld [vmem:[#allocation5 + $0x130] ss:$24 sps:$4 sm:$0xff]  }
  0xe0   :  { %1965 = vmatpush1.bf16.msra.mxu0 %v7815_v49  ;;  %2009 = vmatprep.subr.bf16.mxu1 %v7826_v53  ;;  %v7899_v49 = vld [vmem:[#allocation5 + $0x428] ss:$24 sps:$4 sm:$0xff]   ;;  %v7910_v53 = vld [vmem:[#allocation5 + $0x164] ss:$24 sps:$4 sm:$0xff]  }
  0xe1   :  { %1966 = vmatprep.subr.bf16.mxu0 %v7823_v52  ;;  %v7907_v52 = vld [vmem:[#allocation5 + $0x45c] ss:$24 sps:$4 sm:$0xff]  }
  0xe3   :  { %2010 = vmatpush1.bf16.msra.mxu1 %v7824_v56  ;;  %v7908_v56 = vld [vmem:[#allocation5 + $0x160] ss:$24 sps:$4 sm:$0xff]  }
  0xe4   :  { %1967 = vmatpush1.bf16.msra.mxu0 %v7821_v54  ;;  %2011 = vmatprep.subr.bf16.mxu1 %v7832_v58  ;;  %v7905_v54 = vld [vmem:[#allocation5 + $0x458] ss:$24 sps:$4 sm:$0xff]   ;;  %v7916_v58 = vld [vmem:[#allocation5 + $0x194] ss:$24 sps:$4 sm:$0xff]  }
  0xe5   :  { %1968 = vmatprep.subr.bf16.mxu0 %v7829_v57  ;;  %v7913_v57 = vld [vmem:[#allocation5 + $0x48c] ss:$24 sps:$4 sm:$0xff]  }
  0xe7   :  { %2012 = vmatpush1.bf16.msra.mxu1 %v7830_v60  ;;  %v7914_v60 = vld [vmem:[#allocation5 + $0x190] ss:$24 sps:$4 sm:$0xff]  }
  0xe8   :  { %1969 = vmatpush1.bf16.msra.mxu0 %v7827_v59  ;;  %2013 = vmatprep.subr.bf16.mxu1 %v7838_v62  ;;  %v7911_v59 = vld [vmem:[#allocation5 + $0x488] ss:$24 sps:$4 sm:$0xff]   ;;  %v7922_v62 = vld [vmem:[#allocation5 + $0x1c4] ss:$24 sps:$4 sm:$0xff]  }
  0xe9   :  { %1970 = vmatprep.subr.bf16.mxu0 %v7835_v61  ;;  %v7919_v61 = vld [vmem:[#allocation5 + $0x4bc] ss:$24 sps:$4 sm:$0xff]  }
  0xeb   :  { %2014 = vmatpush1.bf16.msra.mxu1 %v7836_v0  ;;  %v7920_v0 = vld [vmem:[#allocation5 + $0x1c0] ss:$24 sps:$4 sm:$0xff]  }
  0xec   :  { %1971 = vmatpush1.bf16.msra.mxu0 %v7833_v63  ;;  %2015 = vmatprep.subr.bf16.mxu1 %v7844_v2  ;;  %v7917_v63 = vld [vmem:[#allocation5 + $0x4b8] ss:$24 sps:$4 sm:$0xff]   ;;  %v7928_v2 = vld [vmem:[#allocation5 + $0x1f4] ss:$24 sps:$4 sm:$0xff]  }
  0xed   :  { %1972 = vmatprep.subr.bf16.mxu0 %v7841_v1  ;;  %v7925_v1 = vld [vmem:[#allocation5 + $0x4ec] ss:$24 sps:$4 sm:$0xff]  }
  0xef   :  { %2016 = vmatpush1.bf16.msra.mxu1 %v7842_v4  ;;  %v7926_v4 = vld [vmem:[#allocation5 + $0x1f0] ss:$24 sps:$4 sm:$0xff]  }
  0xf0   :  { %1973 = vmatpush1.bf16.msra.mxu0 %v7839_v3  ;;  %2017 = vmatprep.subr.bf16.mxu1 %v7850_v6  ;;  %v7923_v3 = vld [vmem:[#allocation5 + $0x4e8] ss:$24 sps:$4 sm:$0xff]   ;;  %v7934_v6 = vld [vmem:[#allocation5 + $0x224] ss:$24 sps:$4 sm:$0xff]  }
  0xf1   :  { %1974 = vmatprep.subr.bf16.mxu0 %v7847_v5  ;;  %v7931_v5 = vld [vmem:[#allocation5 + $0x51c] ss:$24 sps:$4 sm:$0xff]  }
  0xf3   :  { %2018 = vmatpush1.bf16.msra.mxu1 %v7848_v8  ;;  %v7932_v8 = vld [vmem:[#allocation5 + $0x220] ss:$24 sps:$4 sm:$0xff]  }
  0xf4   :  { %1975 = vmatpush1.bf16.msra.mxu0 %v7845_v7  ;;  %2019 = vmatprep.subr.bf16.mxu1 %v7856_v10  ;;  %v7929_v7 = vld [vmem:[#allocation5 + $0x518] ss:$24 sps:$4 sm:$0xff]   ;;  %v7940_v10 = vld [vmem:[#allocation5 + $0x254] ss:$24 sps:$4 sm:$0xff]  }
  0xf5   :  { %1976 = vmatprep.subr.bf16.mxu0 %v7853_v9  ;;  %v7937_v9 = vld [vmem:[#allocation5 + $0x54c] ss:$24 sps:$4 sm:$0xff]  }
  0xf7   :  { %2020 = vmatpush1.bf16.msra.mxu1 %v7854_v13  ;;  %v7938_v13 = vld [vmem:[#allocation5 + $0x250] ss:$24 sps:$4 sm:$0xff]  }
  0xf8   :  { %1977 = vmatpush1.bf16.msra.mxu0 %v7851_v11  ;;  %2021 = vmatprep.subr.bf16.mxu1 %v7862_v16  ;;  %v7935_v11 = vld [vmem:[#allocation5 + $0x548] ss:$24 sps:$4 sm:$0xff]   ;;  %v7946_v16 = vld [vmem:[#allocation5 + $0x284] ss:$24 sps:$4 sm:$0xff]  }
  0xf9   :  { %1978 = vmatprep.subr.bf16.mxu0 %v7859_v14  ;;  %v7943_v14 = vld [vmem:[#allocation5 + $0x57c] ss:$24 sps:$4 sm:$0xff]  }
  0xfb   :  { %2022 = vmatpush1.bf16.msra.mxu1 %v7860_v18  ;;  %v7944_v18 = vld [vmem:[#allocation5 + $0x280] ss:$24 sps:$4 sm:$0xff]  }
  0xfc   :  { %1979 = vmatpush1.bf16.msra.mxu0 %v7857_v17  ;;  %2034 = vmatprep.subr.bf16.mxu1 %v7865_v21  ;;  %v7941_v17 = vld [vmem:[#allocation5 + $0x578] ss:$24 sps:$4 sm:$0xff]   ;;  %v7947_v21 = vld [vmem:[#allocation5 + $0x5a8] ss:$24 sps:$4 sm:$0xff]  }
  0xfd   :  { %2120 = vmatprep.subr.bf16.mxu0 %v7868_v22  ;;  %v7950_v22 = vld [vmem:[#allocation5 + $0x2b0] ss:$24 sps:$4 sm:$0xff]  }
  0xfe   :  { %2024 = vmatmul.mubr.bf16.vlgmr.msra.gmra.mrb[4].mxu1 %v9343_v12 }
  0xff   :  { %1981 = vmatmul.mubr.bf16.vlgmr.msra.gmra.mrb[0].mxu0 %v9353_v23  ;;  %2035 = vmatpush1.bf16.msra.mxu1 %v7863_v24  ;;  %v7955_v24 = vld [vmem:[#allocation5 + $0x5dc] ss:$24 sps:$4 sm:$0xff]  }
 0x100   :  { %2121 = vmatpush1.bf16.msra.mxu0 %v7866_v25  ;;  %2036 = vmatprep.subr.bf16.mxu1 %v7871_v26  ;;  %v7958_v25 = vld [vmem:[#allocation5 + $0x2e4] ss:$24 sps:$4 sm:$0xff]   ;;  %v7953_v26 = vld [vmem:[#allocation5 + $0x5d8] ss:$24 sps:$4 sm:$0xff]  }
 0x101   :  { %2122 = vmatprep.subr.bf16.mxu0 %v7874_v27  ;;  %2066 = vmatprep.mubr.bf16.mxu1 %v9339_v55  ;;  %v7956_v27 = vld [vmem:[#allocation5 + $0x2e0] ss:$24 sps:$4 sm:$0xff]  }
 0x102   :  { %2152 = vmatprep.mubr.bf16.mxu0 %v9337_v50 }
 0x103   :  { %2037 = vmatpush1.bf16.msra.mxu1 %v7869_v28  ;;  %v7961_v28 = vld [vmem:[#allocation5 + $0x60c] ss:$24 sps:$4 sm:$0xff]  }
 0x104   :  { %2123 = vmatpush1.bf16.msra.mxu0 %v7872_v29  ;;  %2038 = vmatprep.subr.bf16.mxu1 %v7877_v30  ;;  %v7964_v29 = vld [vmem:[#allocation5 + $0x314] ss:$24 sps:$4 sm:$0xff]   ;;  %v7959_v30 = vld [vmem:[#allocation5 + $0x608] ss:$24 sps:$4 sm:$0xff]  }
 0x105   :  { %2124 = vmatprep.subr.bf16.mxu0 %v7880_v31  ;;  %v7962_v31 = vld [vmem:[#allocation5 + $0x310] ss:$24 sps:$4 sm:$0xff]  }
 0x107   :  { %2039 = vmatpush1.bf16.msra.mxu1 %v7875_v32  ;;  %v7967_v32 = vld [vmem:[#allocation5 + $0x63c] ss:$24 sps:$4 sm:$0xff]  }
 0x108   :  { %2125 = vmatpush1.bf16.msra.mxu0 %v7878_v33  ;;  %2040 = vmatprep.subr.bf16.mxu1 %v7883_v34  ;;  %v7970_v33 = vld [vmem:[#allocation5 + $0x344] ss:$24 sps:$4 sm:$0xff]   ;;  %v7965_v34 = vld [vmem:[#allocation5 + $0x638] ss:$24 sps:$4 sm:$0xff]  }
 0x109   :  { %2126 = vmatprep.subr.bf16.mxu0 %v7886_v35  ;;  %v7968_v35 = vld [vmem:[#allocation5 + $0x340] ss:$24 sps:$4 sm:$0xff]  }
 0x10b   :  { %2041 = vmatpush1.bf16.msra.mxu1 %v7881_v36  ;;  %v7973_v36 = vld [vmem:[#allocation5 + $0x66c] ss:$24 sps:$4 sm:$0xff]  }
 0x10c   :  { %2127 = vmatpush1.bf16.msra.mxu0 %v7884_v37  ;;  %2042 = vmatprep.subr.bf16.mxu1 %v7889_v38  ;;  %v7976_v37 = vld [vmem:[#allocation5 + $0x374] ss:$24 sps:$4 sm:$0xff]   ;;  %v7971_v38 = vld [vmem:[#allocation5 + $0x668] ss:$24 sps:$4 sm:$0xff]  }
 0x10d   :  { %2128 = vmatprep.subr.bf16.mxu0 %v7892_v39  ;;  %v7974_v39 = vld [vmem:[#allocation5 + $0x370] ss:$24 sps:$4 sm:$0xff]  }
 0x10f   :  { %2043 = vmatpush1.bf16.msra.mxu1 %v7887_v40  ;;  %v7979_v40 = vld [vmem:[#allocation5 + $0x69c] ss:$24 sps:$4 sm:$0xff]  }
 0x110   :  { %2129 = vmatpush1.bf16.msra.mxu0 %v7890_v41  ;;  %2044 = vmatprep.subr.bf16.mxu1 %v7895_v42  ;;  %v7982_v41 = vld [vmem:[#allocation5 + $0x3a4] ss:$24 sps:$4 sm:$0xff]   ;;  %v7977_v42 = vld [vmem:[#allocation5 + $0x698] ss:$24 sps:$4 sm:$0xff]  }
 0x111   :  { %2130 = vmatprep.subr.bf16.mxu0 %v7898_v43  ;;  %v7980_v43 = vld [vmem:[#allocation5 + $0x3a0] ss:$24 sps:$4 sm:$0xff]  }
 0x113   :  { %2045 = vmatpush1.bf16.msra.mxu1 %v7893_v45  ;;  %v7985_v45 = vld [vmem:[#allocation5 + $0x6cc] ss:$24 sps:$4 sm:$0xff]  }
 0x114   :  { %2131 = vmatpush1.bf16.msra.mxu0 %v7896_v46  ;;  %2046 = vmatprep.subr.bf16.mxu1 %v7901_v47  ;;  %v7988_v46 = vld [vmem:[#allocation5 + $0x3d4] ss:$24 sps:$4 sm:$0xff]   ;;  %v7983_v47 = vld [vmem:[#allocation5 + $0x6c8] ss:$24 sps:$4 sm:$0xff]  }
 0x115   :  { %2132 = vmatprep.subr.bf16.mxu0 %v7904_v48  ;;  %v7986_v48 = vld [vmem:[#allocation5 + $0x3d0] ss:$24 sps:$4 sm:$0xff]  }
 0x117   :  { %2047 = vmatpush1.bf16.msra.mxu1 %v7899_v49  ;;  %v7991_v49 = vld [vmem:[#allocation5 + $0x6fc] ss:$24 sps:$4 sm:$0xff]  }
 0x118   :  { %2133 = vmatpush1.bf16.msra.mxu0 %v7902_v51  ;;  %2048 = vmatprep.subr.bf16.mxu1 %v7907_v52  ;;  %v7994_v51 = vld [vmem:[#allocation5 + $0x404] ss:$24 sps:$4 sm:$0xff]   ;;  %v7989_v52 = vld [vmem:[#allocation5 + $0x6f8] ss:$24 sps:$4 sm:$0xff]  }
 0x119   :  { %2134 = vmatprep.subr.bf16.mxu0 %v7910_v53  ;;  %v7992_v53 = vld [vmem:[#allocation5 + $0x400] ss:$24 sps:$4 sm:$0xff]  }
 0x11b   :  { %2049 = vmatpush1.bf16.msra.mxu1 %v7905_v54  ;;  %v7997_v54 = vld [vmem:[#allocation5 + $0x72c] ss:$24 sps:$4 sm:$0xff]  }
 0x11c   :  { %2135 = vmatpush1.bf16.msra.mxu0 %v7908_v56  ;;  %2050 = vmatprep.subr.bf16.mxu1 %v7913_v57  ;;  %v8000_v56 = vld [vmem:[#allocation5 + $0x434] ss:$24 sps:$4 sm:$0xff]   ;;  %v7995_v57 = vld [vmem:[#allocation5 + $0x728] ss:$24 sps:$4 sm:$0xff]  }
 0x11d   :  { %2136 = vmatprep.subr.bf16.mxu0 %v7916_v58  ;;  %v7998_v58 = vld [vmem:[#allocation5 + $0x430] ss:$24 sps:$4 sm:$0xff]  }
 0x11f   :  { %2051 = vmatpush1.bf16.msra.mxu1 %v7911_v59  ;;  %v8003_v59 = vld [vmem:[#allocation5 + $0x75c] ss:$24 sps:$4 sm:$0xff]  }
 0x120   :  { %2137 = vmatpush1.bf16.msra.mxu0 %v7914_v60  ;;  %2052 = vmatprep.subr.bf16.mxu1 %v7919_v61  ;;  %v8006_v60 = vld [vmem:[#allocation5 + $0x464] ss:$24 sps:$4 sm:$0xff]   ;;  %v8001_v61 = vld [vmem:[#allocation5 + $0x758] ss:$24 sps:$4 sm:$0xff]  }
 0x121   :  { %2138 = vmatprep.subr.bf16.mxu0 %v7922_v62  ;;  %v8004_v62 = vld [vmem:[#allocation5 + $0x460] ss:$24 sps:$4 sm:$0xff]  }
 0x123   :  { %2053 = vmatpush1.bf16.msra.mxu1 %v7917_v63  ;;  %v8009_v63 = vld [vmem:[#allocation5 + $0x78c] ss:$24 sps:$4 sm:$0xff]  }
 0x124   :  { %2139 = vmatpush1.bf16.msra.mxu0 %v7920_v0  ;;  %2054 = vmatprep.subr.bf16.mxu1 %v7925_v1  ;;  %v8012_v0 = vld [vmem:[#allocation5 + $0x494] ss:$24 sps:$4 sm:$0xff]   ;;  %v8007_v1 = vld [vmem:[#allocation5 + $0x788] ss:$24 sps:$4 sm:$0xff]  }
 0x125   :  { %2140 = vmatprep.subr.bf16.mxu0 %v7928_v2  ;;  %v8010_v2 = vld [vmem:[#allocation5 + $0x490] ss:$24 sps:$4 sm:$0xff]  }
 0x127   :  { %2055 = vmatpush1.bf16.msra.mxu1 %v7923_v3  ;;  %v8015_v3 = vld [vmem:[#allocation5 + $0x7bc] ss:$24 sps:$4 sm:$0xff]  }
 0x128   :  { %2141 = vmatpush1.bf16.msra.mxu0 %v7926_v4  ;;  %2056 = vmatprep.subr.bf16.mxu1 %v7931_v5  ;;  %v8018_v4 = vld [vmem:[#allocation5 + $0x4c4] ss:$24 sps:$4 sm:$0xff]   ;;  %v8013_v5 = vld [vmem:[#allocation5 + $0x7b8] ss:$24 sps:$4 sm:$0xff]  }
 0x129   :  { %2142 = vmatprep.subr.bf16.mxu0 %v7934_v6  ;;  %v8016_v6 = vld [vmem:[#allocation5 + $0x4c0] ss:$24 sps:$4 sm:$0xff]  }
 0x12b   :  { %2057 = vmatpush1.bf16.msra.mxu1 %v7929_v7  ;;  %v8021_v7 = vld [vmem:[#allocation5 + $0x7ec] ss:$24 sps:$4 sm:$0xff]  }
 0x12c   :  { %2143 = vmatpush1.bf16.msra.mxu0 %v7932_v8  ;;  %2058 = vmatprep.subr.bf16.mxu1 %v7937_v9  ;;  %v8024_v8 = vld [vmem:[#allocation5 + $0x4f4] ss:$24 sps:$4 sm:$0xff]   ;;  %v8019_v9 = vld [vmem:[#allocation5 + $0x7e8] ss:$24 sps:$4 sm:$0xff]  }
 0x12d   :  { %2144 = vmatprep.subr.bf16.mxu0 %v7940_v10  ;;  %v8022_v10 = vld [vmem:[#allocation5 + $0x4f0] ss:$24 sps:$4 sm:$0xff]  }
 0x12f   :  { %2059 = vmatpush1.bf16.msra.mxu1 %v7935_v11  ;;  %v8027_v11 = vld [vmem:[#allocation5 + $0x81c] ss:$24 sps:$4 sm:$0xff]  }
 0x130   :  { %2145 = vmatpush1.bf16.msra.mxu0 %v7938_v13  ;;  %2060 = vmatprep.subr.bf16.mxu1 %v7943_v14  ;;  %v8030_v13 = vld [vmem:[#allocation5 + $0x524] ss:$24 sps:$4 sm:$0xff]   ;;  %v8025_v14 = vld [vmem:[#allocation5 + $0x818] ss:$24 sps:$4 sm:$0xff]  }
 0x131   :  { %2146 = vmatprep.subr.bf16.mxu0 %v7946_v16  ;;  %v8028_v16 = vld [vmem:[#allocation5 + $0x520] ss:$24 sps:$4 sm:$0xff]  }
 0x133   :  { %2061 = vmatpush1.bf16.msra.mxu1 %v7941_v17  ;;  %v8033_v17 = vld [vmem:[#allocation5 + $0x84c] ss:$24 sps:$4 sm:$0xff]  }
 0x134   :  { %2147 = vmatpush1.bf16.msra.mxu0 %v7944_v18  ;;  %2062 = vmatprep.subr.bf16.mxu1 %v7949_v19  ;;  %v8036_v18 = vld [vmem:[#allocation5 + $0x554] ss:$24 sps:$4 sm:$0xff]   ;;  %v8031_v19 = vld [vmem:[#allocation5 + $0x848] ss:$24 sps:$4 sm:$0xff]  }
 0x135   :  { %2148 = vmatprep.subr.bf16.mxu0 %v7952_v20  ;;  %v8034_v20 = vld [vmem:[#allocation5 + $0x550] ss:$24 sps:$4 sm:$0xff]  }
 0x137   :  { %2063 = vmatpush1.bf16.msra.mxu1 %v7947_v21  ;;  %v8039_v21 = vld [vmem:[#allocation5 + $0x87c] ss:$24 sps:$4 sm:$0xff]  }
 0x138   :  { %2149 = vmatpush1.bf16.msra.mxu0 %v7950_v22  ;;  %2064 = vmatprep.subr.bf16.mxu1 %v7955_v24  ;;  %v8042_v22 = vld [vmem:[#allocation5 + $0x584] ss:$24 sps:$4 sm:$0xff]   ;;  %v8037_v24 = vld [vmem:[#allocation5 + $0x878] ss:$24 sps:$4 sm:$0xff]  }
 0x139   :  { %2150 = vmatprep.subr.bf16.mxu0 %v7958_v25  ;;  %v8040_v25 = vld [vmem:[#allocation5 + $0x580] ss:$24 sps:$4 sm:$0xff]  }
 0x13b   :  { %2065 = vmatpush1.bf16.msra.mxu1 %v7953_v26  ;;  %v8045_v26 = vld [vmem:[#allocation5 + $0x8ac] ss:$24 sps:$4 sm:$0xff]  }
 0x13c   :  { %2151 = vmatpush1.bf16.msra.mxu0 %v7956_v27  ;;  %2077 = vmatprep.subr.bf16.mxu1 %v7961_v28  ;;  %v8048_v27 = vld [vmem:[#allocation5 + $0x5b4] ss:$24 sps:$4 sm:$0xff]   ;;  %v8043_v28 = vld [vmem:[#allocation5 + $0x8a8] ss:$24 sps:$4 sm:$0xff]  }
 0x13d   :  { %2163 = vmatprep.subr.bf16.mxu0 %v7964_v29  ;;  %v8046_v29 = vld [vmem:[#allocation5 + $0x5b0] ss:$24 sps:$4 sm:$0xff]  }
 0x13e   :  { %2067 = vmatmul.mubr.bf16.vlgmr.msra.gmra.mrb[4].mxu1 %v9345_v15 }
 0x13f   :  { %2153 = vmatmul.mubr.bf16.vlgmr.msra.gmra.mrb[4].mxu0 %v9343_v12  ;;  %2078 = vmatpush1.bf16.msra.mxu1 %v7959_v30  ;;  %v8051_v30 = vld [vmem:[#allocation5 + $0x8dc] ss:$24 sps:$4 sm:$0xff]  }
 0x140   :  { %2164 = vmatpush1.bf16.msra.mxu0 %v7962_v31  ;;  %2079 = vmatprep.subr.bf16.mxu1 %v7967_v32  ;;  %v8054_v31 = vld [vmem:[#allocation5 + $0x5e4] ss:$24 sps:$4 sm:$0xff]   ;;  %v8049_v32 = vld [vmem:[#allocation5 + $0x8d8] ss:$24 sps:$4 sm:$0xff]  }
 0x141   :  { %2165 = vmatprep.subr.bf16.mxu0 %v7970_v33  ;;  %2109 = vmatprep.mubr.bf16.mxu1 %v9350_v44  ;;  %v8052_v33 = vld [vmem:[#allocation5 + $0x5e0] ss:$24 sps:$4 sm:$0xff]  }
 0x142   :  { %2195 = vmatprep.mubr.bf16.mxu0 %v9339_v55 }
 0x143   :  { %2080 = vmatpush1.bf16.msra.mxu1 %v7965_v34  ;;  %v8057_v34 = vld [vmem:[#allocation5 + $0x614] ss:$24 sps:$4 sm:$0xff]  }
 0x144   :  { %2166 = vmatpush1.bf16.msra.mxu0 %v7968_v35  ;;  %2081 = vmatprep.subr.bf16.mxu1 %v7973_v36  ;;  %v8060_v35 = vld [vmem:[#allocation7 + $0x4] ss:$24 sps:$4 sm:$0xff]   ;;  %v8055_v36 = vld [vmem:[#allocation5 + $0x610] ss:$24 sps:$4 sm:$0xff]  }
 0x145   :  { %2167 = vmatprep.subr.bf16.mxu0 %v7976_v37  ;;  %v8058_v37 = vld [vmem:[#allocation7] ss:$24 sps:$4 sm:$0xff]  }
 0x147   :  { %2082 = vmatpush1.bf16.msra.mxu1 %v7971_v38  ;;  %v8063_v38 = vld [vmem:[#allocation5 + $0x644] ss:$24 sps:$4 sm:$0xff]  }
 0x148   :  { %2168 = vmatpush1.bf16.msra.mxu0 %v7974_v39  ;;  %2083 = vmatprep.subr.bf16.mxu1 %v7979_v40  ;;  %v8066_v39 = vld [vmem:[#allocation7 + $0x34] ss:$24 sps:$4 sm:$0xff]   ;;  %v8061_v40 = vld [vmem:[#allocation5 + $0x640] ss:$24 sps:$4 sm:$0xff]  }
 0x149   :  { %2169 = vmatprep.subr.bf16.mxu0 %v7982_v41  ;;  %v8064_v41 = vld [vmem:[#allocation7 + $0x30] ss:$24 sps:$4 sm:$0xff]  }
 0x14b   :  { %2084 = vmatpush1.bf16.msra.mxu1 %v7977_v42  ;;  %v8069_v42 = vld [vmem:[#allocation5 + $0x674] ss:$24 sps:$4 sm:$0xff]  }
 0x14c   :  { %2170 = vmatpush1.bf16.msra.mxu0 %v7980_v43  ;;  %2085 = vmatprep.subr.bf16.mxu1 %v7985_v45  ;;  %v8072_v43 = vld [vmem:[#allocation7 + $0x64] ss:$24 sps:$4 sm:$0xff]   ;;  %v8067_v45 = vld [vmem:[#allocation5 + $0x670] ss:$24 sps:$4 sm:$0xff]  }
 0x14d   :  { %2171 = vmatprep.subr.bf16.mxu0 %v7988_v46  ;;  %v8070_v46 = vld [vmem:[#allocation7 + $0x60] ss:$24 sps:$4 sm:$0xff]  }
 0x14f   :  { %2086 = vmatpush1.bf16.msra.mxu1 %v7983_v47  ;;  %v8075_v47 = vld [vmem:[#allocation5 + $0x6a4] ss:$24 sps:$4 sm:$0xff]  }
 0x150   :  { %2172 = vmatpush1.bf16.msra.mxu0 %v7986_v48  ;;  %2087 = vmatprep.subr.bf16.mxu1 %v7991_v49  ;;  %v8078_v48 = vld [vmem:[#allocation7 + $0x94] ss:$24 sps:$4 sm:$0xff]   ;;  %v8073_v49 = vld [vmem:[#allocation5 + $0x6a0] ss:$24 sps:$4 sm:$0xff]  }
 0x151   :  { %2173 = vmatprep.subr.bf16.mxu0 %v7994_v51  ;;  %v8076_v51 = vld [vmem:[#allocation7 + $0x90] ss:$24 sps:$4 sm:$0xff]  }
 0x153   :  { %2088 = vmatpush1.bf16.msra.mxu1 %v7989_v52  ;;  %v8081_v52 = vld [vmem:[#allocation5 + $0x6d4] ss:$24 sps:$4 sm:$0xff]  }
 0x154   :  { %2174 = vmatpush1.bf16.msra.mxu0 %v7992_v53  ;;  %2089 = vmatprep.subr.bf16.mxu1 %v7997_v54  ;;  %v8084_v53 = vld [vmem:[#allocation7 + $0xc4] ss:$24 sps:$4 sm:$0xff]   ;;  %v8079_v54 = vld [vmem:[#allocation5 + $0x6d0] ss:$24 sps:$4 sm:$0xff]  }
 0x155   :  { %2175 = vmatprep.subr.bf16.mxu0 %v8000_v56  ;;  %v8082_v56 = vld [vmem:[#allocation7 + $0xc0] ss:$24 sps:$4 sm:$0xff]  }
 0x157   :  { %2090 = vmatpush1.bf16.msra.mxu1 %v7995_v57  ;;  %v8087_v57 = vld [vmem:[#allocation5 + $0x704] ss:$24 sps:$4 sm:$0xff]  }
 0x158   :  { %2176 = vmatpush1.bf16.msra.mxu0 %v7998_v58  ;;  %2091 = vmatprep.subr.bf16.mxu1 %v8003_v59  ;;  %v8090_v58 = vld [vmem:[#allocation7 + $0xf4] ss:$24 sps:$4 sm:$0xff]   ;;  %v8085_v59 = vld [vmem:[#allocation5 + $0x700] ss:$24 sps:$4 sm:$0xff]  }
 0x159   :  { %2177 = vmatprep.subr.bf16.mxu0 %v8006_v60  ;;  %v8088_v60 = vld [vmem:[#allocation7 + $0xf0] ss:$24 sps:$4 sm:$0xff]  }
 0x15b   :  { %2092 = vmatpush1.bf16.msra.mxu1 %v8001_v61  ;;  %v8093_v61 = vld [vmem:[#allocation5 + $0x734] ss:$24 sps:$4 sm:$0xff]  }
 0x15c   :  { %2178 = vmatpush1.bf16.msra.mxu0 %v8004_v62  ;;  %2093 = vmatprep.subr.bf16.mxu1 %v8009_v63  ;;  %v8096_v62 = vld [vmem:[#allocation7 + $0x124] ss:$24 sps:$4 sm:$0xff]  }
 0x15d   :  { %2179 = vmatprep.subr.bf16.mxu0 %v8012_v0 }
 0x15f   :  { %2094 = vmatpush1.bf16.msra.mxu1 %v8007_v1 }
 0x160   :  { %2180 = vmatpush1.bf16.msra.mxu0 %v8010_v2  ;;  %2095 = vmatprep.subr.bf16.mxu1 %v8015_v3  ;;  %v8091_v2 = vld [vmem:[#allocation5 + $0x730] ss:$24 sps:$4 sm:$0xff]   ;;  %v8094_v3 = vld [vmem:[#allocation7 + $0x120] ss:$24 sps:$4 sm:$0xff]  }
 0x161   :  { %2181 = vmatprep.subr.bf16.mxu0 %v8018_v4 }
 0x163   :  { %2096 = vmatpush1.bf16.msra.mxu1 %v8013_v5  ;;  %v8099_v5 = vld [vmem:[#allocation5 + $0x764] ss:$24 sps:$4 sm:$0xff]  }
 0x164   :  { %2182 = vmatpush1.bf16.msra.mxu0 %v8016_v6  ;;  %2097 = vmatprep.subr.bf16.mxu1 %v8021_v7  ;;  %v8102_v6 = vld [vmem:[#allocation7 + $0x154] ss:$24 sps:$4 sm:$0xff]   ;;  %v8097_v7 = vld [vmem:[#allocation5 + $0x760] ss:$24 sps:$4 sm:$0xff]  }
 0x165   :  { %2183 = vmatprep.subr.bf16.mxu0 %v8024_v8  ;;  %v8100_v8 = vld [vmem:[#allocation7 + $0x150] ss:$24 sps:$4 sm:$0xff]  }
 0x167   :  { %2098 = vmatpush1.bf16.msra.mxu1 %v8019_v9  ;;  %v8105_v9 = vld [vmem:[#allocation5 + $0x794] ss:$24 sps:$4 sm:$0xff]  }
 0x168   :  { %2184 = vmatpush1.bf16.msra.mxu0 %v8022_v10  ;;  %2099 = vmatprep.subr.bf16.mxu1 %v8027_v11  ;;  %v8108_v10 = vld [vmem:[#allocation7 + $0x184] ss:$24 sps:$4 sm:$0xff]   ;;  %v8103_v11 = vld [vmem:[#allocation5 + $0x790] ss:$24 sps:$4 sm:$0xff]  }
 0x169   :  { %2185 = vmatprep.subr.bf16.mxu0 %v8030_v13  ;;  %v8106_v13 = vld [vmem:[#allocation7 + $0x180] ss:$24 sps:$4 sm:$0xff]  }
 0x16b   :  { %2100 = vmatpush1.bf16.msra.mxu1 %v8025_v14  ;;  %v8111_v14 = vld [vmem:[#allocation5 + $0x7c4] ss:$24 sps:$4 sm:$0xff]  }
 0x16c   :  { %2186 = vmatpush1.bf16.msra.mxu0 %v8028_v16  ;;  %2101 = vmatprep.subr.bf16.mxu1 %v8033_v17  ;;  %v8114_v16 = vld [vmem:[#allocation7 + $0x1b4] ss:$24 sps:$4 sm:$0xff]   ;;  %v8109_v17 = vld [vmem:[#allocation5 + $0x7c0] ss:$24 sps:$4 sm:$0xff]  }
 0x16d   :  { %2187 = vmatprep.subr.bf16.mxu0 %v8036_v18  ;;  %v8112_v18 = vld [vmem:[#allocation7 + $0x1b0] ss:$24 sps:$4 sm:$0xff]  }
 0x16f   :  { %2102 = vmatpush1.bf16.msra.mxu1 %v8031_v19  ;;  %v8117_v19 = vld [vmem:[#allocation5 + $0x7f4] ss:$24 sps:$4 sm:$0xff]  }
 0x170   :  { %2188 = vmatpush1.bf16.msra.mxu0 %v8034_v20  ;;  %2103 = vmatprep.subr.bf16.mxu1 %v8039_v21  ;;  %v8120_v20 = vld [vmem:[#allocation7 + $0x1e4] ss:$24 sps:$4 sm:$0xff]   ;;  %v8115_v21 = vld [vmem:[#allocation5 + $0x7f0] ss:$24 sps:$4 sm:$0xff]  }
 0x171   :  { %2189 = vmatprep.subr.bf16.mxu0 %v8042_v22  ;;  %v8118_v22 = vld [vmem:[#allocation7 + $0x1e0] ss:$24 sps:$4 sm:$0xff]  }
 0x173   :  { %2104 = vmatpush1.bf16.msra.mxu1 %v8037_v24  ;;  %v8123_v24 = vld [vmem:[#allocation5 + $0x824] ss:$24 sps:$4 sm:$0xff]  }
 0x174   :  { %2190 = vmatpush1.bf16.msra.mxu0 %v8040_v25  ;;  %2105 = vmatprep.subr.bf16.mxu1 %v8045_v26  ;;  %v8126_v25 = vld [vmem:[#allocation7 + $0x214] ss:$24 sps:$4 sm:$0xff]   ;;  %v8121_v26 = vld [vmem:[#allocation5 + $0x820] ss:$24 sps:$4 sm:$0xff]  }
 0x175   :  { %2191 = vmatprep.subr.bf16.mxu0 %v8048_v27  ;;  %v8124_v27 = vld [vmem:[#allocation7 + $0x210] ss:$24 sps:$4 sm:$0xff]  }
 0x177   :  { %2106 = vmatpush1.bf16.msra.mxu1 %v8043_v28  ;;  %v8129_v28 = vld [vmem:[#allocation5 + $0x854] ss:$24 sps:$4 sm:$0xff]  }
 0x178   :  { %2192 = vmatpush1.bf16.msra.mxu0 %v8046_v29  ;;  %2107 = vmatprep.subr.bf16.mxu1 %v8051_v30  ;;  %v8132_v29 = vld [vmem:[#allocation7 + $0x244] ss:$24 sps:$4 sm:$0xff]   ;;  %v8127_v30 = vld [vmem:[#allocation5 + $0x850] ss:$24 sps:$4 sm:$0xff]  }
 0x179   :  { %2193 = vmatprep.subr.bf16.mxu0 %v8054_v31  ;;  %v8130_v31 = vld [vmem:[#allocation7 + $0x240] ss:$24 sps:$4 sm:$0xff]  }
 0x17b   :  { %2108 = vmatpush1.bf16.msra.mxu1 %v8049_v32  ;;  %v8135_v32 = vld [vmem:[#allocation5 + $0x884] ss:$24 sps:$4 sm:$0xff]  }
 0x17c   :  { %2194 = vmatpush1.bf16.msra.mxu0 %v8052_v33  ;;  %4003 = vmatprep.subr.bf16.mxu1 %v8060_v35  ;;  %v8138_v33 = vld [vmem:[#allocation7 + $0x274] ss:$24 sps:$4 sm:$0xff]   ;;  %v8136_v35 = vld [vmem:[#allocation7 + $0x270] ss:$24 sps:$4 sm:$0xff]  }
 0x17d   :  { %2206 = vmatprep.subr.bf16.mxu0 %v8057_v34  ;;  %v8133_v34 = vld [vmem:[#allocation5 + $0x880] ss:$24 sps:$4 sm:$0xff]  }
 0x17e   :  { %2110 = vmatmul.mubr.bf16.vlgmr.msra.gmra.mrb[4].mxu1 %v9353_v23 }
 0x17f   :  { %2196 = vmatmul.mubr.bf16.vlgmr.msra.gmra.mrb[4].mxu0 %v9345_v15  ;;  %4004 = vmatpush1.bf16.msra.mxu1 %v8058_v37  ;;  %v8144_v37 = vld [vmem:[#allocation7 + $0x2a4] ss:$24 sps:$4 sm:$0xff]  }
 0x180   :  { %2207 = vmatpush1.bf16.msra.mxu0 %v8055_v36  ;;  %4005 = vmatprep.subr.bf16.mxu1 %v8066_v39  ;;  %v8141_v36 = vld [vmem:[#allocation5 + $0x8b4] ss:$24 sps:$4 sm:$0xff]   ;;  %v8142_v39 = vld [vmem:[#allocation7 + $0x2a0] ss:$24 sps:$4 sm:$0xff]  }
 0x181   :  { %2208 = vmatprep.subr.bf16.mxu0 %v8063_v38  ;;  %2238 = vmatprep.mubr.bf16.mxu0 %v9350_v44  ;;  %v8139_v38 = vld [vmem:[#allocation5 + $0x8b0] ss:$24 sps:$4 sm:$0xff]  }
 0x182   :  { %4035 = vmatprep.mubr.bf16.mxu1 %v9337_v50 }
 0x183   :  { %4006 = vmatpush1.bf16.msra.mxu1 %v8064_v41  ;;  %v8150_v41 = vld [vmem:[#allocation7 + $0x2d4] ss:$24 sps:$4 sm:$0xff]  }
 0x184   :  { %2209 = vmatpush1.bf16.msra.mxu0 %v8061_v40  ;;  %4007 = vmatprep.subr.bf16.mxu1 %v8072_v43  ;;  %v8147_v40 = vld [vmem:[#allocation5 + $0x8e4] ss:$24 sps:$4 sm:$0xff]   ;;  %v8148_v43 = vld [vmem:[#allocation7 + $0x2d0] ss:$24 sps:$4 sm:$0xff]  }
 0x185   :  { %2210 = vmatprep.subr.bf16.mxu0 %v8069_v42  ;;  %v8145_v42 = vld [vmem:[#allocation5 + $0x8e0] ss:$24 sps:$4 sm:$0xff]  }
 0x187   :  { %4008 = vmatpush1.bf16.msra.mxu1 %v8070_v46  ;;  %v8156_v46 = vld [vmem:[#allocation7 + $0xc] ss:$24 sps:$4 sm:$0xff]  }
 0x188   :  { %2211 = vmatpush1.bf16.msra.mxu0 %v8067_v45  ;;  %4009 = vmatprep.subr.bf16.mxu1 %v8078_v48  ;;  %v8153_v45 = vld [vmem:[#allocation7 + $0x304] ss:$24 sps:$4 sm:$0xff]   ;;  %v8154_v48 = vld [vmem:[#allocation7 + $0x8] ss:$24 sps:$4 sm:$0xff]  }
 0x189   :  { %2212 = vmatprep.subr.bf16.mxu0 %v8075_v47  ;;  %v8151_v47 = vld [vmem:[#allocation7 + $0x300] ss:$24 sps:$4 sm:$0xff]  }
 0x18b   :  { %4010 = vmatpush1.bf16.msra.mxu1 %v8076_v51  ;;  %v8162_v51 = vld [vmem:[#allocation7 + $0x3c] ss:$24 sps:$4 sm:$0xff]  }
 0x18c   :  { %2213 = vmatpush1.bf16.msra.mxu0 %v8073_v49  ;;  %4011 = vmatprep.subr.bf16.mxu1 %v8084_v53  ;;  %v8159_v49 = vld [vmem:[#allocation7 + $0x334] ss:$24 sps:$4 sm:$0xff]   ;;  %v8160_v53 = vld [vmem:[#allocation7 + $0x38] ss:$24 sps:$4 sm:$0xff]  }
 0x18d   :  { %2214 = vmatprep.subr.bf16.mxu0 %v8081_v52  ;;  %v8157_v52 = vld [vmem:[#allocation7 + $0x330] ss:$24 sps:$4 sm:$0xff]  }
 0x18f   :  { %4012 = vmatpush1.bf16.msra.mxu1 %v8082_v56  ;;  %v8168_v56 = vld [vmem:[#allocation7 + $0x6c] ss:$24 sps:$4 sm:$0xff]  }
 0x190   :  { %2215 = vmatpush1.bf16.msra.mxu0 %v8079_v54  ;;  %4013 = vmatprep.subr.bf16.mxu1 %v8090_v58  ;;  %v8165_v54 = vld [vmem:[#allocation7 + $0x364] ss:$24 sps:$4 sm:$0xff]   ;;  %v8166_v58 = vld [vmem:[#allocation7 + $0x68] ss:$24 sps:$4 sm:$0xff]  }
 0x191   :  { %2216 = vmatprep.subr.bf16.mxu0 %v8087_v57  ;;  %v9367_v63 = vpop.f32.mrb[0].mxu1  ;;  %v8163_v57 = vld [vmem:[#allocation7 + $0x360] ss:$24 sps:$4 sm:$0xff]  }
 0x192   :  { %v9369_v0 = vpop.f32.mrb[1].mxu1 }
 0x193   :  { %v9371_v1 = vpop.f32.mrb[2].mxu1  ;;  %4014 = vmatpush1.bf16.msra.mxu1 %v8088_v60  ;;  %v8174_v60 = vld [vmem:[#allocation7 + $0x9c] ss:$24 sps:$4 sm:$0xff]  }
 0x194   :  { %2217 = vmatpush1.bf16.msra.mxu0 %v8085_v59  ;;  %v9373_v4 = vpop.f32.mrb[3].mxu1  ;;  %4015 = vmatprep.subr.bf16.mxu1 %v8096_v62  ;;  %v8171_v59 = vld [vmem:[#allocation7 + $0x394] ss:$24 sps:$4 sm:$0xff]   ;;  %v8172_v62 = vld [vmem:[#allocation7 + $0x98] ss:$24 sps:$4 sm:$0xff]  }
 0x195   :  { %2218 = vmatprep.subr.bf16.mxu0 %v8093_v61  ;;  %v8169_v61 = vld [vmem:[#allocation7 + $0x390] ss:$24 sps:$4 sm:$0xff]  }
 0x197   :  { %4016 = vmatpush1.bf16.msra.mxu1 %v8094_v3  ;;  %v8180_v3 = vld [vmem:[#allocation7 + $0xcc] ss:$24 sps:$4 sm:$0xff]  }
 0x198   :  { %2219 = vmatpush1.bf16.msra.mxu0 %v8091_v2  ;;  %4017 = vmatprep.subr.bf16.mxu1 %v8102_v6  ;;  %v8177_v2 = vld [vmem:[#allocation7 + $0x3c4] ss:$24 sps:$4 sm:$0xff]   ;;  %v8178_v6 = vld [vmem:[#allocation7 + $0xc8] ss:$24 sps:$4 sm:$0xff]  }
 0x199   :  { %2220 = vmatprep.subr.bf16.mxu0 %v8099_v5  ;;  %v8175_v5 = vld [vmem:[#allocation7 + $0x3c0] ss:$24 sps:$4 sm:$0xff]  }
 0x19b   :  { %4018 = vmatpush1.bf16.msra.mxu1 %v8100_v8  ;;  %v8186_v8 = vld [vmem:[#allocation7 + $0xfc] ss:$24 sps:$4 sm:$0xff]  }
 0x19c   :  { %2221 = vmatpush1.bf16.msra.mxu0 %v8097_v7  ;;  %4019 = vmatprep.subr.bf16.mxu1 %v8108_v10  ;;  %v8183_v7 = vld [vmem:[#allocation7 + $0x3f4] ss:$24 sps:$4 sm:$0xff]   ;;  %v8184_v10 = vld [vmem:[#allocation7 + $0xf8] ss:$24 sps:$4 sm:$0xff]  }
 0x19d   :  { %2222 = vmatprep.subr.bf16.mxu0 %v8105_v9  ;;  %v8181_v9 = vld [vmem:[#allocation7 + $0x3f0] ss:$24 sps:$4 sm:$0xff]  }
 0x19f   :  { %4020 = vmatpush1.bf16.msra.mxu1 %v8106_v13  ;;  %v8192_v13 = vld [vmem:[#allocation7 + $0x12c] ss:$24 sps:$4 sm:$0xff]  }
 0x1a0   :  { %2223 = vmatpush1.bf16.msra.mxu0 %v8103_v11  ;;  %4021 = vmatprep.subr.bf16.mxu1 %v8114_v16  ;;  %v8189_v11 = vld [vmem:[#allocation7 + $0x424] ss:$24 sps:$4 sm:$0xff]   ;;  %v8187_v16 = vld [vmem:[#allocation7 + $0x420] ss:$24 sps:$4 sm:$0xff]  }
 0x1a1   :  { %2224 = vmatprep.subr.bf16.mxu0 %v8111_v14 }
 0x1a3   :  { %4022 = vmatpush1.bf16.msra.mxu1 %v8112_v18 }
 0x1a4   :  { %2225 = vmatpush1.bf16.msra.mxu0 %v8109_v17  ;;  %4023 = vmatprep.subr.bf16.mxu1 %v8120_v20  ;;  %v8190_v17 = vld [vmem:[#allocation7 + $0x128] ss:$24 sps:$4 sm:$0xff]  }
 0x1a5   :  { %2226 = vmatprep.subr.bf16.mxu0 %v8117_v19 }
 0x1a7   :  { %4024 = vmatpush1.bf16.msra.mxu1 %v8118_v22  ;;  %v8991_v22 = vld [vmem:[#allocation2] sm:$0xff] }
 0x1a8   :  { %2227 = vmatpush1.bf16.msra.mxu0 %v8115_v21  ;;  %4025 = vmatprep.subr.bf16.mxu1 %v8126_v25 }
 0x1a9   :  { %2228 = vmatprep.subr.bf16.mxu0 %v8123_v24 }
 0x1ab   :  { %4026 = vmatpush1.bf16.msra.mxu1 %v8124_v27  ;;  %v8195_v27 = vld [vmem:[#allocation7 + $0x454] ss:$24 sps:$4 sm:$0xff]  }
 0x1ac   :  { %2229 = vmatpush1.bf16.msra.mxu0 %v8121_v26  ;;  %4027 = vmatprep.subr.bf16.mxu1 %v8132_v29  ;;  %v8992_v29 = vld [vmem:[#allocation2 + $0x8] sm:$0xff] }
 0x1ad   :  { %2230 = vmatprep.subr.bf16.mxu0 %v8129_v28  ;;  %v8198_v28 = vld [vmem:[#allocation7 + $0x15c] ss:$24 sps:$4 sm:$0xff]  }
 0x1af   :  { %4028 = vmatpush1.bf16.msra.mxu1 %v8130_v31 }
 0x1b0   :  { %2231 = vmatpush1.bf16.msra.mxu0 %v8127_v30  ;;  %4029 = vmatprep.subr.bf16.mxu1 %v8138_v33  ;;  %v8993_v33 = vld [vmem:[#allocation2 + $0x30] sm:$0xff] }
 0x1b1   :  { %2232 = vmatprep.subr.bf16.mxu0 %v8135_v32  ;;  %v8196_v32 = vld [vmem:[#allocation7 + $0x158] ss:$24 sps:$4 sm:$0xff]  }
 0x1b3   :  { %4030 = vmatpush1.bf16.msra.mxu1 %v8136_v35 }
 0x1b4   :  { %2233 = vmatpush1.bf16.msra.mxu0 %v8133_v34  ;;  %4031 = vmatprep.subr.bf16.mxu1 %v8144_v37  ;;  %v8994_v34 = vld [vmem:[#allocation2 + $0x38] sm:$0xff]  ;;  %v8204_v37 = vld [vmem:[#allocation7 + $0x18c] ss:$24 sps:$4 sm:$0xff]  }
 0x1b5   :  { %2234 = vmatprep.subr.bf16.mxu0 %v8141_v36 }
 0x1b7   :  { %4032 = vmatpush1.bf16.msra.mxu1 %v8142_v39  ;;  %v8199_v39 = vld [vmem:[#allocation7 + $0x480] ss:$24 sps:$4 sm:$0xff]  }
 0x1b8   :  { %2235 = vmatpush1.bf16.msra.mxu0 %v8139_v38  ;;  %4033 = vmatprep.subr.bf16.mxu1 %v8150_v41  ;;  %v8210_v41 = vld [vmem:[#allocation7 + $0x1bc] ss:$24 sps:$4 sm:$0xff]  }
 0x1b9   :  { %2236 = vmatprep.subr.bf16.mxu0 %v8147_v40  ;;  %v8207_v40 = vld [vmem:[#allocation7 + $0x4b4] ss:$24 sps:$4 sm:$0xff]  }
 0x1bb   :  { %4034 = vmatpush1.bf16.msra.mxu1 %v8148_v43  ;;  %v8208_v43 = vld [vmem:[#allocation7 + $0x1b8] ss:$24 sps:$4 sm:$0xff]  }
 0x1bc   :  { %2237 = vmatpush1.bf16.msra.mxu0 %v8145_v42  ;;  %4046 = vmatprep.subr.bf16.mxu1 %v8153_v45  ;;  %v8205_v42 = vld [vmem:[#allocation7 + $0x4b0] ss:$24 sps:$4 sm:$0xff]   ;;  %v8213_v45 = vld [vmem:[#allocation7 + $0x4e4] ss:$24 sps:$4 sm:$0xff]  }
 0x1bd   :  { %4132 = vmatprep.subr.bf16.mxu0 %v8156_v46  ;;  %v8216_v46 = vld [vmem:[#allocation7 + $0x1ec] ss:$24 sps:$4 sm:$0xff]  }
 0x1be   :  { %4036 = vmatmul.mubr.bf16.vlgmr.msra.gmra.mrb[8].mxu1 %v9343_v12 }
 0x1bf   :  { %2239 = vmatmul.mubr.bf16.vlgmr.msra.gmra.mrb[4].mxu0 %v9353_v23  ;;  %4047 = vmatpush1.bf16.msra.mxu1 %v8151_v47  ;;  %v8211_v47 = vld [vmem:[#allocation7 + $0x4e0] ss:$24 sps:$4 sm:$0xff]  }
 0x1c0   :  { %4133 = vmatpush1.bf16.msra.mxu0 %v8154_v48  ;;  %4048 = vmatprep.subr.bf16.mxu1 %v8159_v49  ;;  %v8214_v48 = vld [vmem:[#allocation7 + $0x1e8] ss:$24 sps:$4 sm:$0xff]   ;;  %v8219_v49 = vld [vmem:[#allocation7 + $0x514] ss:$24 sps:$4 sm:$0xff]  }
 0x1c1   :  { %4134 = vmatprep.subr.bf16.mxu0 %v8162_v51  ;;  %4078 = vmatprep.mubr.bf16.mxu1 %v9339_v55  ;;  %v8222_v51 = vld [vmem:[#allocation7 + $0x21c] ss:$24 sps:$4 sm:$0xff]  }
 0x1c2   :  { %4164 = vmatprep.mubr.bf16.mxu0 %v9337_v50 }
 0x1c3   :  { %4049 = vmatpush1.bf16.msra.mxu1 %v8157_v52  ;;  %v8217_v52 = vld [vmem:[#allocation7 + $0x510] ss:$24 sps:$4 sm:$0xff]  }
 0x1c4   :  { %4135 = vmatpush1.bf16.msra.mxu0 %v8160_v53  ;;  %4050 = vmatprep.subr.bf16.mxu1 %v8165_v54  ;;  %v8220_v53 = vld [vmem:[#allocation7 + $0x218] ss:$24 sps:$4 sm:$0xff]   ;;  %v8225_v54 = vld [vmem:[#allocation7 + $0x544] ss:$24 sps:$4 sm:$0xff]  }
 0x1c5   :  { %4136 = vmatprep.subr.bf16.mxu0 %v8168_v56  ;;  %v8228_v56 = vld [vmem:[#allocation7 + $0x24c] ss:$24 sps:$4 sm:$0xff]  }
 0x1c7   :  { %4051 = vmatpush1.bf16.msra.mxu1 %v8163_v57  ;;  %v8223_v57 = vld [vmem:[#allocation7 + $0x540] ss:$24 sps:$4 sm:$0xff]  }
 0x1c8   :  { %4137 = vmatpush1.bf16.msra.mxu0 %v8166_v58  ;;  %4052 = vmatprep.subr.bf16.mxu1 %v8171_v59  ;;  %v8226_v58 = vld [vmem:[#allocation7 + $0x248] ss:$24 sps:$4 sm:$0xff]   ;;  %v8231_v59 = vld [vmem:[#allocation7 + $0x574] ss:$24 sps:$4 sm:$0xff]  }
 0x1c9   :  { %4138 = vmatprep.subr.bf16.mxu0 %v8174_v60  ;;  %v8234_v60 = vld [vmem:[#allocation7 + $0x27c] ss:$24 sps:$4 sm:$0xff]  }
 0x1cb   :  { %4053 = vmatpush1.bf16.msra.mxu1 %v8169_v61  ;;  %v8229_v61 = vld [vmem:[#allocation7 + $0x570] ss:$24 sps:$4 sm:$0xff]  }
 0x1cc   :  { %4139 = vmatpush1.bf16.msra.mxu0 %v8172_v62  ;;  %4054 = vmatprep.subr.bf16.mxu1 %v8177_v2  ;;  %v8232_v62 = vld [vmem:[#allocation7 + $0x278] ss:$24 sps:$4 sm:$0xff]   ;;  %v8237_v2 = vld [vmem:[#allocation7 + $0x5a4] ss:$24 sps:$4 sm:$0xff]  }
 0x1cd   :  { %4140 = vmatprep.subr.bf16.mxu0 %v8180_v3  ;;  %v8240_v3 = vld [vmem:[#allocation7 + $0x2ac] ss:$24 sps:$4 sm:$0xff]  }
 0x1cf   :  { %4055 = vmatpush1.bf16.msra.mxu1 %v8175_v5  ;;  %v8235_v5 = vld [vmem:[#allocation7 + $0x5a0] ss:$24 sps:$4 sm:$0xff]  }
 0x1d0   :  { %4141 = vmatpush1.bf16.msra.mxu0 %v8178_v6  ;;  %4056 = vmatprep.subr.bf16.mxu1 %v8183_v7  ;;  %v8238_v6 = vld [vmem:[#allocation7 + $0x2a8] ss:$24 sps:$4 sm:$0xff]   ;;  %v8243_v7 = vld [vmem:[#allocation7 + $0x5d4] ss:$24 sps:$4 sm:$0xff]  }
 0x1d1   :  { %4142 = vmatprep.subr.bf16.mxu0 %v8186_v8  ;;  %v8246_v8 = vld [vmem:[#allocation7 + $0x2dc] ss:$24 sps:$4 sm:$0xff]  }
 0x1d2   :  { %v1982_v14 = vpop.f32.mrb[0].mxu0 }
 0x1d3   :  { %v7575_v18 = vadd.f32 %v1982_v14, %v9367_v63  ;;  %v1984_v19 = vpop.f32.mrb[1].mxu0  ;;  %4057 = vmatpush1.bf16.msra.mxu1 %v8181_v9  ;;  %v8193_v63 = vld [vmem:[#allocation7 + $0x450] ss:$24 sps:$4 sm:$0xff]   ;;  %v8247_v14 = vld [vmem:[#allocation7 + $0x600] ss:$24 sps:$4 sm:$0xff]  }
 0x1d4   :  { %v7576_v20 = vadd.f32 %v1984_v19, %v9369_v0  ;;  %v1986_v21 = vpop.f32.mrb[2].mxu0  ;;  %4143 = vmatpush1.bf16.msra.mxu0 %v8184_v10  ;;  %4058 = vmatprep.subr.bf16.mxu1 %v8189_v11  ;;  %v8241_v9 = vld [vmem:[#allocation7 + $0x5d0] ss:$24 sps:$4 sm:$0xff]   ;;  %v8249_v11 = vld [vmem:[#allocation7 + $0x604] ss:$24 sps:$4 sm:$0xff]  }
 0x1d5   :  { %v2249_v24 = vmul.f32 %v8991_v22, %v7575_v18  ;;  %v7577_v25 = vadd.f32 %v1986_v21, %v9371_v1  ;;  %v1988_v26 = vpop.f32.mrb[3].mxu0  ;;  %4144 = vmatprep.subr.bf16.mxu0 %v8192_v13  ;;  %v8201_v1 = vld [vmem:[#allocation7 + $0x484] ss:$24 sps:$4 sm:$0xff]   ;;  %v8244_v10 = vld [vmem:[#allocation7 + $0x2d8] ss:$24 sps:$4 sm:$0xff]  }
 0x1d6   :  { %v2250_v30 = vmul.f32 %v8992_v29, %v7576_v20  ;;  %v7578_v31 = vadd.f32 %v1988_v26, %v9373_v4  ;;  %v8202_v4 = vld [vmem:[#allocation7 + $0x188] ss:$24 sps:$4 sm:$0xff]   ;;  %v8252_v13 = vld [vmem:[#allocation7 + $0x30c] ss:$24 sps:$4 sm:$0xff]   ;;  %v8258_v18 = vld [vmem:[#allocation7 + $0x33c] ss:$24 sps:$4 sm:$0xff]  }
 0x1d7   :  { %v2255_v0 = vmul.f32 %v8993_v33, %v7577_v25  ;;  %4059 = vmatpush1.bf16.msra.mxu1 %v8187_v16  ;;  %v8250_v16 = vld [vmem:[#allocation7 + $0x308] ss:$24 sps:$4 sm:$0xff]   ;;  %v8256_v20 = vld [vmem:[#allocation7 + $0x338] ss:$24 sps:$4 sm:$0xff]   ;;  %v8261_v21 = vld [vmem:[#allocation7 + $0x664] ss:$24 sps:$4 sm:$0xff]  }
 0x1d8   :  { %v2256_v35 = vmul.f32 %v8994_v34, %v7578_v31  ;;  %4145 = vmatpush1.bf16.msra.mxu0 %v8190_v17  ;;  %v9383_v36 = vadd.f32 %v2250_v30, %v2249_v24  ;;  %4060 = vmatprep.subr.bf16.mxu1 %v8195_v27  ;;  %v8255_v17 = vld [vmem:[#allocation7 + $0x634] ss:$24 sps:$4 sm:$0xff]   ;;  %v8253_v19 = vld [vmem:[#allocation7 + $0x630] ss:$24 sps:$4 sm:$0xff]   ;;  %v8259_v24 = vld [vmem:[#allocation7 + $0x660] ss:$24 sps:$4 sm:$0xff]  }
 0x1d9   :  { %4146 = vmatprep.subr.bf16.mxu0 %v8198_v28  ;;  %v8264_v22 = vld [vmem:[#allocation7 + $0x36c] ss:$24 sps:$4 sm:$0xff]   ;;  %v8262_v25 = vld [vmem:[#allocation7 + $0x368] ss:$24 sps:$4 sm:$0xff]   ;;  %v8270_v27 = vld [vmem:[#allocation7 + $0x39c] ss:$24 sps:$4 sm:$0xff]  }
 0x1da   :  { %v9385_v38 = vadd.f32 %v2256_v35, %v2255_v0  ;;  %v8267_v26 = vld [vmem:[#allocation7 + $0x694] ss:$24 sps:$4 sm:$0xff]   ;;  %v8265_v28 = vld [vmem:[#allocation7 + $0x690] ss:$24 sps:$4 sm:$0xff]   ;;  %v8273_v30 = vld [vmem:[#allocation7 + $0x6c4] ss:$24 sps:$4 sm:$0xff]  }
 0x1db   :  { %4061 = vmatpush1.bf16.msra.mxu1 %v8193_v63  ;;  %v8268_v29 = vld [vmem:[#allocation7 + $0x398] ss:$24 sps:$4 sm:$0xff]   ;;  %v8276_v31 = vld [vmem:[#allocation7 + $0x3cc] ss:$24 sps:$4 sm:$0xff]   ;;  %v8282_v0 = vld [vmem:[#allocation7 + $0x3fc] ss:$24 sps:$4 sm:$0xff]  }
 0x1dc   :  { %4147 = vmatpush1.bf16.msra.mxu0 %v8196_v32  ;;  %4062 = vmatprep.subr.bf16.mxu1 %v8201_v1  ;;  %v8271_v63 = vld [vmem:[#allocation7 + $0x6c0] ss:$24 sps:$4 sm:$0xff]   ;;  %v8279_v33 = vld [vmem:[#allocation7 + $0x6f4] ss:$24 sps:$4 sm:$0xff]   ;;  %v8277_v34 = vld [vmem:[#allocation7 + $0x6f0] ss:$24 sps:$4 sm:$0xff]  }
 0x1dd   :  { %4148 = vmatprep.subr.bf16.mxu0 %v8204_v37  ;;  %v8274_v32 = vld [vmem:[#allocation7 + $0x3c8] ss:$24 sps:$4 sm:$0xff]   ;;  %v8280_v35 = vld [vmem:[#allocation7 + $0x3f8] ss:$24 sps:$4 sm:$0xff]   ;;  %v8285_v1 = vld [vmem:[#allocation7 + $0x724] ss:$24 sps:$4 sm:$0xff]  }
 0x1de   :  { %v8288_v37 = vld [vmem:[#allocation7 + $0x42c] ss:$24 sps:$4 sm:$0xff]  }
 0x1df   :  { %4063 = vmatpush1.bf16.msra.mxu1 %v8199_v39  ;;  %v8283_v39 = vld [vmem:[#allocation7 + $0x720] ss:$24 sps:$4 sm:$0xff]  }
 0x1e0   :  { %4149 = vmatpush1.bf16.msra.mxu0 %v8202_v4  ;;  %4064 = vmatprep.subr.bf16.mxu1 %v8207_v40  ;;  %v8286_v4 = vld [vmem:[#allocation7 + $0x428] ss:$24 sps:$4 sm:$0xff]   ;;  %v8291_v40 = vld [vmem:[#allocation7 + $0x754] ss:$24 sps:$4 sm:$0xff]  }
 0x1e1   :  { %4150 = vmatprep.subr.bf16.mxu0 %v8210_v41  ;;  %v8294_v41 = vld [vmem:[#allocation7 + $0x45c] ss:$24 sps:$4 sm:$0xff]  }
 0x1e3   :  { %4065 = vmatpush1.bf16.msra.mxu1 %v8205_v42  ;;  %v8289_v42 = vld [vmem:[#allocation7 + $0x750] ss:$24 sps:$4 sm:$0xff]  }
 0x1e4   :  { %4151 = vmatpush1.bf16.msra.mxu0 %v8208_v43  ;;  %4066 = vmatprep.subr.bf16.mxu1 %v8213_v45  ;;  %v8292_v43 = vld [vmem:[#allocation7 + $0x458] ss:$24 sps:$4 sm:$0xff]   ;;  %v8297_v45 = vld [vmem:[#allocation7 + $0x784] ss:$24 sps:$4 sm:$0xff]  }
 0x1e5   :  { %4152 = vmatprep.subr.bf16.mxu0 %v8216_v46  ;;  %v8300_v46 = vld [vmem:[#allocation7 + $0x48c] ss:$24 sps:$4 sm:$0xff]  }
 0x1e7   :  { %4067 = vmatpush1.bf16.msra.mxu1 %v8211_v47  ;;  %v8295_v47 = vld [vmem:[#allocation7 + $0x780] ss:$24 sps:$4 sm:$0xff]  }
 0x1e8   :  { %4153 = vmatpush1.bf16.msra.mxu0 %v8214_v48  ;;  %4068 = vmatprep.subr.bf16.mxu1 %v8219_v49  ;;  %v8298_v48 = vld [vmem:[#allocation7 + $0x488] ss:$24 sps:$4 sm:$0xff]   ;;  %v8303_v49 = vld [vmem:[#allocation7 + $0x7b4] ss:$24 sps:$4 sm:$0xff]  }
 0x1e9   :  { %4154 = vmatprep.subr.bf16.mxu0 %v8222_v51  ;;  %v8306_v51 = vld [vmem:[#allocation7 + $0x4bc] ss:$24 sps:$4 sm:$0xff]  }
 0x1eb   :  { %4069 = vmatpush1.bf16.msra.mxu1 %v8217_v52  ;;  %v8301_v52 = vld [vmem:[#allocation7 + $0x7b0] ss:$24 sps:$4 sm:$0xff]  }
 0x1ec   :  { %4155 = vmatpush1.bf16.msra.mxu0 %v8220_v53  ;;  %4070 = vmatprep.subr.bf16.mxu1 %v8225_v54  ;;  %v8304_v53 = vld [vmem:[#allocation7 + $0x4b8] ss:$24 sps:$4 sm:$0xff]   ;;  %v8309_v54 = vld [vmem:[#allocation7 + $0x7e4] ss:$24 sps:$4 sm:$0xff]  }
 0x1ed   :  { %4156 = vmatprep.subr.bf16.mxu0 %v8228_v56  ;;  %v8312_v56 = vld [vmem:[#allocation7 + $0x4ec] ss:$24 sps:$4 sm:$0xff]  }
 0x1ef   :  { %4071 = vmatpush1.bf16.msra.mxu1 %v8223_v57  ;;  %v8307_v57 = vld [vmem:[#allocation7 + $0x7e0] ss:$24 sps:$4 sm:$0xff]  }
 0x1f0   :  { %4157 = vmatpush1.bf16.msra.mxu0 %v8226_v58  ;;  %4072 = vmatprep.subr.bf16.mxu1 %v8231_v59  ;;  %v8310_v58 = vld [vmem:[#allocation7 + $0x4e8] ss:$24 sps:$4 sm:$0xff]   ;;  %v8315_v59 = vld [vmem:[#allocation7 + $0x814] ss:$24 sps:$4 sm:$0xff]  }
 0x1f1   :  { %4158 = vmatprep.subr.bf16.mxu0 %v8234_v60  ;;  %v8318_v60 = vld [vmem:[#allocation7 + $0x51c] ss:$24 sps:$4 sm:$0xff]  }
 0x1f3   :  { %4073 = vmatpush1.bf16.msra.mxu1 %v8229_v61  ;;  %v8313_v61 = vld [vmem:[#allocation7 + $0x810] ss:$24 sps:$4 sm:$0xff]  }
 0x1f4   :  { %4159 = vmatpush1.bf16.msra.mxu0 %v8232_v62  ;;  %4074 = vmatprep.subr.bf16.mxu1 %v8237_v2  ;;  %v8316_v62 = vld [vmem:[#allocation7 + $0x518] ss:$24 sps:$4 sm:$0xff]   ;;  %v8321_v2 = vld [vmem:[#allocation7 + $0x844] ss:$24 sps:$4 sm:$0xff]  }
 0x1f5   :  { %4160 = vmatprep.subr.bf16.mxu0 %v8240_v3  ;;  %v8324_v3 = vld [vmem:[#allocation7 + $0x54c] ss:$24 sps:$4 sm:$0xff]  }
 0x1f7   :  { %4075 = vmatpush1.bf16.msra.mxu1 %v8235_v5  ;;  %v8319_v5 = vld [vmem:[#allocation7 + $0x840] ss:$24 sps:$4 sm:$0xff]  }
 0x1f8   :  { %4161 = vmatpush1.bf16.msra.mxu0 %v8238_v6  ;;  %4076 = vmatprep.subr.bf16.mxu1 %v8243_v7  ;;  %v8322_v6 = vld [vmem:[#allocation7 + $0x548] ss:$24 sps:$4 sm:$0xff]   ;;  %v8327_v7 = vld [vmem:[#allocation7 + $0x874] ss:$24 sps:$4 sm:$0xff]  }
 0x1f9   :  { %4162 = vmatprep.subr.bf16.mxu0 %v8246_v8  ;;  %v8330_v8 = vld [vmem:[#allocation7 + $0x57c] ss:$24 sps:$4 sm:$0xff]  }
 0x1fb   :  { %4077 = vmatpush1.bf16.msra.mxu1 %v8241_v9  ;;  %v8325_v9 = vld [vmem:[#allocation7 + $0x870] ss:$24 sps:$4 sm:$0xff]  }
 0x1fc   :  { %4163 = vmatpush1.bf16.msra.mxu0 %v8244_v10  ;;  %4089 = vmatprep.subr.bf16.mxu1 %v8249_v11  ;;  %v8328_v10 = vld [vmem:[#allocation7 + $0x578] ss:$24 sps:$4 sm:$0xff]   ;;  %v8333_v11 = vld [vmem:[#allocation7 + $0x8a4] ss:$24 sps:$4 sm:$0xff]  }
 0x1fd   :  { %4175 = vmatprep.subr.bf16.mxu0 %v8252_v13  ;;  %v8336_v13 = vld [vmem:[#allocation7 + $0x5ac] ss:$24 sps:$4 sm:$0xff]  }
 0x1fe   :  { %4079 = vmatmul.mubr.bf16.vlgmr.msra.gmra.mrb[8].mxu1 %v9345_v15 }
 0x1ff   :  { %4165 = vmatmul.mubr.bf16.vlgmr.msra.gmra.mrb[8].mxu0 %v9343_v12  ;;  %4090 = vmatpush1.bf16.msra.mxu1 %v8247_v14  ;;  %v8331_v14 = vld [vmem:[#allocation7 + $0x8a0] ss:$24 sps:$4 sm:$0xff]  }
 0x200   :  { %4176 = vmatpush1.bf16.msra.mxu0 %v8250_v16  ;;  %4091 = vmatprep.subr.bf16.mxu1 %v8255_v17  ;;  %v8334_v16 = vld [vmem:[#allocation7 + $0x5a8] ss:$24 sps:$4 sm:$0xff]   ;;  %v8339_v17 = vld [vmem:[#allocation7 + $0x8d4] ss:$24 sps:$4 sm:$0xff]  }
 0x201   :  { %4177 = vmatprep.subr.bf16.mxu0 %v8258_v18  ;;  %4121 = vmatprep.mubr.bf16.mxu1 %v9350_v44  ;;  %v8342_v18 = vld [vmem:[#allocation7 + $0x5dc] ss:$24 sps:$4 sm:$0xff]  }
 0x202   :  { %4207 = vmatprep.mubr.bf16.mxu0 %v9339_v55 }
 0x203   :  { %4092 = vmatpush1.bf16.msra.mxu1 %v8253_v19  ;;  %v8337_v19 = vld [vmem:[#allocation7 + $0x8d0] ss:$24 sps:$4 sm:$0xff]  }
 0x204   :  { %4178 = vmatpush1.bf16.msra.mxu0 %v8256_v20  ;;  %4093 = vmatprep.subr.bf16.mxu1 %v8261_v21  ;;  %v8340_v20 = vld [vmem:[#allocation7 + $0x5d8] ss:$24 sps:$4 sm:$0xff]   ;;  %v8345_v21 = vld [vmem:[#allocation7 + $0x60c] ss:$24 sps:$4 sm:$0xff]  }
 0x205   :  { %4179 = vmatprep.subr.bf16.mxu0 %v8264_v22  ;;  %v8348_v22 = vld [vmem:[#allocation7 + $0x14] ss:$24 sps:$4 sm:$0xff]  }
 0x207   :  { %4094 = vmatpush1.bf16.msra.mxu1 %v8259_v24  ;;  %v8343_v24 = vld [vmem:[#allocation7 + $0x608] ss:$24 sps:$4 sm:$0xff]  }
 0x208   :  { %4180 = vmatpush1.bf16.msra.mxu0 %v8262_v25  ;;  %4095 = vmatprep.subr.bf16.mxu1 %v8267_v26  ;;  %v8346_v25 = vld [vmem:[#allocation7 + $0x10] ss:$24 sps:$4 sm:$0xff]   ;;  %v8351_v26 = vld [vmem:[#allocation7 + $0x63c] ss:$24 sps:$4 sm:$0xff]  }
 0x209   :  { %4181 = vmatprep.subr.bf16.mxu0 %v8270_v27  ;;  %v8354_v27 = vld [vmem:[#allocation7 + $0x44] ss:$24 sps:$4 sm:$0xff]  }
 0x20b   :  { %4096 = vmatpush1.bf16.msra.mxu1 %v8265_v28  ;;  %v8349_v28 = vld [vmem:[#allocation7 + $0x638] ss:$24 sps:$4 sm:$0xff]  }
 0x20c   :  { %4182 = vmatpush1.bf16.msra.mxu0 %v8268_v29  ;;  %4097 = vmatprep.subr.bf16.mxu1 %v8273_v30  ;;  %v8352_v29 = vld [vmem:[#allocation7 + $0x40] ss:$24 sps:$4 sm:$0xff]   ;;  %v8357_v30 = vld [vmem:[#allocation7 + $0x66c] ss:$24 sps:$4 sm:$0xff]  }
 0x20d   :  { %4183 = vmatprep.subr.bf16.mxu0 %v8276_v31  ;;  %v8360_v31 = vld [vmem:[#allocation7 + $0x74] ss:$24 sps:$4 sm:$0xff]  }
 0x20f   :  { %4098 = vmatpush1.bf16.msra.mxu1 %v8271_v63  ;;  %v8355_v63 = vld [vmem:[#allocation7 + $0x668] ss:$24 sps:$4 sm:$0xff]  }
 0x210   :  { %4184 = vmatpush1.bf16.msra.mxu0 %v8274_v32  ;;  %4099 = vmatprep.subr.bf16.mxu1 %v8279_v33  ;;  %v8358_v32 = vld [vmem:[#allocation7 + $0x70] ss:$24 sps:$4 sm:$0xff]   ;;  %v8363_v33 = vld [vmem:[#allocation7 + $0x69c] ss:$24 sps:$4 sm:$0xff]  }
 0x211   :  { %4185 = vmatprep.subr.bf16.mxu0 %v8282_v0  ;;  %v8366_v0 = vld [vmem:[#allocation7 + $0xa4] ss:$24 sps:$4 sm:$0xff]  }
 0x213   :  { %4100 = vmatpush1.bf16.msra.mxu1 %v8277_v34  ;;  %v8361_v34 = vld [vmem:[#allocation7 + $0x698] ss:$24 sps:$4 sm:$0xff]  }
 0x214   :  { %4186 = vmatpush1.bf16.msra.mxu0 %v8280_v35  ;;  %4101 = vmatprep.subr.bf16.mxu1 %v8285_v1  ;;  %v8364_v35 = vld [vmem:[#allocation7 + $0xa0] ss:$24 sps:$4 sm:$0xff]   ;;  %v8369_v1 = vld [vmem:[#allocation7 + $0x6cc] ss:$24 sps:$4 sm:$0xff]  }
 0x215   :  { %4187 = vmatprep.subr.bf16.mxu0 %v8288_v37  ;;  %v8372_v37 = vld [vmem:[#allocation7 + $0xd4] ss:$24 sps:$4 sm:$0xff]  }
 0x217   :  { %4102 = vmatpush1.bf16.msra.mxu1 %v8283_v39  ;;  %v8367_v39 = vld [vmem:[#allocation7 + $0x6c8] ss:$24 sps:$4 sm:$0xff]  }
 0x218   :  { %4188 = vmatpush1.bf16.msra.mxu0 %v8286_v4  ;;  %4103 = vmatprep.subr.bf16.mxu1 %v8291_v40  ;;  %v8370_v4 = vld [vmem:[#allocation7 + $0xd0] ss:$24 sps:$4 sm:$0xff]   ;;  %v8375_v40 = vld [vmem:[#allocation7 + $0x6fc] ss:$24 sps:$4 sm:$0xff]  }
 0x219   :  { %4189 = vmatprep.subr.bf16.mxu0 %v8294_v41  ;;  %v8373_v41 = vld [vmem:[#allocation7 + $0x6f8] ss:$24 sps:$4 sm:$0xff]  }
 0x21b   :  { %4104 = vmatpush1.bf16.msra.mxu1 %v8289_v42  ;;  %v8376_v42 = vld [vmem:[#allocation7 + $0x100] ss:$24 sps:$4 sm:$0xff]  }
 0x21c   :  { %4190 = vmatpush1.bf16.msra.mxu0 %v8292_v43  ;;  %4105 = vmatprep.subr.bf16.mxu1 %v8297_v45  ;;  %v8381_v43 = vld [vmem:[#allocation7 + $0x72c] ss:$24 sps:$4 sm:$0xff]  }
 0x21d   :  { %4191 = vmatprep.subr.bf16.mxu0 %v8300_v46  ;;  %v8384_v45 = vld [vmem:[#allocation7 + $0x134] ss:$24 sps:$4 sm:$0xff]  }
 0x21f   :  { %4106 = vmatpush1.bf16.msra.mxu1 %v8295_v47  ;;  %v8379_v47 = vld [vmem:[#allocation7 + $0x728] ss:$24 sps:$4 sm:$0xff]  }
 0x220   :  { %4192 = vmatpush1.bf16.msra.mxu0 %v8298_v48  ;;  %4107 = vmatprep.subr.bf16.mxu1 %v8303_v49  ;;  %v8382_v48 = vld [vmem:[#allocation7 + $0x130] ss:$24 sps:$4 sm:$0xff]  }
 0x221   :  { %4193 = vmatprep.subr.bf16.mxu0 %v8306_v51  ;;  %v8995_v49 = vld [vmem:[#allocation2 + $0x10] sm:$0xff] }
 0x223   :  { %4108 = vmatpush1.bf16.msra.mxu1 %v8301_v52 }
 0x224   :  { %4194 = vmatpush1.bf16.msra.mxu0 %v8304_v53  ;;  %4109 = vmatprep.subr.bf16.mxu1 %v8309_v54  ;;  %v8996_v53 = vld [vmem:[#allocation2 + $0x18] sm:$0xff] }
 0x225   :  { %4195 = vmatprep.subr.bf16.mxu0 %v8312_v56 }
 0x227   :  { %4110 = vmatpush1.bf16.msra.mxu1 %v8307_v57  ;;  %v8387_v57 = vld [vmem:[#allocation7 + $0x75c] ss:$24 sps:$4 sm:$0xff]  }
 0x228   :  { %4196 = vmatpush1.bf16.msra.mxu0 %v8310_v58  ;;  %4111 = vmatprep.subr.bf16.mxu1 %v8315_v59  ;;  %v8390_v58 = vld [vmem:[#allocation7 + $0x164] ss:$24 sps:$4 sm:$0xff]  }
 0x229   :  { %4197 = vmatprep.subr.bf16.mxu0 %v8318_v60  ;;  %v8997_v60 = vld [vmem:[#allocation2 + $0x40] sm:$0xff] }
 0x22b   :  { %4112 = vmatpush1.bf16.msra.mxu1 %v8313_v61 }
 0x22c   :  { %4198 = vmatpush1.bf16.msra.mxu0 %v8316_v62  ;;  %4113 = vmatprep.subr.bf16.mxu1 %v8321_v2  ;;  %v8998_v2 = vld [vmem:[#allocation2 + $0x48] sm:$0xff] }
 0x22d   :  { %4199 = vmatprep.subr.bf16.mxu0 %v8324_v3 }
 0x22f   :  { %4114 = vmatpush1.bf16.msra.mxu1 %v8319_v5  ;;  %v8385_v5 = vld [vmem:[#allocation7 + $0x758] ss:$24 sps:$4 sm:$0xff]  }
 0x230   :  { %4200 = vmatpush1.bf16.msra.mxu0 %v8322_v6  ;;  %4115 = vmatprep.subr.bf16.mxu1 %v8327_v7  ;;  %v8388_v6 = vld [vmem:[#allocation7 + $0x160] ss:$24 sps:$4 sm:$0xff]  }
 0x231   :  { %4201 = vmatprep.subr.bf16.mxu0 %v8330_v8 }
 0x233   :  { %4116 = vmatpush1.bf16.msra.mxu1 %v8325_v9  ;;  %v8393_v9 = vld [vmem:[#allocation7 + $0x78c] ss:$24 sps:$4 sm:$0xff]  }
 0x234   :  { %4202 = vmatpush1.bf16.msra.mxu0 %v8328_v10  ;;  %4117 = vmatprep.subr.bf16.mxu1 %v8333_v11  ;;  %v8396_v10 = vld [vmem:[#allocation7 + $0x194] ss:$24 sps:$4 sm:$0xff]  }
 0x235   :  { %4203 = vmatprep.subr.bf16.mxu0 %v8336_v13  ;;  %v8394_v13 = vld [vmem:[#allocation7 + $0x190] ss:$24 sps:$4 sm:$0xff]  }
 0x237   :  { %4118 = vmatpush1.bf16.msra.mxu1 %v8331_v14  ;;  %v8399_v14 = vld [vmem:[#allocation7 + $0x7bc] ss:$24 sps:$4 sm:$0xff]  }
 0x238   :  { %4204 = vmatpush1.bf16.msra.mxu0 %v8334_v16  ;;  %4119 = vmatprep.subr.bf16.mxu1 %v8339_v17  ;;  %v8402_v16 = vld [vmem:[#allocation7 + $0x1c4] ss:$24 sps:$4 sm:$0xff]   ;;  %v8397_v17 = vld [vmem:[#allocation7 + $0x7b8] ss:$24 sps:$4 sm:$0xff]  }
 0x239   :  { %4205 = vmatprep.subr.bf16.mxu0 %v8342_v18  ;;  %v8405_v18 = vld [vmem:[#allocation7 + $0x7ec] ss:$24 sps:$4 sm:$0xff]  }
 0x23b   :  { %4120 = vmatpush1.bf16.msra.mxu1 %v8337_v19  ;;  %v8408_v19 = vld [vmem:[#allocation7 + $0x1f4] ss:$24 sps:$4 sm:$0xff]  }
 0x23c   :  { %4206 = vmatpush1.bf16.msra.mxu0 %v8340_v20  ;;  %4261 = vmatprep.subr.bf16.mxu1 %v8348_v22  ;;  %v8403_v20 = vld [vmem:[#allocation7 + $0x7e8] ss:$24 sps:$4 sm:$0xff]   ;;  %v8411_v22 = vld [vmem:[#allocation7 + $0x81c] ss:$24 sps:$4 sm:$0xff]  }
 0x23d   :  { %4218 = vmatprep.subr.bf16.mxu0 %v8345_v21  ;;  %v8406_v21 = vld [vmem:[#allocation7 + $0x1f0] ss:$24 sps:$4 sm:$0xff]  }
 0x23e   :  { %4122 = vmatmul.mubr.bf16.vlgmr.msra.gmra.mrb[8].mxu1 %v9353_v23 }
 0x23f   :  { %4208 = vmatmul.mubr.bf16.vlgmr.msra.gmra.mrb[8].mxu0 %v9345_v15  ;;  %4262 = vmatpush1.bf16.msra.mxu1 %v8346_v25  ;;  %v8409_v25 = vld [vmem:[#allocation7 + $0x818] ss:$24 sps:$4 sm:$0xff]  }
 0x240   :  { %4219 = vmatpush1.bf16.msra.mxu0 %v8343_v24  ;;  %4263 = vmatprep.subr.bf16.mxu1 %v8354_v27  ;;  %v8414_v24 = vld [vmem:[#allocation7 + $0x224] ss:$24 sps:$4 sm:$0xff]  }
 0x241   :  { %4220 = vmatprep.subr.bf16.mxu0 %v8351_v26  ;;  %4250 = vmatprep.mubr.bf16.mxu0 %v9350_v44  ;;  %v8412_v26 = vld [vmem:[#allocation7 + $0x220] ss:$24 sps:$4 sm:$0xff]   ;;  %v8417_v27 = vld [vmem:[#allocation7 + $0x84c] ss:$24 sps:$4 sm:$0xff]  }
 0x242   :  { %4293 = vmatprep.mubr.bf16.mxu1 %v9337_v50  ;;  %v8378_v50 = vld [vmem:[#allocation7 + $0x104] ss:$24 sps:$4 sm:$0xff]  }
 0x243   :  { %4264 = vmatpush1.bf16.msra.mxu1 %v8352_v29  ;;  %v8415_v29 = vld [vmem:[#allocation7 + $0x848] ss:$24 sps:$4 sm:$0xff]  }
 0x244   :  { %4221 = vmatpush1.bf16.msra.mxu0 %v8349_v28  ;;  %4265 = vmatprep.subr.bf16.mxu1 %v8360_v31  ;;  %v8420_v28 = vld [vmem:[#allocation7 + $0x254] ss:$24 sps:$4 sm:$0xff]  }
 0x245   :  { %4222 = vmatprep.subr.bf16.mxu0 %v8357_v30  ;;  %v8418_v30 = vld [vmem:[#allocation7 + $0x250] ss:$24 sps:$4 sm:$0xff]   ;;  %v8423_v31 = vld [vmem:[#allocation7 + $0x87c] ss:$24 sps:$4 sm:$0xff]  }
 0x247   :  { %4266 = vmatpush1.bf16.msra.mxu1 %v8358_v32  ;;  %v8421_v32 = vld [vmem:[#allocation7 + $0x878] ss:$24 sps:$4 sm:$0xff]  }
 0x248   :  { %4223 = vmatpush1.bf16.msra.mxu0 %v8355_v63  ;;  %4267 = vmatprep.subr.bf16.mxu1 %v8366_v0  ;;  %v8426_v63 = vld [vmem:[#allocation7 + $0x284] ss:$24 sps:$4 sm:$0xff]  }
 0x249   :  { %4224 = vmatprep.subr.bf16.mxu0 %v8363_v33  ;;  %v8424_v33 = vld [vmem:[#allocation7 + $0x280] ss:$24 sps:$4 sm:$0xff]   ;;  %v8429_v0 = vld [vmem:[#allocation7 + $0x8ac] ss:$24 sps:$4 sm:$0xff]  }
 0x24b   :  { %4268 = vmatpush1.bf16.msra.mxu1 %v8364_v35  ;;  %v8427_v35 = vld [vmem:[#allocation7 + $0x8a8] ss:$24 sps:$4 sm:$0xff]  }
 0x24c   :  { %4225 = vmatpush1.bf16.msra.mxu0 %v8361_v34  ;;  %4269 = vmatprep.subr.bf16.mxu1 %v8372_v37  ;;  %v8432_v34 = vld [vmem:[#allocation7 + $0x2b4] ss:$24 sps:$4 sm:$0xff]  }
 0x24d   :  { %4226 = vmatprep.subr.bf16.mxu0 %v8369_v1  ;;  %v8430_v1 = vld [vmem:[#allocation7 + $0x2b0] ss:$24 sps:$4 sm:$0xff]   ;;  %v8435_v37 = vld [vmem:[#allocation7 + $0x8dc] ss:$24 sps:$4 sm:$0xff]  }
 0x24f   :  { %4270 = vmatpush1.bf16.msra.mxu1 %v8370_v4  ;;  %v8433_v4 = vld [vmem:[#allocation7 + $0x8d8] ss:$24 sps:$4 sm:$0xff]  }
 0x250   :  { %4227 = vmatpush1.bf16.msra.mxu0 %v8367_v39  ;;  %4271 = vmatprep.subr.bf16.mxu1 %v8378_v50  ;;  %v8438_v39 = vld [vmem:[#allocation7 + $0x2e4] ss:$24 sps:$4 sm:$0xff]   ;;  %v8441_v50 = vld [vmem:[#allocation7 + $0x314] ss:$24 sps:$4 sm:$0xff]  }
 0x251   :  { %4228 = vmatprep.subr.bf16.mxu0 %v8375_v40  ;;  %v2111_v46 = vpop.f32.mrb[4].mxu1  ;;  %v8436_v40 = vld [vmem:[#allocation7 + $0x2e0] ss:$24 sps:$4 sm:$0xff]  }
 0x252   :  { %v2251_v51 = vmul.f32 %v8995_v49, %v2111_v46  ;;  %v2113_v52 = vpop.f32.mrb[5].mxu1  ;;  %v8442_v46 = vld [vmem:[#allocation7 + $0x340] ss:$24 sps:$4 sm:$0xff]   ;;  %v8541_v49 = vld [vmem:[#allocation11 + $0x30] ss:$24 sps:$4 sm:$0xff]  }
 0x253   :  { %v2252_v54 = vmul.f32 %v8996_v53, %v2113_v52  ;;  %v2115_v56 = vpop.f32.mrb[6].mxu1  ;;  %4272 = vmatpush1.bf16.msra.mxu1 %v8376_v42  ;;  %v8444_v42 = vld [vmem:[#allocation7 + $0x344] ss:$24 sps:$4 sm:$0xff]   ;;  %v8549_v52 = vld [vmem:[#allocation11 + $0x64] ss:$24 sps:$4 sm:$0xff]  }
 0x254   :  { %4229 = vmatpush1.bf16.msra.mxu0 %v8373_v41  ;;  %v2262_v59 = vadd.f32 %v9383_v36, %v2251_v51  ;;  %v2257_v61 = vmul.f32 %v8997_v60, %v2115_v56  ;;  %v2117_v62 = vpop.f32.mrb[7].mxu1  ;;  %4273 = vmatprep.subr.bf16.mxu1 %v8384_v45  ;;  %v8391_v36 = vld [vmem:[#allocation7 + $0x788] ss:$24 sps:$4 sm:$0xff]   ;;  %v8535_v45 = vld [vmem:[#allocation11] ss:$24 sps:$4 sm:$0xff]  }
 0x255   :  { %4230 = vmatprep.subr.bf16.mxu0 %v8381_v43  ;;  %v2258_v3 = vmul.f32 %v8998_v2, %v2117_v62  ;;  %v8439_v41 = vld [vmem:[#allocation7 + $0x310] ss:$24 sps:$4 sm:$0xff]   ;;  %v8450_v53 = vld [vmem:[#allocation7 + $0x3a4] ss:$24 sps:$4 sm:$0xff]   ;;  %v8555_v56 = vld [vmem:[#allocation11 + $0x94] ss:$24 sps:$4 sm:$0xff]  }
 0x256   :  { %v9396_v7 = vadd.f32 %v2262_v59, %v2252_v54  ;;  %v2269_v8 = vadd.f32 %v9385_v38, %v2257_v61  ;;  %v8400_v38 = vld [vmem:[#allocation7 + $0x1c0] ss:$24 sps:$4 sm:$0xff]   ;;  %v8537_v43 = vld [vmem:[#allocation11 + $0x4] ss:$24 sps:$4 sm:$0xff]   ;;  %v8547_v54 = vld [vmem:[#allocation11 + $0x60] ss:$24 sps:$4 sm:$0xff]  }
 0x257   :  { %4274 = vmatpush1.bf16.msra.mxu1 %v8382_v48  ;;  %v8447_v48 = vld [vmem:[#allocation7 + $0x374] ss:$24 sps:$4 sm:$0xff]   ;;  %v8445_v51 = vld [vmem:[#allocation7 + $0x370] ss:$24 sps:$4 sm:$0xff]   ;;  %v8456_v60 = vld [vmem:[#allocation7 + $0x404] ss:$24 sps:$4 sm:$0xff]  }
 0x258   :  { %4231 = vmatpush1.bf16.msra.mxu0 %v8379_v47  ;;  %v9399_v11 = vadd.f32 %v2269_v8, %v2258_v3  ;;  %4275 = vmatprep.subr.bf16.mxu1 %v8390_v58  ;;  %v8543_v47 = vld [vmem:[#allocation11 + $0x34] ss:$24 sps:$4 sm:$0xff]   ;;  %v8451_v58 = vld [vmem:[#allocation7 + $0x3d0] ss:$24 sps:$4 sm:$0xff]   ;;  %v8559_v61 = vld [vmem:[#allocation11 + $0xc0] ss:$24 sps:$4 sm:$0xff]  }
 0x259   :  { %4232 = vmatprep.subr.bf16.mxu0 %v8387_v57  ;;  %v8553_v57 = vld [vmem:[#allocation11 + $0x90] ss:$24 sps:$4 sm:$0xff]   ;;  %v8561_v59 = vld [vmem:[#allocation11 + $0xc4] ss:$24 sps:$4 sm:$0xff]   ;;  %v8454_v62 = vld [vmem:[#allocation7 + $0x400] ss:$24 sps:$4 sm:$0xff]  }
 0x25a   :  { %v8459_v2 = vld [vmem:[#allocation7 + $0x434] ss:$24 sps:$4 sm:$0xff]  }
 0x25b   :  { %4276 = vmatpush1.bf16.msra.mxu1 %v8388_v6  ;;  %v8999_v6 = vld [vmem:[#allocation2 + $0x20] sm:$0xff] }
 0x25c   :  { %4233 = vmatpush1.bf16.msra.mxu0 %v8385_v5  ;;  %4277 = vmatprep.subr.bf16.mxu1 %v8396_v10  ;;  %v8567_v5 = vld [vmem:[#allocation11 + $0xf4] ss:$24 sps:$4 sm:$0xff]   ;;  %v8565_v10 = vld [vmem:[#allocation11 + $0xf0] ss:$24 sps:$4 sm:$0xff]  }
 0x25d   :  { %4234 = vmatprep.subr.bf16.mxu0 %v8393_v9 }
 0x25f   :  { %4278 = vmatpush1.bf16.msra.mxu1 %v8394_v13 }
 0x260   :  { %4235 = vmatpush1.bf16.msra.mxu0 %v8391_v36  ;;  %4279 = vmatprep.subr.bf16.mxu1 %v8402_v16  ;;  %v9000_v36 = vld [vmem:[#allocation2 + $0x28] sm:$0xff] }
 0x261   :  { %4236 = vmatprep.subr.bf16.mxu0 %v8399_v14  ;;  %v8457_v16 = vld [vmem:[#allocation7 + $0x430] ss:$24 sps:$4 sm:$0xff]  }
 0x263   :  { %4280 = vmatpush1.bf16.msra.mxu1 %v8400_v38 }
 0x264   :  { %4237 = vmatpush1.bf16.msra.mxu0 %v8397_v17  ;;  %4281 = vmatprep.subr.bf16.mxu1 %v8408_v19  ;;  %v9001_v17 = vld [vmem:[#allocation2 + $0x50] sm:$0xff] }
 0x265   :  { %4238 = vmatprep.subr.bf16.mxu0 %v8405_v18 }
 0x267   :  { %4282 = vmatpush1.bf16.msra.mxu1 %v8406_v21  ;;  %v9002_v21 = vld [vmem:[#allocation2 + $0x58] sm:$0xff] }
 0x268   :  { %4239 = vmatpush1.bf16.msra.mxu0 %v8403_v20  ;;  %4283 = vmatprep.subr.bf16.mxu1 %v8414_v24  ;;  %v8462_v20 = vld [vmem:[#allocation7 + $0x464] ss:$24 sps:$4 sm:$0xff]  }
 0x269   :  { %4240 = vmatprep.subr.bf16.mxu0 %v8411_v22  ;;  %v8571_v24 = vld [vmem:[#allocation11 + $0x120] ss:$24 sps:$4 sm:$0xff]  }
 0x26b   :  { %4284 = vmatpush1.bf16.msra.mxu1 %v8412_v26 }
 0x26c   :  { %4241 = vmatpush1.bf16.msra.mxu0 %v8409_v25  ;;  %4285 = vmatprep.subr.bf16.mxu1 %v8420_v28  ;;  %v8573_v25 = vld [vmem:[#allocation11 + $0x124] ss:$24 sps:$4 sm:$0xff]   ;;  %v8460_v28 = vld [vmem:[#allocation7 + $0x460] ss:$24 sps:$4 sm:$0xff]  }
 0x26d   :  { %4242 = vmatprep.subr.bf16.mxu0 %v8417_v27 }
 0x26f   :  { %4286 = vmatpush1.bf16.msra.mxu1 %v8418_v30 }
 0x270   :  { %4243 = vmatpush1.bf16.msra.mxu0 %v8415_v29  ;;  %4287 = vmatprep.subr.bf16.mxu1 %v8426_v63  ;;  %v8579_v29 = vld [vmem:[#allocation11 + $0x154] ss:$24 sps:$4 sm:$0xff]   ;;  %v8577_v63 = vld [vmem:[#allocation11 + $0x150] ss:$24 sps:$4 sm:$0xff]  }
 0x271   :  { %4244 = vmatprep.subr.bf16.mxu0 %v8423_v31  ;;  %v8465_v31 = vld [vmem:[#allocation7 + $0x494] ss:$24 sps:$4 sm:$0xff]  }
 0x273   :  { %4288 = vmatpush1.bf16.msra.mxu1 %v8424_v33  ;;  %v8468_v33 = vld [vmem:[#allocation7 + $0x4c4] ss:$24 sps:$4 sm:$0xff]  }
 0x274   :  { %4245 = vmatpush1.bf16.msra.mxu0 %v8421_v32  ;;  %4289 = vmatprep.subr.bf16.mxu1 %v8432_v34  ;;  %v8585_v32 = vld [vmem:[#allocation11 + $0x184] ss:$24 sps:$4 sm:$0xff]   ;;  %v8591_v34 = vld [vmem:[#allocation11 + $0x1b4] ss:$24 sps:$4 sm:$0xff]  }
 0x275   :  { %4246 = vmatprep.subr.bf16.mxu0 %v8429_v0  ;;  %v8466_v0 = vld [vmem:[#allocation7 + $0x4c0] ss:$24 sps:$4 sm:$0xff]  }
 0x277   :  { %4290 = vmatpush1.bf16.msra.mxu1 %v8430_v1  ;;  %v8589_v1 = vld [vmem:[#allocation11 + $0x1b0] ss:$24 sps:$4 sm:$0xff]  }
 0x278   :  { %4247 = vmatpush1.bf16.msra.mxu0 %v8427_v35  ;;  %4291 = vmatprep.subr.bf16.mxu1 %v8438_v39  ;;  %v8471_v35 = vld [vmem:[#allocation7 + $0x4f4] ss:$24 sps:$4 sm:$0xff]   ;;  %v8474_v39 = vld [vmem:[#allocation7 + $0x524] ss:$24 sps:$4 sm:$0xff]  }
 0x279   :  { %4248 = vmatprep.subr.bf16.mxu0 %v8435_v37  ;;  %v8469_v37 = vld [vmem:[#allocation7 + $0x4f0] ss:$24 sps:$4 sm:$0xff]  }
 0x27b   :  { %4292 = vmatpush1.bf16.msra.mxu1 %v8436_v40  ;;  %v8597_v40 = vld [vmem:[#allocation11 + $0x1e4] ss:$24 sps:$4 sm:$0xff]  }
 0x27c   :  { %4249 = vmatpush1.bf16.msra.mxu0 %v8433_v4  ;;  %4304 = vmatprep.subr.bf16.mxu1 %v8441_v50  ;;  %v8595_v4 = vld [vmem:[#allocation11 + $0x1e0] ss:$24 sps:$4 sm:$0xff]   ;;  %v8472_v50 = vld [vmem:[#allocation7 + $0x520] ss:$24 sps:$4 sm:$0xff]  }
 0x27d   :  { %6292 = vmatprep.subr.bf16.mxu0 %v8537_v43  ;;  %v8475_v43 = vld [vmem:[#allocation7 + $0x550] ss:$24 sps:$4 sm:$0xff]  }
 0x27e   :  { %4294 = vmatmul.mubr.bf16.vlgmr.msra.gmra.mrb[12].mxu1 %v9343_v12  ;;  %v8448_v12 = vld [vmem:[#allocation7 + $0x3a0] ss:$24 sps:$4 sm:$0xff]  }
 0x27f   :  { %4251 = vmatmul.mubr.bf16.vlgmr.msra.gmra.mrb[8].mxu0 %v9353_v23  ;;  %4305 = vmatpush1.bf16.msra.mxu1 %v8439_v41  ;;  %v8477_v41 = vld [vmem:[#allocation7 + $0x554] ss:$24 sps:$4 sm:$0xff]  }
 0x280   :  { %4336 = vmatprep.mubr.bf16.mxu1 %v9339_v55  ;;  %4306 = vmatprep.subr.bf16.mxu1 %v8444_v42  ;;  %v8453_v55 = vld [vmem:[#allocation7 + $0x3d4] ss:$24 sps:$4 sm:$0xff]   ;;  %v8603_v42 = vld [vmem:[#allocation11 + $0x214] ss:$24 sps:$4 sm:$0xff]  }
 0x281   :  { %6293 = vmatpush1.bf16.msra.mxu0 %v8535_v45  ;;  %v8601_v45 = vld [vmem:[#allocation11 + $0x210] ss:$24 sps:$4 sm:$0xff]  }
 0x282   :  { %6294 = vmatprep.subr.bf16.mxu0 %v8543_v47  ;;  %v8609_v47 = vld [vmem:[#allocation11 + $0x244] ss:$24 sps:$4 sm:$0xff]  }
 0x283   :  { %4307 = vmatpush1.bf16.msra.mxu1 %v8442_v46  ;;  %v8480_v46 = vld [vmem:[#allocation7 + $0x584] ss:$24 sps:$4 sm:$0xff]  }
 0x284   :  { %4308 = vmatprep.subr.bf16.mxu1 %v8447_v48  ;;  %v8478_v48 = vld [vmem:[#allocation7 + $0x580] ss:$24 sps:$4 sm:$0xff]  }
 0x285   :  { %6295 = vmatpush1.bf16.msra.mxu0 %v8541_v49  ;;  %v8607_v49 = vld [vmem:[#allocation11 + $0x240] ss:$24 sps:$4 sm:$0xff]  }
 0x286   :  { %6296 = vmatprep.subr.bf16.mxu0 %v8549_v52  ;;  %v8615_v52 = vld [vmem:[#allocation11 + $0x274] ss:$24 sps:$4 sm:$0xff]  }
 0x287   :  { %4309 = vmatpush1.bf16.msra.mxu1 %v8445_v51  ;;  %v8483_v51 = vld [vmem:[#allocation7 + $0x5b4] ss:$24 sps:$4 sm:$0xff]  }
 0x288   :  { %4310 = vmatprep.subr.bf16.mxu1 %v8450_v53  ;;  %v8481_v53 = vld [vmem:[#allocation7 + $0x5b0] ss:$24 sps:$4 sm:$0xff]  }
 0x289   :  { %6297 = vmatpush1.bf16.msra.mxu0 %v8547_v54  ;;  %v8613_v54 = vld [vmem:[#allocation11 + $0x270] ss:$24 sps:$4 sm:$0xff]  }
 0x28a   :  { %6298 = vmatprep.subr.bf16.mxu0 %v8555_v56  ;;  %v8621_v56 = vld [vmem:[#allocation11 + $0x2a4] ss:$24 sps:$4 sm:$0xff]  }
 0x28b   :  { %4311 = vmatpush1.bf16.msra.mxu1 %v8448_v12  ;;  %v8486_v12 = vld [vmem:[#allocation7 + $0x5e4] ss:$24 sps:$4 sm:$0xff]  }
 0x28c   :  { %4312 = vmatprep.subr.bf16.mxu1 %v8453_v55  ;;  %v8619_v55 = vld [vmem:[#allocation11 + $0x2a0] ss:$24 sps:$4 sm:$0xff]  }
 0x28d   :  { %6299 = vmatpush1.bf16.msra.mxu0 %v8553_v57  ;;  %v8484_v57 = vld [vmem:[#allocation7 + $0x5e0] ss:$24 sps:$4 sm:$0xff]  }
 0x28e   :  { %6300 = vmatprep.subr.bf16.mxu0 %v8561_v59  ;;  %v8489_v59 = vld [vmem:[#allocation7 + $0x614] ss:$24 sps:$4 sm:$0xff]  }
 0x28f   :  { %4313 = vmatpush1.bf16.msra.mxu1 %v8451_v58  ;;  %v8627_v58 = vld [vmem:[#allocation11 + $0x2d4] ss:$24 sps:$4 sm:$0xff]  }
 0x290   :  { %4314 = vmatprep.subr.bf16.mxu1 %v8456_v60  ;;  %v8625_v60 = vld [vmem:[#allocation11 + $0x2d0] ss:$24 sps:$4 sm:$0xff]  }
 0x291   :  { %6301 = vmatpush1.bf16.msra.mxu0 %v8559_v61  ;;  %v8487_v61 = vld [vmem:[#allocation7 + $0x610] ss:$24 sps:$4 sm:$0xff]  }
 0x292   :  { %v2240_v3 = vpop.f32.mrb[4].mxu0  ;;  %6302 = vmatprep.subr.bf16.mxu0 %v8567_v5  ;;  %v8495_v5 = vld [vmem:[#allocation7 + $0x674] ss:$24 sps:$4 sm:$0xff]  }
 0x293   :  { %v2253_v8 = vmul.f32 %v8999_v6, %v2240_v3  ;;  %v2242_v9 = vpop.f32.mrb[5].mxu0  ;;  %4315 = vmatpush1.bf16.msra.mxu1 %v8454_v62  ;;  %v8492_v62 = vld [vmem:[#allocation7 + $0x644] ss:$24 sps:$4 sm:$0xff]   ;;  %v8490_v3 = vld [vmem:[#allocation7 + $0x640] ss:$24 sps:$4 sm:$0xff]  }
 0x294   :  { %v2254_v13 = vmul.f32 %v9000_v36, %v2242_v9  ;;  %v2244_v14 = vpop.f32.mrb[6].mxu0  ;;  %4316 = vmatprep.subr.bf16.mxu1 %v8459_v2  ;;  %v8633_v2 = vld [vmem:[#allocation11 + $0x304] ss:$24 sps:$4 sm:$0xff]   ;;  %v8496_v9 = vld [vmem:[#allocation7 + $0x6a0] ss:$24 sps:$4 sm:$0xff]  }
 0x295   :  { %v2259_v38 = vmul.f32 %v9001_v17, %v2244_v14  ;;  %v2246_v18 = vpop.f32.mrb[7].mxu0  ;;  %v2264_v19 = vadd.f32 %v9396_v7, %v2253_v8  ;;  %6303 = vmatpush1.bf16.msra.mxu0 %v8565_v10  ;;  %v8463_v7 = vld [vmem:[#allocation7 + $0x490] ss:$24 sps:$4 sm:$0xff]   ;;  %v8498_v8 = vld [vmem:[#allocation7 + $0x6a4] ss:$24 sps:$4 sm:$0xff]  }
 0x296   :  { %v2260_v22 = vmul.f32 %v9002_v21, %v2246_v18  ;;  %6304 = vmatprep.subr.bf16.mxu0 %v8573_v25  ;;  %v8493_v6 = vld [vmem:[#allocation7 + $0x670] ss:$24 sps:$4 sm:$0xff]   ;;  %v8501_v10 = vld [vmem:[#allocation7 + $0x6d4] ss:$24 sps:$4 sm:$0xff]   ;;  %v8508_v17 = vld [vmem:[#allocation7 + $0x760] ss:$24 sps:$4 sm:$0xff]  }
 0x297   :  { %v2271_v26 = vadd.f32 %v9399_v11, %v2259_v38  ;;  %v2265_v27 = vadd.f32 %v2264_v19, %v2254_v13  ;;  %4317 = vmatpush1.bf16.msra.mxu1 %v8457_v16  ;;  %v8583_v11 = vld [vmem:[#allocation11 + $0x180] ss:$24 sps:$4 sm:$0xff]   ;;  %v8499_v36 = vld [vmem:[#allocation7 + $0x6d0] ss:$24 sps:$4 sm:$0xff]   ;;  %v8502_v13 = vld [vmem:[#allocation7 + $0x700] ss:$24 sps:$4 sm:$0xff]  }
 0x298   :  { %4318 = vmatprep.subr.bf16.mxu1 %v8462_v20  ;;  %v8507_v14 = vld [vmem:[#allocation7 + $0x734] ss:$24 sps:$4 sm:$0xff]   ;;  %v8510_v16 = vld [vmem:[#allocation7 + $0x764] ss:$24 sps:$4 sm:$0xff]   ;;  %v8511_v18 = vld [vmem:[#allocation7 + $0x790] ss:$24 sps:$4 sm:$0xff]  }
 0x299   :  { %2266 = vadd.xlane.f32.xlu0 %v2265_v27  ;;  %v2272_v30 = vadd.f32 %v2271_v26, %v2260_v22  ;;  %6305 = vmatpush1.bf16.msra.mxu0 %v8571_v24  ;;  %v8513_v38 = vld [vmem:[#allocation7 + $0x794] ss:$24 sps:$4 sm:$0xff]   ;;  %v8516_v19 = vld [vmem:[#allocation7 + $0x7c4] ss:$24 sps:$4 sm:$0xff]   ;;  %v8514_v20 = vld [vmem:[#allocation7 + $0x7c0] ss:$24 sps:$4 sm:$0xff]  }
 0x29a   :  { %6306 = vmatprep.subr.bf16.mxu0 %v8579_v29  ;;  %v8519_v21 = vld [vmem:[#allocation7 + $0x7f4] ss:$24 sps:$4 sm:$0xff]   ;;  %v8517_v22 = vld [vmem:[#allocation7 + $0x7f0] ss:$24 sps:$4 sm:$0xff]   ;;  %v8522_v24 = vld [vmem:[#allocation7 + $0x824] ss:$24 sps:$4 sm:$0xff]  }
 0x29b   :  { %4319 = vmatpush1.bf16.msra.mxu1 %v8460_v28  ;;  %v8520_v25 = vld [vmem:[#allocation7 + $0x820] ss:$24 sps:$4 sm:$0xff]   ;;  %v8525_v26 = vld [vmem:[#allocation7 + $0x854] ss:$24 sps:$4 sm:$0xff]   ;;  %v8523_v27 = vld [vmem:[#allocation7 + $0x850] ss:$24 sps:$4 sm:$0xff]  }
 0x29c   :  { %4320 = vmatprep.subr.bf16.mxu1 %v8465_v31  ;;  %v8528_v28 = vld [vmem:[#allocation7 + $0x884] ss:$24 sps:$4 sm:$0xff]   ;;  %v8526_v29 = vld [vmem:[#allocation7 + $0x880] ss:$24 sps:$4 sm:$0xff]   ;;  %v8529_v31 = vld [vmem:[#allocation7 + $0x8b0] ss:$24 sps:$4 sm:$0xff]  }
 0x29d   :  { %2273 = vadd.xlane.f32.xlu0 %v2272_v30  ;;  %6307 = vmatpush1.bf16.msra.mxu0 %v8577_v63  ;;  %v8531_v30 = vld [vmem:[#allocation7 + $0x8b4] ss:$24 sps:$4 sm:$0xff]   ;;  %v8534_v63 = vld [vmem:[#allocation7 + $0x8e4] ss:$24 sps:$4 sm:$0xff]  }
 0x29e   :  { %6308 = vmatprep.subr.bf16.mxu0 %v8585_v32  ;;  %v8540_v32 = vld [vmem:[#allocation11 + $0xc] ss:$24 sps:$4 sm:$0xff]  }
 0x29f   :  { %4321 = vmatpush1.bf16.msra.mxu1 %v8463_v7  ;;  %v8532_v7 = vld [vmem:[#allocation7 + $0x8e0] ss:$24 sps:$4 sm:$0xff]  }
 0x2a0   :  { %4322 = vmatprep.subr.bf16.mxu1 %v8468_v33  ;;  %v8538_v33 = vld [vmem:[#allocation11 + $0x8] ss:$24 sps:$4 sm:$0xff]  }
 0x2a1   :  { %6309 = vmatpush1.bf16.msra.mxu0 %v8583_v11  ;;  %v8546_v11 = vld [vmem:[#allocation11 + $0x3c] ss:$24 sps:$4 sm:$0xff]  }
 0x2a2   :  { %6310 = vmatprep.subr.bf16.mxu0 %v8591_v34  ;;  %v8552_v34 = vld [vmem:[#allocation11 + $0x6c] ss:$24 sps:$4 sm:$0xff]  }
 0x2a3   :  { %4323 = vmatpush1.bf16.msra.mxu1 %v8466_v0  ;;  %v8544_v0 = vld [vmem:[#allocation11 + $0x38] ss:$24 sps:$4 sm:$0xff]  }
 0x2a4   :  { %4324 = vmatprep.subr.bf16.mxu1 %v8471_v35  ;;  %v8550_v35 = vld [vmem:[#allocation11 + $0x68] ss:$24 sps:$4 sm:$0xff]  }
 0x2a5   :  { %6311 = vmatpush1.bf16.msra.mxu0 %v8589_v1  ;;  %v8558_v1 = vld [vmem:[#allocation11 + $0x9c] ss:$24 sps:$4 sm:$0xff]  }
 0x2a6   :  { %6312 = vmatprep.subr.bf16.mxu0 %v8597_v40  ;;  %v8570_v40 = vld [vmem:[#allocation11 + $0xfc] ss:$24 sps:$4 sm:$0xff]  }
 0x2a7   :  { %4325 = vmatpush1.bf16.msra.mxu1 %v8469_v37  ;;  %v8556_v37 = vld [vmem:[#allocation11 + $0x98] ss:$24 sps:$4 sm:$0xff]  }
 0x2a8   :  { %4326 = vmatprep.subr.bf16.mxu1 %v8474_v39  ;;  %v8564_v39 = vld [vmem:[#allocation11 + $0xcc] ss:$24 sps:$4 sm:$0xff]  }
 0x2a9   :  { %6313 = vmatpush1.bf16.msra.mxu0 %v8595_v4  ;;  %v8562_v4 = vld [vmem:[#allocation11 + $0xc8] ss:$24 sps:$4 sm:$0xff]  }
 0x2aa   :  { %6314 = vmatprep.subr.bf16.mxu0 %v8603_v42 }
 0x2ab   :  { %4327 = vmatpush1.bf16.msra.mxu1 %v8472_v50  ;;  %v8568_v50 = vld [vmem:[#allocation11 + $0xf8] ss:$24 sps:$4 sm:$0xff]  }
 0x2ac   :  { %4328 = vmatprep.subr.bf16.mxu1 %v8477_v41 }
 0x2ad   :  { %6315 = vmatpush1.bf16.msra.mxu0 %v8601_v45  ;;  %v8574_v45 = vld [vmem:[#allocation11 + $0x128] ss:$24 sps:$4 sm:$0xff]  }
 0x2ae   :  { %6316 = vmatprep.subr.bf16.mxu0 %v8609_v47  ;;  %v8582_v47 = vld [vmem:[#allocation11 + $0x15c] ss:$24 sps:$4 sm:$0xff]  }
 0x2af   :  { %4329 = vmatpush1.bf16.msra.mxu1 %v8475_v43 }
 0x2b0   :  { %4330 = vmatprep.subr.bf16.mxu1 %v8480_v46 }
 0x2b1   :  { %6317 = vmatpush1.bf16.msra.mxu0 %v8607_v49  ;;  %v8580_v49 = vld [vmem:[#allocation11 + $0x158] ss:$24 sps:$4 sm:$0xff]  }
 0x2b2   :  { %6318 = vmatprep.subr.bf16.mxu0 %v8615_v52 }
 0x2b3   :  { %4331 = vmatpush1.bf16.msra.mxu1 %v8478_v48  ;;  %v4392_v48 = vlaneseq }
 0x2b4   :  { %4332 = vmatprep.subr.bf16.mxu1 %v8483_v51  ;;  %v8588_v51 = vld [vmem:[#allocation11 + $0x18c] ss:$24 sps:$4 sm:$0xff]  }
 0x2b5   :  { %6319 = vmatpush1.bf16.msra.mxu0 %v8613_v54  ;;  %v9409_v52 = vshrl.u32 %v4392_v48, 7  ;;  %v8594_v54 = vld [vmem:[#allocation11 + $0x1bc] ss:$24 sps:$4 sm:$0xff]  }
 0x2b6   :  { %6320 = vmatprep.subr.bf16.mxu0 %v8621_v56 }
 0x2b7   :  { %4333 = vmatpush1.bf16.msra.mxu1 %v8481_v53  ;;  %v8586_v53 = vld [vmem:[#allocation11 + $0x188] ss:$24 sps:$4 sm:$0xff]   ;;  %v9415_v56 = vsub.s32 1, %v9409_v52 }
 0x2b8   :  { %4334 = vmatprep.subr.bf16.mxu1 %v8486_v12  ;;  %v9412_v12 = vsub.s32 0, %v9409_v52 }
 0x2b9   :  { %6321 = vmatpush1.bf16.msra.mxu0 %v8619_v55  ;;  %v9418_v55 = vsub.s32 2, %v9409_v52 }
 0x2ba   :  { %6322 = vmatprep.subr.bf16.mxu0 %v8627_v58  ;;  %v9420_v58 = vld [vmem:[#allocation8] sm:$0x3f] }
 0x2bb   :  { %4335 = vmatpush1.bf16.msra.mxu1 %v8484_v57  ;;  %v8592_v57 = vld [vmem:[#allocation11 + $0x1b8] ss:$24 sps:$4 sm:$0xff]  }
 0x2bc   :  { %4347 = vmatprep.subr.bf16.mxu1 %v8489_v59  ;;  %v9423_v59 = vsub.s32 4, %v9409_v52 }
 0x2bd   :  { %6323 = vmatpush1.bf16.msra.mxu0 %v8625_v60  ;;  %v9426_v60 = vsub.s32 5, %v9409_v52 }
 0x2be   :  { %4337 = vmatmul.mubr.bf16.vlgmr.msra.gmra.mrb[12].mxu1 %v9345_v15  ;;  %6335 = vmatprep.subr.bf16.mxu0 %v8633_v2  ;;  %v8504_v15 = vld [vmem:[#allocation7 + $0x704] ss:$24 sps:$4 sm:$0xff]   ;;  %v4399_v2 = vrot.slane %v9420_v58, %v9415_v56 }
 0x2bf   :  { %4348 = vmatpush1.bf16.msra.mxu1 %v8487_v61  ;;  %4379 = vmatprep.mubr.bf16.mxu1 %v9350_v44  ;;  %v8505_v44 = vld [vmem:[#allocation7 + $0x730] ss:$24 sps:$4 sm:$0xff]  }
 0x2c0   :  { %4349 = vmatprep.subr.bf16.mxu1 %v8492_v62  ;;  %v8600_v61 = vld [vmem:[#allocation11 + $0x1ec] ss:$24 sps:$4 sm:$0xff]   ;;  %v4395_v62 = vrot.slane %v9420_v58, %v9412_v12 }
 0x2c3   :  { %4350 = vmatpush1.bf16.msra.mxu1 %v8490_v3  ;;  %v9432_v3 = vld [vmem:[#allocation10] sm:$0x3f] }
 0x2c4   :  { %4351 = vmatprep.subr.bf16.mxu1 %v8495_v5  ;;  %v4403_v5 = vrot.slane %v9420_v58, %v9418_v55 }
 0x2c7   :  { %4352 = vmatpush1.bf16.msra.mxu1 %v8493_v6  ;;  %v8598_v6 = vld [vmem:[#allocation11 + $0x1e8] ss:$24 sps:$4 sm:$0xff]  }
 0x2c8   :  { %4353 = vmatprep.subr.bf16.mxu1 %v8498_v8  ;;  %v4411_v8 = vrot.slane %v9420_v58, %v9423_v59 }
 0x2cb   :  { %4354 = vmatpush1.bf16.msra.mxu1 %v8496_v9  ;;  %v4415_v9 = vrot.slane %v9420_v58, %v9426_v60 }
 0x2cc   :  { %4355 = vmatprep.subr.bf16.mxu1 %v8501_v10  ;;  %v8606_v10 = vld [vmem:[#allocation11 + $0x21c] ss:$24 sps:$4 sm:$0xff]  }
 0x2cf   :  { %4356 = vmatpush1.bf16.msra.mxu1 %v8499_v36 }
 0x2d0   :  { %4357 = vmatprep.subr.bf16.mxu1 %v8504_v15 }
 0x2d3   :  { %4358 = vmatpush1.bf16.msra.mxu1 %v8502_v13  ;;  %v4463_v13 = vrot.slane %v9432_v3, %v9412_v12 }
 0x2d4   :  { %4359 = vmatprep.subr.bf16.mxu1 %v8507_v14  ;;  %v4467_v14 = vrot.slane %v9432_v3, %v9415_v56 }
 0x2d7   :  { %4360 = vmatpush1.bf16.msra.mxu1 %v8505_v44 }
 0x2d8   :  { %4361 = vmatprep.subr.bf16.mxu1 %v8510_v16 }
 0x2db   :  { %4362 = vmatpush1.bf16.msra.mxu1 %v8508_v17 }
 0x2dc   :  { %4363 = vmatprep.subr.bf16.mxu1 %v8513_v38 }
 0x2df   :  { %4364 = vmatpush1.bf16.msra.mxu1 %v8511_v18  ;;  %v8604_v18 = vld [vmem:[#allocation11 + $0x218] ss:$24 sps:$4 sm:$0xff]  }
 0x2e0   :  { %4365 = vmatprep.subr.bf16.mxu1 %v8516_v19 }
 0x2e3   :  { %4366 = vmatpush1.bf16.msra.mxu1 %v8514_v20 }
 0x2e4   :  { %4367 = vmatprep.subr.bf16.mxu1 %v8519_v21 }
 0x2e7   :  { %4368 = vmatpush1.bf16.msra.mxu1 %v8517_v22 }
 0x2e8   :  { %4369 = vmatprep.subr.bf16.mxu1 %v8522_v24  ;;  %v8612_v24 = vld [vmem:[#allocation11 + $0x24c] ss:$24 sps:$4 sm:$0xff]  }
 0x2eb   :  { %4370 = vmatpush1.bf16.msra.mxu1 %v8520_v25 }
 0x2ec   :  { %4371 = vmatprep.subr.bf16.mxu1 %v8525_v26 }
 0x2ef   :  { %4372 = vmatpush1.bf16.msra.mxu1 %v8523_v27 }
 0x2f0   :  { %4373 = vmatprep.subr.bf16.mxu1 %v8528_v28 }
 0x2f3   :  { %4374 = vmatpush1.bf16.msra.mxu1 %v8526_v29 }
 0x2f4   :  { %4375 = vmatprep.subr.bf16.mxu1 %v8531_v30 }
 0x2f7   :  { %4376 = vmatpush1.bf16.msra.mxu1 %v8529_v31 }
 0x2f8   :  { %4377 = vmatprep.subr.bf16.mxu1 %v8534_v63  ;;  %v8610_v63 = vld [vmem:[#allocation11 + $0x248] ss:$24 sps:$4 sm:$0xff]  }
 0x2fb   :  { %4378 = vmatpush1.bf16.msra.mxu1 %v8532_v7 }
 0x2fc   :  { %6421 = vmatprep.subr.bf16.mxu1 %v8540_v32 }
 0x2fe   :  { %4380 = vmatmul.mubr.bf16.vlgmr.msra.gmra.mrb[12].mxu1 %v9353_v23  ;;  %v8576_v23 = vld [vmem:[#allocation11 + $0x12c] ss:$24 sps:$4 sm:$0xff]  }
 0x2ff   :  { %6422 = vmatpush1.bf16.msra.mxu1 %v8538_v33 }
 0x300   :  { %6423 = vmatprep.subr.bf16.mxu1 %v8546_v11 }
 0x303   :  { %6424 = vmatpush1.bf16.msra.mxu1 %v8544_v0 }
 0x304   :  { %6425 = vmatprep.subr.bf16.mxu1 %v8552_v34 }
 0x307   :  { %6426 = vmatpush1.bf16.msra.mxu1 %v8550_v35  ;;  %v8618_v35 = vld [vmem:[#allocation11 + $0x27c] ss:$24 sps:$4 sm:$0xff]  }
 0x308   :  { %6427 = vmatprep.subr.bf16.mxu1 %v8558_v1 }
 0x30b   :  { %6428 = vmatpush1.bf16.msra.mxu1 %v8556_v37 }
 0x30c   :  { %6429 = vmatprep.subr.bf16.mxu1 %v8564_v39 }
 0x30f   :  { %6430 = vmatpush1.bf16.msra.mxu1 %v8562_v4  ;;  %v8616_v4 = vld [vmem:[#allocation11 + $0x278] ss:$24 sps:$4 sm:$0xff]  }
 0x310   :  { %6431 = vmatprep.subr.bf16.mxu1 %v8570_v40 }
 0x311   :  { %v4123_v41 = vpop.f32.mrb[8].mxu1 }
 0x312   :  { %v4125_v42 = vpop.f32.mrb[9].mxu1  ;;  %v4434_v36 = vmul.f32 2.0, %v4123_v41  ;;  %v8622_v41 = vld [vmem:[#allocation11 + $0x2a8] ss:$24 sps:$4 sm:$0xff]  }
 0x313   :  { %v4127_v43 = vpop.f32.mrb[10].mxu1  ;;  %6432 = vmatpush1.bf16.msra.mxu1 %v8568_v50  ;;  %v4435_v44 = vmul.f32 2.0, %v4125_v42  ;;  %v8630_v42 = vld [vmem:[#allocation11 + $0x2dc] ss:$24 sps:$4 sm:$0xff]  }
 0x314   :  { %v4129_v46 = vpop.f32.mrb[11].mxu1  ;;  %6433 = vmatprep.subr.bf16.mxu1 %v8576_v23  ;;  %v4440_v25 = vmul.f32 2.0, %v4127_v43  ;;  %v8624_v23 = vld [vmem:[#allocation11 + $0x2ac] ss:$24 sps:$4 sm:$0xff]   ;;  %v8628_v43 = vld [vmem:[#allocation11 + $0x2d8] ss:$24 sps:$4 sm:$0xff]  }
 0x315   :  { %v4441_v26 = vmul.f32 2.0, %v4129_v46 }
 0x317   :  { %6434 = vmatpush1.bf16.msra.mxu1 %v8574_v45  ;;  %v8636_v45 = vld [vmem:[#allocation11 + $0x30c] ss:$24 sps:$4 sm:$0xff]  }
 0x318   :  { %6435 = vmatprep.subr.bf16.mxu1 %v8582_v47 }
 0x31b   :  { %6436 = vmatpush1.bf16.msra.mxu1 %v8580_v49 }
 0x31c   :  { %6437 = vmatprep.subr.bf16.mxu1 %v8588_v51 }
 0x31f   :  { %6438 = vmatpush1.bf16.msra.mxu1 %v8586_v53 }
 0x320   :  { %6439 = vmatprep.subr.bf16.mxu1 %v8594_v54  ;;  %v8631_v54 = vld [vmem:[#allocation11 + $0x300] ss:$24 sps:$4 sm:$0xff]  }
 0x323   :  { %6440 = vmatpush1.bf16.msra.mxu1 %v8592_v57  ;;  %v8634_v57 = vld [vmem:[#allocation11 + $0x308] ss:$24 sps:$4 sm:$0xff]  }
 0x324   :  { %6441 = vmatprep.subr.bf16.mxu1 %v8600_v61  ;;  %v8639_v61 = vld [vmem:[#allocation11 + $0x334] ss:$24 sps:$4 sm:$0xff]  }
 0x326   :  { %v9440_v15 = vpop.xlane.xlu0 %2266 }
 0x327   :  { %v4422_v16 = vadd.f32 %v4395_v62, %v9440_v15  ;;  %v4423_v17 = vadd.f32 %v4399_v2, %v9440_v15  ;;  %v9449_v38 = vadd.f32 %v4403_v5, %v9440_v15  ;;  %6442 = vmatpush1.bf16.msra.mxu1 %v8598_v6  ;;  %v9452_v19 = vadd.f32 %v4411_v8, %v9440_v15  ;;  %v8645_v6 = vld [vmem:[#allocation11 + $0x364] ss:$24 sps:$4 sm:$0xff]  }
 0x328   :  { %v9455_v20 = vadd.f32 %v4415_v9, %v9440_v15  ;;  %6443 = vmatprep.subr.bf16.mxu1 %v8606_v10  ;;  %v8646_v10 = vld [vmem:[#allocation11 + $0x368] ss:$24 sps:$4 sm:$0xff]  }
 0x329   :  { %v4446_v21 = vsub.f32 %v4422_v16, %v4434_v36  ;;  %v4447_v22 = vsub.f32 %v4423_v17, %v4435_v44  ;;  %v8651_v36 = vld [vmem:[#allocation11 + $0x394] ss:$24 sps:$4 sm:$0xff]   ;;  %v8652_v44 = vld [vmem:[#allocation11 + $0x398] ss:$24 sps:$4 sm:$0xff]   ;;  %v8657_v16 = vld [vmem:[#allocation11 + $0x3c4] ss:$24 sps:$4 sm:$0xff]  }
 0x32a   :  { %v9457_v27 = vpop.xlane.xlu0 %2273  ;;  %v8660_v17 = vld [vmem:[#allocation11 + $0x3cc] ss:$24 sps:$4 sm:$0xff]  }
 0x32b   :  { %v4490_v28 = vmul.f32 %v4463_v13, %v4446_v21  ;;  %v4428_v29 = vadd.f32 %v4395_v62, %v9457_v27  ;;  %v4429_v30 = vadd.f32 %v4399_v2, %v9457_v27  ;;  %v4491_v31 = vmul.f32 %v4467_v14, %v4447_v22  ;;  %6444 = vmatpush1.bf16.msra.mxu1 %v8604_v18  ;;  %v8642_v62 = vld [vmem:[#allocation11 + $0x33c] ss:$24 sps:$4 sm:$0xff]   ;;  %v8637_v2 = vld [vmem:[#allocation11 + $0x330] ss:$24 sps:$4 sm:$0xff]   ;;  %v8655_v21 = vld [vmem:[#allocation11 + $0x3c0] ss:$24 sps:$4 sm:$0xff]  }
 0x32c   :  { %v9462_v7 = vadd.f32 %v4403_v5, %v9457_v27  ;;  %v9465_v32 = vadd.f32 %v4411_v8, %v9457_v27  ;;  %v9468_v33 = vadd.f32 %v4415_v9, %v9457_v27  ;;  %6445 = vmatprep.subr.bf16.mxu1 %v8612_v24  ;;  %v8640_v5 = vld [vmem:[#allocation11 + $0x338] ss:$24 sps:$4 sm:$0xff]   ;;  %v8648_v8 = vld [vmem:[#allocation11 + $0x36c] ss:$24 sps:$4 sm:$0xff]   ;;  %v9479_v18 = vsub.s32 3, %v9409_v52 }
 0x32d   :  { %v4502_v11 = vmul.f32 1.442695, %v4490_v28  ;;  %v4452_v0 = vsub.f32 %v4428_v29, %v4440_v25  ;;  %v4453_v34 = vsub.f32 %v4429_v30, %v4441_v26  ;;  %v4504_v1 = vmul.f32 1.442695, %v4491_v31  ;;  %v8643_v9 = vld [vmem:[#allocation11 + $0x360] ss:$24 sps:$4 sm:$0xff]  }
 0x32e   :  { %v8658_v22 = vld [vmem:[#allocation11 + $0x3c8] ss:$24 sps:$4 sm:$0xff]   ;;  %v4407_v24 = vrot.slane %v9420_v58, %v9479_v18  ;;  %v8663_v25 = vld [vmem:[#allocation11 + $0x3f4] ss:$24 sps:$4 sm:$0xff]   ;;  %v4471_v30 = vrot.slane %v9432_v3, %v9418_v55  ;;  %v8669_v58 = vld [vmem:[#allocation11 + $0x424] ss:$24 sps:$4 sm:$0xff]  }
 0x32f   :  { %v4496_v37 = vmul.f32 %v4463_v13, %v4452_v0  ;;  %v4497_v39 = vmul.f32 %v4467_v14, %v4453_v34  ;;  %6446 = vmatpush1.bf16.msra.mxu1 %v8610_v63  ;;  %8967 = vpow2.f32 %v4502_v11  ;;  %v8654_v13 = vld [vmem:[#allocation11 + $0x39c] ss:$24 sps:$4 sm:$0xff]   ;;  %v8649_v14 = vld [vmem:[#allocation11 + $0x390] ss:$24 sps:$4 sm:$0xff]   ;;  %v4475_v34 = vrot.slane %v9432_v3, %v9479_v18 }
 0x330   :  { %6447 = vmatprep.subr.bf16.mxu1 %v8618_v35  ;;  %8969 = vpow2.f32 %v4504_v1  ;;  %v8666_v26 = vld [vmem:[#allocation11 + $0x3fc] ss:$24 sps:$4 sm:$0xff]   ;;  %v8661_v31 = vld [vmem:[#allocation11 + $0x3f0] ss:$24 sps:$4 sm:$0xff]   ;;  %v4425_v11 = vadd.f32 %v4407_v24, %v9440_v15  ;;  %v8672_v1 = vld [vmem:[#allocation11 + $0x42c] ss:$24 sps:$4 sm:$0xff]  }
 0x331   :  { %v4514_v40 = vmul.f32 1.442695, %v4496_v37  ;;  %v4516_v50 = vmul.f32 1.442695, %v4497_v39  ;;  %v8664_v63 = vld [vmem:[#allocation11 + $0x3f8] ss:$24 sps:$4 sm:$0xff]  }
 0x333   :  { %8971 = vpow2.f32 %v4514_v40  ;;  %6448 = vmatpush1.bf16.msra.mxu1 %v8616_v4 }
 0x334   :  { %8973 = vpow2.f32 %v4516_v50  ;;  %6449 = vmatprep.subr.bf16.mxu1 %v8624_v23  ;;  %v4431_v50 = vadd.f32 %v4407_v24, %v9457_v27  ;;  %v8694_v24 = vld [vmem:[#allocation11 + $0x4e8] ss:$24 sps:$4 sm:$0xff]  }
 0x337   :  { %6450 = vmatpush1.bf16.msra.mxu1 %v8622_v41 }
 0x338   :  { %6451 = vmatprep.subr.bf16.mxu1 %v8630_v42  ;;  %v8667_v42 = vld [vmem:[#allocation11 + $0x420] ss:$24 sps:$4 sm:$0xff]  }
 0x339   :  { %v8968_v46 = vpop.eup %8967 }
 0x33a   :  { %v8970_v47 = vpop.eup %8969 }
 0x33b   :  { %6452 = vmatpush1.bf16.msra.mxu1 %v8628_v43  ;;  %v8670_v43 = vld [vmem:[#allocation11 + $0x428] ss:$24 sps:$4 sm:$0xff]  }
 0x33c   :  { %6464 = vmatprep.subr.bf16.mxu1 %v8636_v45 }
 0x33d   :  { %v8972_v48 = vpop.eup %8971 }
 0x33e   :  { %v8974_v49 = vpop.eup %8973  ;;  %v9470_v51 = vpack.c.bf16 %v8972_v48, %v8968_v46  ;;  %v8678_v48 = vld [vmem:[#allocation11 + $0x45c] ss:$24 sps:$4 sm:$0xff]  }
 0x33f   :  { %v9472_v53 = vpack.c.bf16 %v8974_v49, %v8970_v47  ;;  %v8675_v47 = vld [vmem:[#allocation11 + $0x454] ss:$24 sps:$4 sm:$0xff]  }
 0x341   :  { %6324 = vmatprep.mubr.bf16.mxu0 %v9472_v53  ;;  %6453 = vmatprep.mubr.bf16.mxu1 %v9472_v53 }
 0x342   :  { %6325 = vmatmul.mubr.bf16.vlgmr.msra.gmra.mrb[12].mxu0 %v9470_v51  ;;  %6454 = vmatmul.mubr.bf16.vlgmr.msra.gmra.mrb[16].mxu1 %v9470_v51 }
 0x343   :  { %6336 = vmatpush1.bf16.msra.mxu0 %v8631_v54  ;;  %6465 = vmatpush1.bf16.msra.mxu1 %v8634_v57 }
 0x344   :  { %6337 = vmatprep.subr.bf16.mxu0 %v8639_v61  ;;  %6466 = vmatprep.subr.bf16.mxu1 %v8642_v62  ;;  %v8673_v61 = vld [vmem:[#allocation11 + $0x450] ss:$24 sps:$4 sm:$0xff]  }
 0x347   :  { %6338 = vmatpush1.bf16.msra.mxu0 %v8637_v2  ;;  %6467 = vmatpush1.bf16.msra.mxu1 %v8640_v5  ;;  %v8681_v2 = vld [vmem:[#allocation11 + $0x484] ss:$24 sps:$4 sm:$0xff]  }
 0x348   :  { %6339 = vmatprep.subr.bf16.mxu0 %v8645_v6  ;;  %6468 = vmatprep.subr.bf16.mxu1 %v8648_v8  ;;  %v8684_v5 = vld [vmem:[#allocation11 + $0x48c] ss:$24 sps:$4 sm:$0xff]   ;;  %v8679_v6 = vld [vmem:[#allocation11 + $0x480] ss:$24 sps:$4 sm:$0xff]  }
 0x349   :  { %v8682_v8 = vld [vmem:[#allocation11 + $0x488] ss:$24 sps:$4 sm:$0xff]  }
 0x34b   :  { %6340 = vmatpush1.bf16.msra.mxu0 %v8643_v9  ;;  %6469 = vmatpush1.bf16.msra.mxu1 %v8646_v10  ;;  %v8687_v9 = vld [vmem:[#allocation11 + $0x4b4] ss:$24 sps:$4 sm:$0xff]  }
 0x34c   :  { %6341 = vmatprep.subr.bf16.mxu0 %v8651_v36  ;;  %6470 = vmatprep.subr.bf16.mxu1 %v8654_v13  ;;  %v8690_v10 = vld [vmem:[#allocation11 + $0x4bc] ss:$24 sps:$4 sm:$0xff]   ;;  %v8685_v36 = vld [vmem:[#allocation11 + $0x4b0] ss:$24 sps:$4 sm:$0xff]  }
 0x34d   :  { %v8688_v13 = vld [vmem:[#allocation11 + $0x4b8] ss:$24 sps:$4 sm:$0xff]  }
 0x34f   :  { %6342 = vmatpush1.bf16.msra.mxu0 %v8649_v14  ;;  %6471 = vmatpush1.bf16.msra.mxu1 %v8652_v44  ;;  %v8693_v14 = vld [vmem:[#allocation11 + $0x4e4] ss:$24 sps:$4 sm:$0xff]  }
 0x350   :  { %6343 = vmatprep.subr.bf16.mxu0 %v8657_v16  ;;  %6472 = vmatprep.subr.bf16.mxu1 %v8660_v17  ;;  %v8696_v44 = vld [vmem:[#allocation11 + $0x4ec] ss:$24 sps:$4 sm:$0xff]  }
 0x352   :  { %v4252_v28 = vpop.f32.mrb[8].mxu0 }
 0x353   :  { %6344 = vmatpush1.bf16.msra.mxu0 %v8655_v21  ;;  %6473 = vmatpush1.bf16.msra.mxu1 %v8658_v22  ;;  %v4436_v29 = vmul.f32 2.0, %v4252_v28  ;;  %v4254_v52 = vpop.f32.mrb[9].mxu0  ;;  %v8691_v22 = vld [vmem:[#allocation11 + $0x4e0] ss:$24 sps:$4 sm:$0xff]  }
 0x354   :  { %v4437_v0 = vmul.f32 2.0, %v4254_v52  ;;  %v4256_v35 = vpop.f32.mrb[10].mxu0  ;;  %6345 = vmatprep.subr.bf16.mxu0 %v8663_v25  ;;  %6474 = vmatprep.subr.bf16.mxu1 %v8666_v26  ;;  %v8697_v52 = vld [vmem:[#allocation11 + $0x510] ss:$24 sps:$4 sm:$0xff]  }
 0x355   :  { %v4448_v37 = vsub.f32 %v9449_v38, %v4436_v29  ;;  %v4442_v39 = vmul.f32 2.0, %v4256_v35  ;;  %v4258_v4 = vpop.f32.mrb[11].mxu0  ;;  %v8699_v29 = vld [vmem:[#allocation11 + $0x514] ss:$24 sps:$4 sm:$0xff]  }
 0x356   :  { %v4449_v40 = vsub.f32 %v4425_v11, %v4437_v0  ;;  %v4443_v23 = vmul.f32 2.0, %v4258_v4  ;;  %v8708_v11 = vld [vmem:[#allocation11 + $0x54c] ss:$24 sps:$4 sm:$0xff]   ;;  %v8703_v0 = vld [vmem:[#allocation11 + $0x540] ss:$24 sps:$4 sm:$0xff]  }
 0x357   :  { %v4492_v41 = vmul.f32 %v4471_v30, %v4448_v37  ;;  %v4454_v15 = vsub.f32 %v9462_v7, %v4442_v39  ;;  %6346 = vmatpush1.bf16.msra.mxu0 %v8661_v31  ;;  %6475 = vmatpush1.bf16.msra.mxu1 %v8664_v63  ;;  %v8676_v7 = vld [vmem:[#allocation11 + $0x458] ss:$24 sps:$4 sm:$0xff]   ;;  %v8705_v63 = vld [vmem:[#allocation11 + $0x544] ss:$24 sps:$4 sm:$0xff]   ;;  %v8711_v35 = vld [vmem:[#allocation11 + $0x574] ss:$24 sps:$4 sm:$0xff]  }
 0x358   :  { %v4493_v45 = vmul.f32 %v4475_v34, %v4449_v40  ;;  %v4455_v46 = vsub.f32 %v4431_v50, %v4443_v23  ;;  %6347 = vmatprep.subr.bf16.mxu0 %v8669_v58  ;;  %6476 = vmatprep.subr.bf16.mxu1 %v8672_v1  ;;  %v8700_v31 = vld [vmem:[#allocation11 + $0x518] ss:$24 sps:$4 sm:$0xff]   ;;  %v8714_v58 = vld [vmem:[#allocation11 + $0x57c] ss:$24 sps:$4 sm:$0xff]   ;;  %v8720_v4 = vld [vmem:[#allocation11 + $0x5ac] ss:$24 sps:$4 sm:$0xff]  }
 0x359   :  { %v4506_v38 = vmul.f32 1.442695, %v4492_v41  ;;  %v4498_v49 = vmul.f32 %v4471_v30, %v4454_v15  ;;  %v8702_v30 = vld [vmem:[#allocation11 + $0x51c] ss:$24 sps:$4 sm:$0xff]   ;;  %v8709_v1 = vld [vmem:[#allocation11 + $0x570] ss:$24 sps:$4 sm:$0xff]  }
 0x35a   :  { %v4508_v54 = vmul.f32 1.442695, %v4493_v45  ;;  %v4499_v57 = vmul.f32 %v4475_v34, %v4455_v46  ;;  %v8706_v34 = vld [vmem:[#allocation11 + $0x548] ss:$24 sps:$4 sm:$0xff]   ;;  %v8712_v37 = vld [vmem:[#allocation11 + $0x578] ss:$24 sps:$4 sm:$0xff]  }
 0x35b   :  { %8975 = vpow2.f32 %v4506_v38  ;;  %v4518_v27 = vmul.f32 1.442695, %v4498_v49  ;;  %6348 = vmatpush1.bf16.msra.mxu0 %v8667_v42  ;;  %6477 = vmatpush1.bf16.msra.mxu1 %v8670_v43  ;;  %v8717_v39 = vld [vmem:[#allocation11 + $0x5a4] ss:$24 sps:$4 sm:$0xff]   ;;  %v8715_v40 = vld [vmem:[#allocation11 + $0x5a0] ss:$24 sps:$4 sm:$0xff]  }
 0x35c   :  { %8977 = vpow2.f32 %v4508_v54  ;;  %v4520_v62 = vmul.f32 1.442695, %v4499_v57  ;;  %6349 = vmatprep.subr.bf16.mxu0 %v8675_v47  ;;  %6478 = vmatprep.subr.bf16.mxu1 %v8678_v48  ;;  %v8718_v50 = vld [vmem:[#allocation11 + $0x5a8] ss:$24 sps:$4 sm:$0xff]   ;;  %v8723_v23 = vld [vmem:[#allocation11 + $0x5d4] ss:$24 sps:$4 sm:$0xff]  }
 0x35d   :  { %8979 = vpow2.f32 %v4518_v27  ;;  %v8726_v41 = vld [vmem:[#allocation11 + $0x5dc] ss:$24 sps:$4 sm:$0xff]   ;;  %v8721_v15 = vld [vmem:[#allocation11 + $0x5d0] ss:$24 sps:$4 sm:$0xff]   ;;  %v8732_v45 = vld [vmem:[#allocation11 + $0x60c] ss:$24 sps:$4 sm:$0xff]  }
 0x35e   :  { %8981 = vpow2.f32 %v4520_v62  ;;  %v8724_v42 = vld [vmem:[#allocation11 + $0x5d8] ss:$24 sps:$4 sm:$0xff]   ;;  %v8729_v43 = vld [vmem:[#allocation11 + $0x604] ss:$24 sps:$4 sm:$0xff]   ;;  %v8730_v47 = vld [vmem:[#allocation11 + $0x608] ss:$24 sps:$4 sm:$0xff]  }
 0x35f   :  { %6350 = vmatpush1.bf16.msra.mxu0 %v8673_v61  ;;  %6479 = vmatpush1.bf16.msra.mxu1 %v8676_v7  ;;  %v8727_v46 = vld [vmem:[#allocation11 + $0x600] ss:$24 sps:$4 sm:$0xff]   ;;  %v8735_v48 = vld [vmem:[#allocation11 + $0x634] ss:$24 sps:$4 sm:$0xff]   ;;  %v8733_v49 = vld [vmem:[#allocation11 + $0x630] ss:$24 sps:$4 sm:$0xff]  }
 0x360   :  { %6351 = vmatprep.subr.bf16.mxu0 %v8681_v2  ;;  %6480 = vmatprep.subr.bf16.mxu1 %v8684_v5  ;;  %v8738_v38 = vld [vmem:[#allocation11 + $0x63c] ss:$24 sps:$4 sm:$0xff]   ;;  %v8736_v54 = vld [vmem:[#allocation11 + $0x638] ss:$24 sps:$4 sm:$0xff]   ;;  %v8744_v27 = vld [vmem:[#allocation11 + $0x66c] ss:$24 sps:$4 sm:$0xff]  }
 0x361   :  { %v8741_v57 = vld [vmem:[#allocation11 + $0x664] ss:$24 sps:$4 sm:$0xff]   ;;  %v8739_v61 = vld [vmem:[#allocation11 + $0x660] ss:$24 sps:$4 sm:$0xff]   ;;  %v8747_v62 = vld [vmem:[#allocation11 + $0x694] ss:$24 sps:$4 sm:$0xff]  }
 0x362   :  { %v8742_v7 = vld [vmem:[#allocation11 + $0x668] ss:$24 sps:$4 sm:$0xff]   ;;  %v8750_v2 = vld [vmem:[#allocation11 + $0x69c] ss:$24 sps:$4 sm:$0xff]  }
 0x363   :  { %6352 = vmatpush1.bf16.msra.mxu0 %v8679_v6  ;;  %6481 = vmatpush1.bf16.msra.mxu1 %v8682_v8  ;;  %v8745_v5 = vld [vmem:[#allocation11 + $0x690] ss:$24 sps:$4 sm:$0xff]   ;;  %v8753_v8 = vld [vmem:[#allocation11 + $0x6c4] ss:$24 sps:$4 sm:$0xff]  }
 0x364   :  { %6353 = vmatprep.subr.bf16.mxu0 %v8687_v9  ;;  %6482 = vmatprep.subr.bf16.mxu1 %v8690_v10  ;;  %v8748_v6 = vld [vmem:[#allocation11 + $0x698] ss:$24 sps:$4 sm:$0xff]   ;;  %v8756_v9 = vld [vmem:[#allocation11 + $0x6cc] ss:$24 sps:$4 sm:$0xff]  }
 0x365   :  { %v8976_v16 = vpop.eup %8975  ;;  %v8751_v10 = vld [vmem:[#allocation11 + $0x6c0] ss:$24 sps:$4 sm:$0xff]  }
 0x366   :  { %v8978_v17 = vpop.eup %8977 }
 0x367   :  { %v8980_v21 = vpop.eup %8979  ;;  %6354 = vmatpush1.bf16.msra.mxu0 %v8685_v36  ;;  %6483 = vmatpush1.bf16.msra.mxu1 %v8688_v13  ;;  %v8754_v36 = vld [vmem:[#allocation11 + $0x6c8] ss:$24 sps:$4 sm:$0xff]   ;;  %v8759_v13 = vld [vmem:[#allocation11 + $0x6f4] ss:$24 sps:$4 sm:$0xff]  }
 0x368   :  { %v8982_v25 = vpop.eup %8981  ;;  %6355 = vmatprep.subr.bf16.mxu0 %v8693_v14  ;;  %6484 = vmatprep.subr.bf16.mxu1 %v8696_v44  ;;  %v9491_v26 = vpack.c.bf16 %v8980_v21, %v8976_v16  ;;  %v8762_v14 = vld [vmem:[#allocation11 + $0x6fc] ss:$24 sps:$4 sm:$0xff]   ;;  %v8757_v44 = vld [vmem:[#allocation11 + $0x6f0] ss:$24 sps:$4 sm:$0xff]   ;;  %v8768_v21 = vld [vmem:[#allocation11 + $0x72c] ss:$24 sps:$4 sm:$0xff]  }
 0x369   :  { %v9493_v28 = vpack.c.bf16 %v8982_v25, %v8978_v17  ;;  %v8760_v16 = vld [vmem:[#allocation11 + $0x6f8] ss:$24 sps:$4 sm:$0xff]   ;;  %v8765_v17 = vld [vmem:[#allocation11 + $0x724] ss:$24 sps:$4 sm:$0xff]   ;;  %v8771_v25 = vld [vmem:[#allocation11 + $0x754] ss:$24 sps:$4 sm:$0xff]  }
 0x36b   :  { %6356 = vmatpush1.bf16.msra.mxu0 %v8691_v22  ;;  %6485 = vmatpush1.bf16.msra.mxu1 %v8694_v24  ;;  %v8763_v22 = vld [vmem:[#allocation11 + $0x720] ss:$24 sps:$4 sm:$0xff]  }
 0x36c   :  { %6367 = vmatprep.mubr.bf16.mxu0 %v9493_v28  ;;  %6496 = vmatprep.mubr.bf16.mxu1 %v9493_v28  ;;  %v8766_v24 = vld [vmem:[#allocation11 + $0x728] ss:$24 sps:$4 sm:$0xff]  }
 0x36d   :  { %6357 = vmatprep.subr.bf16.mxu0 %v8699_v29  ;;  %6486 = vmatprep.subr.bf16.mxu1 %v8702_v30  ;;  %v8774_v29 = vld [vmem:[#allocation11 + $0x75c] ss:$24 sps:$4 sm:$0xff]   ;;  %v8769_v30 = vld [vmem:[#allocation11 + $0x750] ss:$24 sps:$4 sm:$0xff]  }
 0x36f   :  { %6358 = vmatpush1.bf16.msra.mxu0 %v8697_v52  ;;  %6487 = vmatpush1.bf16.msra.mxu1 %v8700_v31  ;;  %v8772_v52 = vld [vmem:[#allocation11 + $0x758] ss:$24 sps:$4 sm:$0xff]   ;;  %v8777_v31 = vld [vmem:[#allocation11 + $0x784] ss:$24 sps:$4 sm:$0xff]  }
 0x370   :  { %6359 = vmatprep.subr.bf16.mxu0 %v8705_v63  ;;  %6488 = vmatprep.subr.bf16.mxu1 %v8708_v11  ;;  %v8780_v63 = vld [vmem:[#allocation11 + $0x78c] ss:$24 sps:$4 sm:$0xff]   ;;  %v8775_v11 = vld [vmem:[#allocation11 + $0x780] ss:$24 sps:$4 sm:$0xff]  }
 0x373   :  { %6360 = vmatpush1.bf16.msra.mxu0 %v8703_v0  ;;  %6489 = vmatpush1.bf16.msra.mxu1 %v8706_v34  ;;  %v8778_v0 = vld [vmem:[#allocation11 + $0x788] ss:$24 sps:$4 sm:$0xff]   ;;  %v8783_v34 = vld [vmem:[#allocation11 + $0x7b4] ss:$24 sps:$4 sm:$0xff]  }
 0x374   :  { %6361 = vmatprep.subr.bf16.mxu0 %v8711_v35  ;;  %6490 = vmatprep.subr.bf16.mxu1 %v8714_v58  ;;  %v8786_v35 = vld [vmem:[#allocation11 + $0x7bc] ss:$24 sps:$4 sm:$0xff]   ;;  %v8781_v58 = vld [vmem:[#allocation11 + $0x7b0] ss:$24 sps:$4 sm:$0xff]  }
 0x377   :  { %6362 = vmatpush1.bf16.msra.mxu0 %v8709_v1  ;;  %6491 = vmatpush1.bf16.msra.mxu1 %v8712_v37  ;;  %v8784_v1 = vld [vmem:[#allocation11 + $0x7b8] ss:$24 sps:$4 sm:$0xff]   ;;  %v8789_v37 = vld [vmem:[#allocation11 + $0x7e4] ss:$24 sps:$4 sm:$0xff]  }
 0x378   :  { %6363 = vmatprep.subr.bf16.mxu0 %v8717_v39  ;;  %6492 = vmatprep.subr.bf16.mxu1 %v8720_v4  ;;  %v8792_v39 = vld [vmem:[#allocation11 + $0x7ec] ss:$24 sps:$4 sm:$0xff]   ;;  %v8787_v4 = vld [vmem:[#allocation11 + $0x7e0] ss:$24 sps:$4 sm:$0xff]  }
 0x37b   :  { %6364 = vmatpush1.bf16.msra.mxu0 %v8715_v40  ;;  %6493 = vmatpush1.bf16.msra.mxu1 %v8718_v50  ;;  %v8790_v40 = vld [vmem:[#allocation11 + $0x7e8] ss:$24 sps:$4 sm:$0xff]   ;;  %v8795_v50 = vld [vmem:[#allocation11 + $0x814] ss:$24 sps:$4 sm:$0xff]  }
 0x37c   :  { %6365 = vmatprep.subr.bf16.mxu0 %v8723_v23  ;;  %6494 = vmatprep.subr.bf16.mxu1 %v8726_v41  ;;  %v8798_v23 = vld [vmem:[#allocation11 + $0x81c] ss:$24 sps:$4 sm:$0xff]   ;;  %v8793_v41 = vld [vmem:[#allocation11 + $0x810] ss:$24 sps:$4 sm:$0xff]  }
 0x37f   :  { %6366 = vmatpush1.bf16.msra.mxu0 %v8721_v15  ;;  %6495 = vmatpush1.bf16.msra.mxu1 %v8724_v42  ;;  %v8796_v15 = vld [vmem:[#allocation11 + $0x818] ss:$24 sps:$4 sm:$0xff]   ;;  %v8801_v42 = vld [vmem:[#allocation11 + $0x844] ss:$24 sps:$4 sm:$0xff]  }
 0x380   :  { %6378 = vmatprep.subr.bf16.mxu0 %v8729_v43  ;;  %6507 = vmatprep.subr.bf16.mxu1 %v8732_v45  ;;  %v8804_v43 = vld [vmem:[#allocation11 + $0x84c] ss:$24 sps:$4 sm:$0xff]   ;;  %v8799_v45 = vld [vmem:[#allocation11 + $0x840] ss:$24 sps:$4 sm:$0xff]  }
 0x382   :  { %6368 = vmatmul.mubr.bf16.vlgmr.msra.gmra.mrb[12].mxu0 %v9491_v26  ;;  %6497 = vmatmul.mubr.bf16.vlgmr.msra.gmra.mrb[16].mxu1 %v9491_v26 }
 0x383   :  { %6379 = vmatpush1.bf16.msra.mxu0 %v8727_v46  ;;  %6508 = vmatpush1.bf16.msra.mxu1 %v8730_v47  ;;  %v8802_v46 = vld [vmem:[#allocation11 + $0x848] ss:$24 sps:$4 sm:$0xff]   ;;  %v8807_v47 = vld [vmem:[#allocation11 + $0x874] ss:$24 sps:$4 sm:$0xff]  }
 0x384   :  { %6380 = vmatprep.subr.bf16.mxu0 %v8735_v48  ;;  %6509 = vmatprep.subr.bf16.mxu1 %v8738_v38  ;;  %v8810_v48 = vld [vmem:[#allocation11 + $0x87c] ss:$24 sps:$4 sm:$0xff]   ;;  %v8805_v38 = vld [vmem:[#allocation11 + $0x870] ss:$24 sps:$4 sm:$0xff]  }
 0x387   :  { %6381 = vmatpush1.bf16.msra.mxu0 %v8733_v49  ;;  %6510 = vmatpush1.bf16.msra.mxu1 %v8736_v54  ;;  %v8808_v49 = vld [vmem:[#allocation11 + $0x878] ss:$24 sps:$4 sm:$0xff]   ;;  %v8813_v54 = vld [vmem:[#allocation11 + $0x8a4] ss:$24 sps:$4 sm:$0xff]  }
 0x388   :  { %6382 = vmatprep.subr.bf16.mxu0 %v8741_v57  ;;  %6511 = vmatprep.subr.bf16.mxu1 %v8744_v27  ;;  %v8816_v57 = vld [vmem:[#allocation11 + $0x8ac] ss:$24 sps:$4 sm:$0xff]   ;;  %v8811_v27 = vld [vmem:[#allocation11 + $0x8a0] ss:$24 sps:$4 sm:$0xff]  }
 0x38b   :  { %6383 = vmatpush1.bf16.msra.mxu0 %v8739_v61  ;;  %6512 = vmatpush1.bf16.msra.mxu1 %v8742_v7  ;;  %v8814_v61 = vld [vmem:[#allocation11 + $0x8a8] ss:$24 sps:$4 sm:$0xff]   ;;  %v8819_v7 = vld [vmem:[#allocation11 + $0x8d4] ss:$24 sps:$4 sm:$0xff]  }
 0x38c   :  { %6384 = vmatprep.subr.bf16.mxu0 %v8747_v62  ;;  %6513 = vmatprep.subr.bf16.mxu1 %v8750_v2  ;;  %v8822_v62 = vld [vmem:[#allocation11 + $0x8dc] ss:$24 sps:$4 sm:$0xff]   ;;  %v8817_v2 = vld [vmem:[#allocation11 + $0x8d0] ss:$24 sps:$4 sm:$0xff]  }
 0x38f   :  { %6385 = vmatpush1.bf16.msra.mxu0 %v8745_v5  ;;  %6514 = vmatpush1.bf16.msra.mxu1 %v8748_v6  ;;  %v8820_v5 = vld [vmem:[#allocation11 + $0x8d8] ss:$24 sps:$4 sm:$0xff]   ;;  %v8825_v6 = vld [vmem:[#allocation11 + $0x14] ss:$24 sps:$4 sm:$0xff]  }
 0x390   :  { %6386 = vmatprep.subr.bf16.mxu0 %v8753_v8  ;;  %6515 = vmatprep.subr.bf16.mxu1 %v8756_v9 }
 0x393   :  { %6387 = vmatpush1.bf16.msra.mxu0 %v8751_v10  ;;  %6516 = vmatpush1.bf16.msra.mxu1 %v8754_v36  ;;  %v4479_v10 = vrot.slane %v9432_v3, %v9423_v59 }
 0x394   :  { %6388 = vmatprep.subr.bf16.mxu0 %v8759_v13  ;;  %6517 = vmatprep.subr.bf16.mxu1 %v8762_v14  ;;  %v4483_v14 = vrot.slane %v9432_v3, %v9426_v60 }
 0x397   :  { %6389 = vmatpush1.bf16.msra.mxu0 %v8757_v44  ;;  %6518 = vmatpush1.bf16.msra.mxu1 %v8760_v16 }
 0x398   :  { %6390 = vmatprep.subr.bf16.mxu0 %v8765_v17  ;;  %6519 = vmatprep.subr.bf16.mxu1 %v8768_v21 }
 0x39b   :  { %6391 = vmatpush1.bf16.msra.mxu0 %v8763_v22  ;;  %6520 = vmatpush1.bf16.msra.mxu1 %v8766_v24 }
 0x39c   :  { %6392 = vmatprep.subr.bf16.mxu0 %v8771_v25  ;;  %6521 = vmatprep.subr.bf16.mxu1 %v8774_v29 }
 0x39f   :  { %6393 = vmatpush1.bf16.msra.mxu0 %v8769_v30  ;;  %6522 = vmatpush1.bf16.msra.mxu1 %v8772_v52 }
 0x3a0   :  { %6394 = vmatprep.subr.bf16.mxu0 %v8777_v31  ;;  %6523 = vmatprep.subr.bf16.mxu1 %v8780_v63 }
 0x3a3   :  { %6395 = vmatpush1.bf16.msra.mxu0 %v8775_v11  ;;  %6524 = vmatpush1.bf16.msra.mxu1 %v8778_v0 }
 0x3a4   :  { %6396 = vmatprep.subr.bf16.mxu0 %v8783_v34  ;;  %6525 = vmatprep.subr.bf16.mxu1 %v8786_v35 }
 0x3a7   :  { %6397 = vmatpush1.bf16.msra.mxu0 %v8781_v58  ;;  %6526 = vmatpush1.bf16.msra.mxu1 %v8784_v1 }
 0x3a8   :  { %6398 = vmatprep.subr.bf16.mxu0 %v8789_v37  ;;  %6527 = vmatprep.subr.bf16.mxu1 %v8792_v39  ;;  %v8823_v37 = vld [vmem:[#allocation11 + $0x10] ss:$24 sps:$4 sm:$0xff]   ;;  %v8826_v39 = vld [vmem:[#allocation11 + $0x40] ss:$24 sps:$4 sm:$0xff]  }
 0x3ab   :  { %6399 = vmatpush1.bf16.msra.mxu0 %v8787_v4  ;;  %6528 = vmatpush1.bf16.msra.mxu1 %v8790_v40  ;;  %v8831_v4 = vld [vmem:[#allocation11 + $0x74] ss:$24 sps:$4 sm:$0xff]   ;;  %v8829_v40 = vld [vmem:[#allocation11 + $0x70] ss:$24 sps:$4 sm:$0xff]  }
 0x3ac   :  { %6400 = vmatprep.subr.bf16.mxu0 %v8795_v50  ;;  %6529 = vmatprep.subr.bf16.mxu1 %v8798_v23  ;;  %v8834_v50 = vld [vmem:[#allocation11 + $0xa4] ss:$24 sps:$4 sm:$0xff]   ;;  %v8832_v23 = vld [vmem:[#allocation11 + $0xa0] ss:$24 sps:$4 sm:$0xff]  }
 0x3af   :  { %6401 = vmatpush1.bf16.msra.mxu0 %v8793_v41  ;;  %6530 = vmatpush1.bf16.msra.mxu1 %v8796_v15  ;;  %v8837_v41 = vld [vmem:[#allocation11 + $0xd4] ss:$24 sps:$4 sm:$0xff]   ;;  %v8835_v15 = vld [vmem:[#allocation11 + $0xd0] ss:$24 sps:$4 sm:$0xff]  }
 0x3b0   :  { %6402 = vmatprep.subr.bf16.mxu0 %v8801_v42  ;;  %6531 = vmatprep.subr.bf16.mxu1 %v8804_v43  ;;  %v8840_v42 = vld [vmem:[#allocation11 + $0x104] ss:$24 sps:$4 sm:$0xff]   ;;  %v8838_v43 = vld [vmem:[#allocation11 + $0x100] ss:$24 sps:$4 sm:$0xff]  }
 0x3b3   :  { %6403 = vmatpush1.bf16.msra.mxu0 %v8799_v45  ;;  %6532 = vmatpush1.bf16.msra.mxu1 %v8802_v46  ;;  %v8843_v45 = vld [vmem:[#allocation11 + $0x134] ss:$24 sps:$4 sm:$0xff]   ;;  %v8846_v46 = vld [vmem:[#allocation11 + $0x164] ss:$24 sps:$4 sm:$0xff]  }
 0x3b4   :  { %6404 = vmatprep.subr.bf16.mxu0 %v8807_v47  ;;  %6533 = vmatprep.subr.bf16.mxu1 %v8810_v48  ;;  %v8844_v47 = vld [vmem:[#allocation11 + $0x160] ss:$24 sps:$4 sm:$0xff]   ;;  %v8849_v48 = vld [vmem:[#allocation11 + $0x194] ss:$24 sps:$4 sm:$0xff]  }
 0x3b7   :  { %6405 = vmatpush1.bf16.msra.mxu0 %v8805_v38  ;;  %6534 = vmatpush1.bf16.msra.mxu1 %v8808_v49  ;;  %v8847_v38 = vld [vmem:[#allocation11 + $0x190] ss:$24 sps:$4 sm:$0xff]   ;;  %v8852_v49 = vld [vmem:[#allocation11 + $0x1c4] ss:$24 sps:$4 sm:$0xff]  }
 0x3b8   :  { %6406 = vmatprep.subr.bf16.mxu0 %v8813_v54  ;;  %6535 = vmatprep.subr.bf16.mxu1 %v8816_v57  ;;  %v8850_v54 = vld [vmem:[#allocation11 + $0x1c0] ss:$24 sps:$4 sm:$0xff]   ;;  %v8855_v57 = vld [vmem:[#allocation11 + $0x1f4] ss:$24 sps:$4 sm:$0xff]  }
 0x3bb   :  { %6407 = vmatpush1.bf16.msra.mxu0 %v8811_v27  ;;  %6536 = vmatpush1.bf16.msra.mxu1 %v8814_v61  ;;  %v8853_v27 = vld [vmem:[#allocation11 + $0x1f0] ss:$24 sps:$4 sm:$0xff]   ;;  %v8858_v61 = vld [vmem:[#allocation11 + $0x224] ss:$24 sps:$4 sm:$0xff]  }
 0x3bc   :  { %6408 = vmatprep.subr.bf16.mxu0 %v8819_v7  ;;  %6537 = vmatprep.subr.bf16.mxu1 %v8822_v62  ;;  %v8856_v7 = vld [vmem:[#allocation11 + $0x220] ss:$24 sps:$4 sm:$0xff]   ;;  %v8861_v62 = vld [vmem:[#allocation11 + $0x254] ss:$24 sps:$4 sm:$0xff]  }
 0x3bf   :  { %6409 = vmatpush1.bf16.msra.mxu0 %v8817_v2  ;;  %6538 = vmatpush1.bf16.msra.mxu1 %v8820_v5  ;;  %v8859_v2 = vld [vmem:[#allocation11 + $0x250] ss:$24 sps:$4 sm:$0xff]   ;;  %v8864_v5 = vld [vmem:[#allocation11 + $0x284] ss:$24 sps:$4 sm:$0xff]  }
 0x3c0   :  { %6550 = vmatprep.subr.bf16.mxu0 %v8825_v6  ;;  %v8862_v6 = vld [vmem:[#allocation11 + $0x280] ss:$24 sps:$4 sm:$0xff]  }
 0x3d1   :  { %v4381_v8 = vpop.f32.mrb[12].mxu1 }
 0x3d2   :  { %v4438_v9 = vmul.f32 2.0, %v4381_v8  ;;  %v4383_v36 = vpop.f32.mrb[13].mxu1  ;;  %v8867_v8 = vld [vmem:[#allocation11 + $0x2b4] ss:$24 sps:$4 sm:$0xff]  }
 0x3d3   :  { %v4439_v13 = vmul.f32 2.0, %v4383_v36  ;;  %v4385_v44 = vpop.f32.mrb[14].mxu1  ;;  %v8868_v36 = vld [vmem:[#allocation11 + $0x2e0] ss:$24 sps:$4 sm:$0xff]  }
 0x3d4   :  { %v4450_v16 = vsub.f32 %v9452_v19, %v4438_v9  ;;  %v4444_v17 = vmul.f32 2.0, %v4385_v44  ;;  %v4387_v21 = vpop.f32.mrb[15].mxu1  ;;  %v8865_v9 = vld [vmem:[#allocation11 + $0x2b0] ss:$24 sps:$4 sm:$0xff]   ;;  %v8876_v44 = vld [vmem:[#allocation11 + $0x344] ss:$24 sps:$4 sm:$0xff]  }
 0x3d5   :  { %v4451_v22 = vsub.f32 %v9455_v20, %v4439_v13  ;;  %v4445_v24 = vmul.f32 2.0, %v4387_v21  ;;  %v8873_v13 = vld [vmem:[#allocation11 + $0x314] ss:$24 sps:$4 sm:$0xff]   ;;  %v8877_v21 = vld [vmem:[#allocation11 + $0x370] ss:$24 sps:$4 sm:$0xff]  }
 0x3d6   :  { %v4494_v25 = vmul.f32 %v4479_v10, %v4450_v16  ;;  %v4456_v29 = vsub.f32 %v9465_v32, %v4444_v17  ;;  %v8874_v16 = vld [vmem:[#allocation11 + $0x340] ss:$24 sps:$4 sm:$0xff]   ;;  %v8879_v17 = vld [vmem:[#allocation11 + $0x374] ss:$24 sps:$4 sm:$0xff]  }
 0x3d7   :  { %v4495_v30 = vmul.f32 %v4483_v14, %v4451_v22  ;;  %v4457_v52 = vsub.f32 %v9468_v33, %v4445_v24  ;;  %v8828_v33 = vld [vmem:[#allocation11 + $0x44] ss:$24 sps:$4 sm:$0xff]   ;;  %v8880_v24 = vld [vmem:[#allocation11 + $0x3a0] ss:$24 sps:$4 sm:$0xff]  }
 0x3d8   :  { %v4510_v31 = vmul.f32 1.442695, %v4494_v25  ;;  %v4500_v63 = vmul.f32 %v4479_v10, %v4456_v29  ;;  %v8870_v10 = vld [vmem:[#allocation11 + $0x2e4] ss:$24 sps:$4 sm:$0xff]   ;;  %v8885_v25 = vld [vmem:[#allocation11 + $0x3d4] ss:$24 sps:$4 sm:$0xff]  }
 0x3d9   :  { %v4512_v11 = vmul.f32 1.442695, %v4495_v30  ;;  %v4501_v0 = vmul.f32 %v4483_v14, %v4457_v52  ;;  %v8871_v14 = vld [vmem:[#allocation11 + $0x310] ss:$24 sps:$4 sm:$0xff]   ;;  %v8882_v22 = vld [vmem:[#allocation11 + $0x3a4] ss:$24 sps:$4 sm:$0xff]  }
 0x3da   :  { %8983 = vpow2.f32 %v4510_v31  ;;  %v4522_v3 = vmul.f32 1.442695, %v4500_v63  ;;  %v8883_v29 = vld [vmem:[#allocation11 + $0x3d0] ss:$24 sps:$4 sm:$0xff]   ;;  %v8888_v30 = vld [vmem:[#allocation11 + $0x404] ss:$24 sps:$4 sm:$0xff]  }
 0x3db   :  { %8985 = vpow2.f32 %v4512_v11  ;;  %v4524_v34 = vmul.f32 1.442695, %v4501_v0  ;;  %v8891_v52 = vld [vmem:[#allocation11 + $0x434] ss:$24 sps:$4 sm:$0xff]   ;;  %v8894_v31 = vld [vmem:[#allocation11 + $0x464] ss:$24 sps:$4 sm:$0xff]  }
 0x3dc   :  { %8987 = vpow2.f32 %v4522_v3  ;;  %v8892_v63 = vld [vmem:[#allocation11 + $0x460] ss:$24 sps:$4 sm:$0xff]   ;;  %v8897_v11 = vld [vmem:[#allocation11 + $0x494] ss:$24 sps:$4 sm:$0xff]   ;;  %v8895_v0 = vld [vmem:[#allocation11 + $0x490] ss:$24 sps:$4 sm:$0xff]  }
 0x3dd   :  { %8989 = vpow2.f32 %v4524_v34  ;;  %v8900_v3 = vld [vmem:[#allocation11 + $0x4c4] ss:$24 sps:$4 sm:$0xff]   ;;  %v8898_v34 = vld [vmem:[#allocation11 + $0x4c0] ss:$24 sps:$4 sm:$0xff]  }
 0x3e4   :  { %v8984_v19 = vpop.eup %8983 }
 0x3e5   :  { %v8986_v35 = vpop.eup %8985 }
 0x3e6   :  { %v8988_v20 = vpop.eup %8987 }
 0x3e7   :  { %v8990_v58 = vpop.eup %8989  ;;  %v9507_v1 = vpack.c.bf16 %v8988_v20, %v8984_v19  ;;  %v8903_v19 = vld [vmem:[#allocation11 + $0x4f4] ss:$24 sps:$4 sm:$0xff]   ;;  %v8906_v20 = vld [vmem:[#allocation11 + $0x524] ss:$24 sps:$4 sm:$0xff]  }
 0x3e8   :  { %v9509_v32 = vpack.c.bf16 %v8990_v58, %v8986_v35  ;;  %v8901_v35 = vld [vmem:[#allocation11 + $0x4f0] ss:$24 sps:$4 sm:$0xff]   ;;  %v8904_v58 = vld [vmem:[#allocation11 + $0x520] ss:$24 sps:$4 sm:$0xff]  }
 0x3ea   :  { %6410 = vmatprep.mubr.bf16.mxu0 %v9509_v32  ;;  %6539 = vmatprep.mubr.bf16.mxu1 %v9509_v32 }
 0x3eb   :  { %6411 = vmatmul.mubr.bf16.vlgmr.msra.gmra.mrb[12].mxu0 %v9507_v1  ;;  %6540 = vmatmul.mubr.bf16.vlgmr.msra.gmra.mrb[16].mxu1 %v9507_v1 }
 0x3ec   :  { %6551 = vmatpush1.bf16.msra.mxu0 %v8823_v37  ;;  %6582 = vmatprep.mubr.bf16.mxu0 %v9472_v53  ;;  %v8841_v53 = vld [vmem:[#allocation11 + $0x130] ss:$24 sps:$4 sm:$0xff]   ;;  %v8909_v37 = vld [vmem:[#allocation11 + $0x554] ss:$24 sps:$4 sm:$0xff]  }
 0x3ed   :  { %6552 = vmatprep.subr.bf16.mxu0 %v8828_v33  ;;  %v8907_v33 = vld [vmem:[#allocation11 + $0x550] ss:$24 sps:$4 sm:$0xff]  }
 0x3f0   :  { %6553 = vmatpush1.bf16.msra.mxu0 %v8826_v39  ;;  %v8912_v39 = vld [vmem:[#allocation11 + $0x584] ss:$24 sps:$4 sm:$0xff]  }
 0x3f1   :  { %6554 = vmatprep.subr.bf16.mxu0 %v8831_v4  ;;  %v8910_v4 = vld [vmem:[#allocation11 + $0x580] ss:$24 sps:$4 sm:$0xff]  }
 0x3f4   :  { %6555 = vmatpush1.bf16.msra.mxu0 %v8829_v40  ;;  %v8915_v40 = vld [vmem:[#allocation11 + $0x5b4] ss:$24 sps:$4 sm:$0xff]  }
 0x3f5   :  { %6556 = vmatprep.subr.bf16.mxu0 %v8834_v50  ;;  %v8913_v50 = vld [vmem:[#allocation11 + $0x5b0] ss:$24 sps:$4 sm:$0xff]  }
 0x3f8   :  { %6557 = vmatpush1.bf16.msra.mxu0 %v8832_v23  ;;  %v8918_v23 = vld [vmem:[#allocation11 + $0x5e4] ss:$24 sps:$4 sm:$0xff]  }
 0x3f9   :  { %6558 = vmatprep.subr.bf16.mxu0 %v8837_v41  ;;  %v8916_v41 = vld [vmem:[#allocation11 + $0x5e0] ss:$24 sps:$4 sm:$0xff]  }
 0x3fc   :  { %6559 = vmatpush1.bf16.msra.mxu0 %v8835_v15  ;;  %v8921_v15 = vld [vmem:[#allocation11 + $0x614] ss:$24 sps:$4 sm:$0xff]  }
 0x3fd   :  { %6560 = vmatprep.subr.bf16.mxu0 %v8840_v42  ;;  %v8919_v42 = vld [vmem:[#allocation11 + $0x610] ss:$24 sps:$4 sm:$0xff]  }
 0x400   :  { %6561 = vmatpush1.bf16.msra.mxu0 %v8838_v43  ;;  %v8924_v43 = vld [vmem:[#allocation11 + $0x644] ss:$24 sps:$4 sm:$0xff]  }
 0x401   :  { %6562 = vmatprep.subr.bf16.mxu0 %v8843_v45  ;;  %v8922_v45 = vld [vmem:[#allocation11 + $0x640] ss:$24 sps:$4 sm:$0xff]  }
 0x404   :  { %6563 = vmatpush1.bf16.msra.mxu0 %v8841_v53  ;;  %v8927_v53 = vld [vmem:[#allocation11 + $0x674] ss:$24 sps:$4 sm:$0xff]  }
 0x405   :  { %6564 = vmatprep.subr.bf16.mxu0 %v8846_v46  ;;  %v8925_v46 = vld [vmem:[#allocation11 + $0x670] ss:$24 sps:$4 sm:$0xff]  }
 0x408   :  { %6565 = vmatpush1.bf16.msra.mxu0 %v8844_v47  ;;  %v8930_v47 = vld [vmem:[#allocation11 + $0x6a4] ss:$24 sps:$4 sm:$0xff]  }
 0x409   :  { %6566 = vmatprep.subr.bf16.mxu0 %v8849_v48  ;;  %v8928_v48 = vld [vmem:[#allocation11 + $0x6a0] ss:$24 sps:$4 sm:$0xff]  }
 0x40c   :  { %6567 = vmatpush1.bf16.msra.mxu0 %v8847_v38  ;;  %v8933_v38 = vld [vmem:[#allocation11 + $0x6d4] ss:$24 sps:$4 sm:$0xff]  }
 0x40d   :  { %6568 = vmatprep.subr.bf16.mxu0 %v8852_v49  ;;  %v8931_v49 = vld [vmem:[#allocation11 + $0x6d0] ss:$24 sps:$4 sm:$0xff]  }
 0x410   :  { %6569 = vmatpush1.bf16.msra.mxu0 %v8850_v54  ;;  %v8936_v54 = vld [vmem:[#allocation11 + $0x704] ss:$24 sps:$4 sm:$0xff]  }
 0x411   :  { %6570 = vmatprep.subr.bf16.mxu0 %v8855_v57  ;;  %v8939_v57 = vld [vmem:[#allocation11 + $0x734] ss:$24 sps:$4 sm:$0xff]  }
 0x414   :  { %6571 = vmatpush1.bf16.msra.mxu0 %v8853_v27  ;;  %v8942_v27 = vld [vmem:[#allocation11 + $0x764] ss:$24 sps:$4 sm:$0xff]  }
 0x415   :  { %6572 = vmatprep.subr.bf16.mxu0 %v8858_v61  ;;  %v8940_v61 = vld [vmem:[#allocation11 + $0x760] ss:$24 sps:$4 sm:$0xff]  }
 0x418   :  { %6573 = vmatpush1.bf16.msra.mxu0 %v8856_v7  ;;  %v8945_v7 = vld [vmem:[#allocation11 + $0x794] ss:$24 sps:$4 sm:$0xff]  }
 0x419   :  { %6574 = vmatprep.subr.bf16.mxu0 %v8861_v62  ;;  %v8943_v62 = vld [vmem:[#allocation11 + $0x790] ss:$24 sps:$4 sm:$0xff]  }
 0x41c   :  { %6575 = vmatpush1.bf16.msra.mxu0 %v8859_v2  ;;  %v8948_v2 = vld [vmem:[#allocation11 + $0x7c4] ss:$24 sps:$4 sm:$0xff]  }
 0x41d   :  { %6576 = vmatprep.subr.bf16.mxu0 %v8864_v5  ;;  %v8946_v5 = vld [vmem:[#allocation11 + $0x7c0] ss:$24 sps:$4 sm:$0xff]  }
 0x420   :  { %6577 = vmatpush1.bf16.msra.mxu0 %v8862_v6  ;;  %v8951_v6 = vld [vmem:[#allocation11 + $0x7f4] ss:$24 sps:$4 sm:$0xff]  }
 0x421   :  { %6578 = vmatprep.subr.bf16.mxu0 %v8867_v8  ;;  %v8949_v8 = vld [vmem:[#allocation11 + $0x7f0] ss:$24 sps:$4 sm:$0xff]  }
 0x424   :  { %6579 = vmatpush1.bf16.msra.mxu0 %v8865_v9  ;;  %v8954_v9 = vld [vmem:[#allocation11 + $0x824] ss:$24 sps:$4 sm:$0xff]  }
 0x425   :  { %6580 = vmatprep.subr.bf16.mxu0 %v8870_v10  ;;  %v8952_v10 = vld [vmem:[#allocation11 + $0x820] ss:$24 sps:$4 sm:$0xff]  }
 0x428   :  { %6581 = vmatpush1.bf16.msra.mxu0 %v8868_v36  ;;  %v8957_v36 = vld [vmem:[#allocation11 + $0x854] ss:$24 sps:$4 sm:$0xff]  }
 0x429   :  { %6593 = vmatprep.subr.bf16.mxu0 %v8873_v13  ;;  %v8955_v13 = vld [vmem:[#allocation11 + $0x850] ss:$24 sps:$4 sm:$0xff]  }
 0x42b   :  { %6583 = vmatmul.mubr.bf16.vlgmr.msra.gmra.mrb[16].mxu0 %v9470_v51  ;;  %v8886_v51 = vld [vmem:[#allocation11 + $0x400] ss:$24 sps:$4 sm:$0xff]  }
 0x42c   :  { %6594 = vmatpush1.bf16.msra.mxu0 %v8871_v14  ;;  %6625 = vmatprep.mubr.bf16.mxu0 %v9493_v28  ;;  %v8889_v28 = vld [vmem:[#allocation11 + $0x430] ss:$24 sps:$4 sm:$0xff]   ;;  %v8960_v14 = vld [vmem:[#allocation11 + $0x884] ss:$24 sps:$4 sm:$0xff]  }
 0x42d   :  { %6595 = vmatprep.subr.bf16.mxu0 %v8876_v44  ;;  %v8958_v44 = vld [vmem:[#allocation11 + $0x880] ss:$24 sps:$4 sm:$0xff]  }
 0x430   :  { %6596 = vmatpush1.bf16.msra.mxu0 %v8874_v16  ;;  %v8963_v16 = vld [vmem:[#allocation11 + $0x8b4] ss:$24 sps:$4 sm:$0xff]  }
 0x431   :  { %6597 = vmatprep.subr.bf16.mxu0 %v8879_v17  ;;  %v8961_v17 = vld [vmem:[#allocation11 + $0x8b0] ss:$24 sps:$4 sm:$0xff]  }
 0x434   :  { %6598 = vmatpush1.bf16.msra.mxu0 %v8877_v21  ;;  %v8966_v21 = vld [vmem:[#allocation11 + $0x8e4] ss:$24 sps:$4 sm:$0xff]  }
 0x435   :  { %6599 = vmatprep.subr.bf16.mxu0 %v8882_v22  ;;  %v8964_v22 = vld [vmem:[#allocation11 + $0x8e0] ss:$24 sps:$4 sm:$0xff]  }
 0x438   :  { %6600 = vmatpush1.bf16.msra.mxu0 %v8880_v24  ;;  %v4820_v24 = vld [vmem:[#allocation13] sm:$0x3f] }
 0x439   :  { %6601 = vmatprep.subr.bf16.mxu0 %v8885_v25  ;;  %v4825_v25 = vrot.slane %v4820_v24, %v9412_v12 }
 0x43c   :  { %6602 = vmatpush1.bf16.msra.mxu0 %v8883_v29  ;;  %v4833_v29 = vrot.slane %v4820_v24, %v9418_v55 }
 0x43d   :  { %6603 = vmatprep.subr.bf16.mxu0 %v8888_v30  ;;  %v4829_v30 = vrot.slane %v4820_v24, %v9415_v56 }
 0x440   :  { %6604 = vmatpush1.bf16.msra.mxu0 %v8886_v51  ;;  %v4837_v51 = vrot.slane %v4820_v24, %v9479_v18 }
 0x441   :  { %6605 = vmatprep.subr.bf16.mxu0 %v8891_v52 }
 0x444   :  { %6606 = vmatpush1.bf16.msra.mxu0 %v8889_v28 }
 0x445   :  { %6607 = vmatprep.subr.bf16.mxu0 %v8894_v31 }
 0x448   :  { %6608 = vmatpush1.bf16.msra.mxu0 %v8892_v63 }
 0x449   :  { %6609 = vmatprep.subr.bf16.mxu0 %v8897_v11 }
 0x44c   :  { %6610 = vmatpush1.bf16.msra.mxu0 %v8895_v0 }
 0x44d   :  { %6611 = vmatprep.subr.bf16.mxu0 %v8900_v3 }
 0x450   :  { %6612 = vmatpush1.bf16.msra.mxu0 %v8898_v34 }
 0x451   :  { %6613 = vmatprep.subr.bf16.mxu0 %v8903_v19 }
 0x454   :  { %6614 = vmatpush1.bf16.msra.mxu0 %v8901_v35 }
 0x455   :  { %6615 = vmatprep.subr.bf16.mxu0 %v8906_v20 }
 0x458   :  { %6616 = vmatpush1.bf16.msra.mxu0 %v8904_v58  ;;  %v4841_v58 = vrot.slane %v4820_v24, %v9423_v59 }
 0x459   :  { %6617 = vmatprep.subr.bf16.mxu0 %v8909_v37  ;;  %v4845_v37 = vrot.slane %v4820_v24, %v9426_v60 }
 0x45c   :  { %6618 = vmatpush1.bf16.msra.mxu0 %v8907_v33 }
 0x45d   :  { %6619 = vmatprep.subr.bf16.mxu0 %v8912_v39 }
 0x460   :  { %6620 = vmatpush1.bf16.msra.mxu0 %v8910_v4 }
 0x461   :  { %6621 = vmatprep.subr.bf16.mxu0 %v8915_v40 }
 0x464   :  { %6622 = vmatpush1.bf16.msra.mxu0 %v8913_v50 }
 0x465   :  { %6623 = vmatprep.subr.bf16.mxu0 %v8918_v23 }
 0x468   :  { %6624 = vmatpush1.bf16.msra.mxu0 %v8916_v41 }
 0x469   :  { %6636 = vmatprep.subr.bf16.mxu0 %v8921_v15 }
 0x46b   :  { %6626 = vmatmul.mubr.bf16.vlgmr.msra.gmra.mrb[16].mxu0 %v9491_v26  ;;  %v8934_v26 = vld [vmem:[#allocation11 + $0x700] ss:$24 sps:$4 sm:$0xff]  }
 0x46c   :  { %6637 = vmatpush1.bf16.msra.mxu0 %v8919_v42  ;;  %6668 = vmatprep.mubr.bf16.mxu0 %v9509_v32  ;;  %v8937_v32 = vld [vmem:[#allocation11 + $0x730] ss:$24 sps:$4 sm:$0xff]  }
 0x46d   :  { %6638 = vmatprep.subr.bf16.mxu0 %v8924_v43 }
 0x470   :  { %6639 = vmatpush1.bf16.msra.mxu0 %v8922_v45 }
 0x471   :  { %6640 = vmatprep.subr.bf16.mxu0 %v8927_v53 }
 0x474   :  { %6641 = vmatpush1.bf16.msra.mxu0 %v8925_v46 }
 0x475   :  { %6642 = vmatprep.subr.bf16.mxu0 %v8930_v47 }
 0x478   :  { %6643 = vmatpush1.bf16.msra.mxu0 %v8928_v48 }
 0x479   :  { %6644 = vmatprep.subr.bf16.mxu0 %v8933_v38 }
 0x47c   :  { %6645 = vmatpush1.bf16.msra.mxu0 %v8931_v49 }
 0x47d   :  { %6646 = vmatprep.subr.bf16.mxu0 %v8936_v54 }
 0x480   :  { %6647 = vmatpush1.bf16.msra.mxu0 %v8934_v26 }
 0x481   :  { %6648 = vmatprep.subr.bf16.mxu0 %v8939_v57 }
 0x484   :  { %6649 = vmatpush1.bf16.msra.mxu0 %v8937_v32 }
 0x485   :  { %6650 = vmatprep.subr.bf16.mxu0 %v8942_v27 }
 0x488   :  { %6651 = vmatpush1.bf16.msra.mxu0 %v8940_v61 }
 0x489   :  { %6652 = vmatprep.subr.bf16.mxu0 %v8945_v7 }
 0x48c   :  { %6653 = vmatpush1.bf16.msra.mxu0 %v8943_v62 }
 0x48d   :  { %6654 = vmatprep.subr.bf16.mxu0 %v8948_v2 }
 0x490   :  { %6655 = vmatpush1.bf16.msra.mxu0 %v8946_v5 }
 0x491   :  { %6656 = vmatprep.subr.bf16.mxu0 %v8951_v6 }
 0x494   :  { %6657 = vmatpush1.bf16.msra.mxu0 %v8949_v8 }
 0x495   :  { %6658 = vmatprep.subr.bf16.mxu0 %v8954_v9 }
 0x498   :  { %6659 = vmatpush1.bf16.msra.mxu0 %v8952_v10 }
 0x499   :  { %6660 = vmatprep.subr.bf16.mxu0 %v8957_v36 }
 0x49c   :  { %6661 = vmatpush1.bf16.msra.mxu0 %v8955_v13 }
 0x49d   :  { %6662 = vmatprep.subr.bf16.mxu0 %v8960_v14 }
 0x4a0   :  { %6663 = vmatpush1.bf16.msra.mxu0 %v8958_v44 }
 0x4a1   :  { %6664 = vmatprep.subr.bf16.mxu0 %v8963_v16 }
 0x4a4   :  { %6665 = vmatpush1.bf16.msra.mxu0 %v8961_v17 }
 0x4a5   :  { %6666 = vmatprep.subr.bf16.mxu0 %v8966_v21 }
 0x4a8   :  { %6667 = vmatpush1.bf16.msra.mxu0 %v8964_v22 }
 0x4ab   :  { %6669 = vmatmul.mubr.bf16.vlgmr.msra.gmra.mrb[16].mxu0 %v9507_v1 }
 0x4be   :  { %v6412_v52 = vpop.f32.mrb[12].mxu0  ;;  %v6541_v28 = vpop.f32.mrb[16].mxu1 }
 0x4bf   :  { %v7579_v31 = vadd.f32 %v6412_v52, %v4825_v25  ;;  %v7583_v63 = vadd.f32 %v6541_v28, %v4833_v29  ;;  %v6414_v11 = vpop.f32.mrb[13].mxu0  ;;  %v6543_v0 = vpop.f32.mrb[17].mxu1 }
 0x4c0   :  { %v7580_v3 = vadd.f32 %v6414_v11, %v4829_v30  ;;  %v7584_v34 = vadd.f32 %v6543_v0, %v4837_v51  ;;  %v6416_v19 = vpop.f32.mrb[14].mxu0  ;;  %v6545_v35 = vpop.f32.mrb[18].mxu1 }
 0x4c1   :  { %6679 = vst [vmem:[#allocation14] sm:$0xff] %v7579_v31  ;;  %6681 = vst [vmem:[#allocation14 + $0x10] sm:$0xff] %v7583_v63  ;;  %v7581_v1 = vadd.f32 %v6416_v19, %v4825_v25  ;;  %v7585_v12 = vadd.f32 %v6545_v35, %v4833_v29  ;;  %v6418_v20 = vpop.f32.mrb[15].mxu0  ;;  %v6547_v55 = vpop.f32.mrb[19].mxu1 }
 0x4c2   :  { %6680 = vst [vmem:[#allocation14 + $0x8] sm:$0xff] %v7580_v3  ;;  %6682 = vst [vmem:[#allocation14 + $0x18] sm:$0xff] %v7584_v34  ;;  %v7582_v56 = vadd.f32 %v6418_v20, %v4829_v30  ;;  %v7586_v18 = vadd.f32 %v6547_v55, %v4837_v51 }
 0x4c3   :  { %6685 = vst [vmem:[#allocation14 + $0x30] sm:$0xff] %v7581_v1  ;;  %6687 = vst [vmem:[#allocation14 + $0x40] sm:$0xff] %v7585_v12 }
 0x4c4   :  { %6686 = vst [vmem:[#allocation14 + $0x38] sm:$0xff] %v7582_v56  ;;  %6688 = vst [vmem:[#allocation14 + $0x48] sm:$0xff] %v7586_v18 }
 0x57e   :  { %v6670_v33 = vpop.f32.mrb[16].mxu0 }
 0x57f   :  { %v7587_v39 = vadd.f32 %v6670_v33, %v4841_v58  ;;  %v6672_v4 = vpop.f32.mrb[17].mxu0 }
 0x580   :  { %v7588_v40 = vadd.f32 %v6672_v4, %v4845_v37  ;;  %v6674_v50 = vpop.f32.mrb[18].mxu0 }
 0x581   :  { %6683 = vst [vmem:[#allocation14 + $0x20] sm:$0xff] %v7587_v39  ;;  %v7589_v23 = vadd.f32 %v6674_v50, %v4841_v58  ;;  %v6676_v41 = vpop.f32.mrb[19].mxu0 }
 0x582   :  { %6684 = vst [vmem:[#allocation14 + $0x28] sm:$0xff] %v7588_v40  ;;  %v7590_v15 = vadd.f32 %v6676_v41, %v4845_v37 }
 0x583   :  { %6689 = vst [vmem:[#allocation14 + $0x50] sm:$0xff] %v7589_v23 }
 0x584   :  { %6690 = vst [vmem:[#allocation14 + $0x58] sm:$0xff] %v7590_v15 }
 0x585   :  { %9168 = shalt.err (!%p9165_p4)
}
 0x586   :  { %s9169_s19 = scalar_lea.hbm %s9549_s7, 1536 }
 0x587   :  { %p9170_p5 = scmp.ne.s32.totalorder %s9549_s7, %s9169_s19  ;;  %p9173_p6 = scmp.lt.u32.totalorder %s9169_s19, %s9549_s7 }
 0x589   :  { %p9175_p7 = pnand %p9173_p6, %p9170_p5 }
 0x58b   :  { %9178 = shalt.err (!%p9175_p7)
}
 0x58c   :  { %6702 = dma.vmem_to_hbm [thread:$0]  %s6697_s15, 1536, %s9549_s7, [#allocation4], %s9195_s5, %s9195_s5, %s9196_s18  }
 0x58d   :  { %9187 = dma.done.wait [#allocation4], 1536  }
 0x58e   :  { %9188 = vsyncadd [#allocation4], 4294965760 }
 0x58f   :  { %6706 = vsyncpa [#allocation3], 1 }
 0x590   :  { %6707 = vsyncpa [#allocation6], 1 }
 0x591   :  { %6708 = vsyncpa [#allocation9], 1 }
 0x592   :  { %6709 = vsyncpa [#allocation12], 1 }
 0x593   :  { %6710 = vsyncpa [#allocation4], 1 }

</bundles_post_ra>
